<compile_context>
chip_gen: v6e
topology: v6e:2x2x1
jax: 0.10.0
libtpu: 0.0.40
codegen_flags: <defaults>
</compile_context>

<pallas_src>
import functools

import jax
import jax.numpy as jnp
from jax.experimental import pallas as pl
from jax.experimental.pallas import tpu as pltpu

LEAKY_SLOPE = 0.2
BN_EPS = 1e-5
LANE = 128          # TPU lane width: Cout padded to a multiple of this
KTAPS = 16          # every conv in this model is 4x4 -> 16 taps


def _ceil_to(x, m):
    return (x + m - 1) // m * m


@functools.lru_cache(maxsize=None)
def _vmem_limit_bytes():
    """Generation-aware VMEM request: ~3/4 of physical, capped at 96 MiB."""
    cap = 64 * 1024 * 1024  # safe default (v7x physical per-TC)
    try:
        info = pltpu.get_tpu_info()
        cap = int(getattr(info, "vmem_capacity_bytes", cap)) or cap
    except Exception:
        pass
    return min((cap * 3) // 4, 96 * 1024 * 1024)


def _pick_tm(m_rows, k, n_pad, out_bytes, budget, prologue):
    """Largest legal row tile whose block footprint fits in `budget` bytes.

    K-aware: small-K (mem-bound) layers get very large tiles (up to 8192 rows);
    big-K layers are shrunk so double-buffered A/out blocks + weights + the
    prologue/epilogue f32 temporaries stay inside the VMEM limit.
    """
    fixed = 2 * (k * n_pad * 2) + 2 * 2 * (k * 4)            # bf16 weights (x2 bufs) + scale/shift
    per_row = 2 * (k * 2 + n_pad * out_bytes) + n_pad * 8    # A/out blocks + f32 epilogue temps
    if prologue:
        per_row += 6 * k                                     # f32 + bf16 prologue temporaries
    cap = max((budget - fixed) // per_row, 8)
    cap = min(cap, 8192, m_rows)
    if m_rows >= 64:
        # keep at least 2 row steps so input DMA / output writeback overlap compute
        cap = min(cap, max((m_rows // 2) // 8 * 8, 8))
    if m_rows <= cap:
        return m_rows
    t = (cap // 8) * 8
    while t >= 8:
        if m_rows % t == 0:
            return t
        t -= 8
    # TODO(synk): ragged M (no divisor that is a multiple of 8) -> pad M in production.
    return m_rows


# ---------------------------------------------------------------------------
# The one conv kernel: optional BN+LeakyReLU prologue on the A (patch) tile,
# MXU matmul with f32 accumulation, optional fused activation epilogue and
# optional fused BatchNorm batch-statistics epilogue (accumulated directly
# into resident output refs).
# ---------------------------------------------------------------------------
def _make_conv_kernel(prologue, act, with_stats):
    def kernel(*refs):
        it = iter(refs)
        a_ref = next(it)
        b_ref = next(it)
        scale_ref = shift_ref = None
        if prologue:
            scale_ref = next(it)
            shift_ref = next(it)
        y_ref = next(it)
        sum_ref = sq_ref = None
        if with_stats:
            sum_ref = next(it)
            sq_ref = next(it)

        a = a_ref[...]
        if prologue:
            # Folded BatchNorm (previous layer) + LeakyReLU, applied per patch column.
            af = a.astype(jnp.float32) * scale_ref[...] + shift_ref[...]
            af = jnp.where(af > 0, af, LEAKY_SLOPE * af)
            a = af.astype(jnp.bfloat16)

        acc = jnp.dot(a, b_ref[...], preferred_element_type=jnp.float32)

        if with_stats:
            # Stats ride on VPU/XLU while the MXU is busy; accumulated directly into the
            # resident (constant block index along the row axis) output refs.
            # NOTE(v5e): on small-K layers this epilogue can become the binding slot —
            # profile and drop to large-K layers only if slot_util confirms it.
            @pl.when(pl.program_id(1) == 0)
            def _init():
                sum_ref[...] = jnp.zeros_like(sum_ref)
                sq_ref[...] = jnp.zeros_like(sq_ref)

            sum_ref[...] += jnp.sum(acc, axis=0, keepdims=True)
            sq_ref[...] += jnp.sum(acc * acc, axis=0, keepdims=True)

        if act == "leaky":
            acc = jnp.where(acc > 0, acc, LEAKY_SLOPE * acc)
        elif act == "sigmoid":
            acc = jax.nn.sigmoid(acc)
        y_ref[...] = acc.astype(y_ref.dtype)

    return kernel


def conv_matmul(a, b, *, prologue=None, act="none", with_stats=False,
                out_dtype=jnp.bfloat16):
    m, k = a.shape
    _, n_pad = b.shape  # already lane-padded to a multiple of 128
    out_bytes = jnp.dtype(out_dtype).itemsize
    vmem_limit = _vmem_limit_bytes()
    block_budget = (vmem_limit * 3) // 4

    kernel = _make_conv_kernel(prologue is not None, act, with_stats)

    if with_stats:
        # Two row-groups let v7x's 2 TensorCores each own one stats partial sum.
        groups = 2 if m % 16 == 0 else 1
        m_group = m // groups
        tm = _pick_tm(m_group, k, n_pad, out_bytes, block_budget, prologue is not None)
        steps = m_group // tm

        in_specs = [
            pl.BlockSpec((tm, k), lambda i, j: (i * steps + j, 0)),
            pl.BlockSpec((k, n_pad), lambda i, j: (0, 0)),
        ]
        args = [a, b]
        if prologue is not None:
            in_specs += [
                pl.BlockSpec((1, k), lambda i, j: (0, 0)),
                pl.BlockSpec((1, k), lambda i, j: (0, 0)),
            ]
            args += [prologue[0], prologue[1]]

        # Stats outputs: (groups, 8, n_pad) so the per-group block keeps (8, 128)-aligned
        # last-two dims; row 0 carries the real partial sum (rows broadcast-accumulated).
        out_shape = (
            jax.ShapeDtypeStruct((m, n_pad), out_dtype),
            jax.ShapeDtypeStruct((groups, 8, n_pad), jnp.float32),
            jax.ShapeDtypeStruct((groups, 8, n_pad), jnp.float32),
        )
        out_specs = (
            pl.BlockSpec((tm, n_pad), lambda i, j: (i * steps + j, 0)),
            pl.BlockSpec((1, 8, n_pad), lambda i, j: (i, 0, 0)),
            pl.BlockSpec((1, 8, n_pad), lambda i, j: (i, 0, 0)),
        )
        grid = (groups, steps)
        sem = ("parallel", "arbitrary")
    else:
        tm = _pick_tm(m, k, n_pad, out_bytes, block_budget, prologue is not None)
        steps = m // tm

        in_specs = [
            pl.BlockSpec((tm, k), lambda i: (i, 0)),
            pl.BlockSpec((k, n_pad), lambda i: (0, 0)),
        ]
        args = [a, b]
        if prologue is not None:
            in_specs += [
                pl.BlockSpec((1, k), lambda i: (0, 0)),
                pl.BlockSpec((1, k), lambda i: (0, 0)),
            ]
            args += [prologue[0], prologue[1]]

        out_shape = jax.ShapeDtypeStruct((m, n_pad), out_dtype)
        out_specs = pl.BlockSpec((tm, n_pad), lambda i: (i, 0))
        grid = (steps,)
        sem = ("parallel",)

    return pl.pallas_call(
        kernel,
        out_shape=out_shape,
        grid_spec=pltpu.PrefetchScalarGridSpec(
            num_scalar_prefetch=0,
            grid=grid,
            in_specs=in_specs,
            out_specs=out_specs,
        ),
        compiler_params=pltpu.CompilerParams(
            dimension_semantics=sem,
            vmem_limit_bytes=vmem_limit,
        ),
    )(*args)


# ---------------------------------------------------------------------------
# Wrapper glue: canvas construction (spatial pad with per-channel BN-neutral
# values) + im2col gather (bf16), kept lazy/fusible for XLA.
# ---------------------------------------------------------------------------
def make_canvas(y_slab, n, oh, ow, cout, pad, pad_vals=None):
    """(m, n_pad) slab -> (n, oh+2p, ow+2p, cout) NHWC canvas.

    The reshape is free (contiguous); the :cout slice is lazy so XLA fuses it into the
    pad/gather.  `pad_vals` (per-channel -shift/scale) makes the padded border map to
    ~0 after the next kernel's folded BN+LeakyReLU prologue.
    """
    x = y_slab.reshape(n, oh, ow, -1)[..., :cout]
    if pad == 0:
        return x
    if pad_vals is None:
        return jnp.pad(x, ((0, 0), (pad, pad), (pad, pad), (0, 0)))
    canvas = jnp.broadcast_to(
        pad_vals.astype(x.dtype)[None, None, None, :],
        (n, oh + 2 * pad, ow + 2 * pad, cout))
    return canvas.at[:, pad:pad + oh, pad:pad + ow, :].set(x)


def im2col(canvas, ksize, stride):
    """Canvas is already spatially padded.  Columns ordered (kh, kw, cin), cin fastest."""
    n, hp, wp, c = canvas.shape
    oh = (hp - ksize) // stride + 1
    ow = (wp - ksize) // stride + 1
    cols = []
    for kh in range(ksize):
        for kw in range(ksize):
            cols.append(
                canvas[:,
                       kh:kh + (oh - 1) * stride + 1:stride,
                       kw:kw + (ow - 1) * stride + 1:stride,
                       :])
    patches = jnp.concatenate(cols, axis=-1)            # (N, OH, OW, KH*KW*C)
    return patches.reshape(n * oh * ow, ksize * ksize * c).astype(jnp.bfloat16), (n, oh, ow)


def conv_layer(canvas, w_torch, stride, *, prologue=None, act="none",
               with_stats=False, out_dtype=jnp.bfloat16):
    cout, cin, kh, kw = w_torch.shape
    a, (n, oh, ow) = im2col(canvas, kh, stride)
    n_pad = _ceil_to(max(cout, LANE), LANE)
    # PyTorch (Cout, Cin, KH, KW) -> (KH*KW*Cin, Cout_pad), matching the patch column order.
    b = jnp.transpose(w_torch, (2, 3, 1, 0)).reshape(kh * kw * cin, cout)
    b = jnp.pad(b, ((0, 0), (0, n_pad - cout))).astype(jnp.bfloat16)
    out = conv_matmul(a, b, prologue=prologue, act=act,
                      with_stats=with_stats, out_dtype=out_dtype)
    return out, (n, oh, ow, cout, n_pad)


def init_params(key, f=8):
    channel_pairs = [(3, f), (f, 2 * f), (2 * f, 4 * f), (4 * f, 8 * f), (8 * f, 1)]
    keys = jax.random.split(key, len(channel_pairs))
    ws = [
        0.02 * jax.random.normal(k, (cout, cin, 4, 4), jnp.float32)
        for k, (cin, cout) in zip(keys, channel_pairs)
    ]
    # All convs in the reference use bias=False.  BatchNorm2d gamma=1, beta=0 (fresh init).
    bns = [
        (jnp.ones((cout,), jnp.float32), jnp.zeros((cout,), jnp.float32))
        for (_, cout) in channel_pairs[1:4]
    ]
    return ws, bns


def discriminator_forward(x_nchw, ws, bns):
    # NCHW f32 -> NHWC bf16, zero-pad for conv1 (raw input: zero pad is exact).
    x = jnp.transpose(x_nchw, (0, 2, 3, 1)).astype(jnp.bfloat16)
    canvas = jnp.pad(x, ((0, 0), (1, 1), (1, 1), (0, 0)))

    # conv1 (3 -> f, k4 s2 p1) + LeakyReLU(0.2) fused in the epilogue.
    y, (n, oh, ow, cout, n_pad) = conv_layer(canvas, ws[0], 2, act="leaky")
    canvas = make_canvas(y, n, oh, ow, cout, pad=1)  # already activated, plain zero pad

    # conv2..conv4 (k4 s2 p1): raw conv + fused batch stats; the BN(batch)+LeakyReLU of
    # each layer is folded into the NEXT conv's A-tile prologue.
    scale_shift = None
    for li in range(3):
        (y, s, sq), (n, oh, ow, cout, n_pad) = conv_layer(
            canvas, ws[1 + li], 2, prologue=scale_shift, with_stats=True)
        m = y.shape[0]
        tot = jnp.sum(s[:, 0, :], axis=0)    # per-core partials summed
        tot2 = jnp.sum(sq[:, 0, :], axis=0)
        mean = tot[:cout] / m
        # NOTE: E[x^2]-E[x]^2 in f32 (clamped); fine for a forward pass on fresh activations.
        var = jnp.maximum(tot2[:cout] / m - mean * mean, 0.0)
        gamma, beta = bns[li]
        scale_c = gamma * jax.lax.rsqrt(var + BN_EPS)    # gamma=1 here -> scale > 0
        shift_c = beta - mean * scale_c
        # Fold BN + LeakyReLU into the next conv's prologue: per-channel values tiled
        # over the 16 taps to match the (kh, kw, cin) patch column order.
        scale_k = jnp.tile(scale_c, KTAPS)[None, :].astype(jnp.float32)
        shift_k = jnp.tile(shift_c, KTAPS)[None, :].astype(jnp.float32)
        scale_shift = (scale_k, shift_k)
        pad_here = 1 if li < 2 else 0                    # conv3/conv4 pad=1, conv5 pad=0
        pad_vals = -(shift_c / scale_c)                  # affine+leaky image ~= 0
        canvas = make_canvas(y, n, oh, ow, cout, pad=pad_here, pad_vals=pad_vals)

    # conv5 (8f -> 1, k4 s1 p0) + Sigmoid, f32 out; conv4's BN+LeakyReLU in the prologue.
    y, (n, oh, ow, cout, n_pad) = conv_layer(
        canvas, ws[4], 1, prologue=scale_shift, act="sigmoid", out_dtype=jnp.float32)
    # output.view(-1, 1); OH=OW=Cout=1 so orderings coincide.
    return y[:, :1].reshape(n * oh * ow, 1)


if __name__ == "__main__":
    key = jax.random.PRNGKey(0)
    kx, kp = jax.random.split(key)

    f = 8  # small feature width for the synthetic run (module default is 64)
    # The DCGAN discriminator stack implies 64x64 spatial input (-> 1x1 after conv5).
    x = jax.random.normal(kx, (2, 3, 64, 64), jnp.float32)  # NCHW, as PyTorch
    ws, bns = init_params(kp, f=f)

    fwd = jax.jit(discriminator_forward)
    out = jax.block_until_ready(fwd(x, ws, bns))

    assert out.shape == (2, 1), out.shape
    assert bool(jnp.all(jnp.isfinite(out)))
    assert bool(jnp.all((out >= 0.0) & (out <= 1.0)))  # post-sigmoid range
    print("KERNEL_OK")
</pallas_src>

<mosaic_0001>
module attributes {stable_mosaic.version = 11 : i64} {
  func.func @kernel(%arg0: i32, %arg1: memref<1024x48xbf16, #tpu.memory_space<vmem>>, %arg2: memref<48x128xbf16, #tpu.memory_space<vmem>>, %arg3: memref<1024x128xbf16, #tpu.memory_space<vmem>>) attributes {dimension_semantics = [#tpu.dimension_semantics<parallel>], iteration_bounds = array<i64: 2>, scalar_prefetch = 0 : i64, scratch_operands = 0 : i64, tpu.core_type = #tpu.core_type<tc>, window_params = [{transform_indices = @transform_0, window_bounds = array<i64: 1024, 48>}, {pipeline_mode = #tpu.pipeline_mode<synchronous>, transform_indices = @transform_1, window_bounds = array<i64: 48, 128>}, {transform_indices = @transform_2, window_bounds = array<i64: 1024, 128>}]} {
    %c0 = arith.constant 0 : index
    %c0_0 = arith.constant 0 : index
    %0 = vector.load %arg1[%c0, %c0_0] : memref<1024x48xbf16, #tpu.memory_space<vmem>>, vector<1024x48xbf16>
    %c0_1 = arith.constant 0 : index
    %c0_2 = arith.constant 0 : index
    %1 = vector.load %arg2[%c0_1, %c0_2] : memref<48x128xbf16, #tpu.memory_space<vmem>>, vector<48x128xbf16>
    %cst = arith.constant dense<0.000000e+00> : vector<1024x128xf32>
    %2 = tpu.matmul %0, %1, %cst {dimension_numbers = #tpu.dot_dimension_numbers<[1], [0], [0], [1], [0, 0, 1, 1], [], []>} : vector<1024x48xbf16>, vector<48x128xbf16>, vector<1024x128xf32> -> vector<1024x128xf32>
    %cst_3 = arith.constant 0.000000e+00 : f32
    %3 = vector.broadcast %cst_3 : f32 to vector<1024x128xf32>
    %4 = arith.cmpf ogt, %2, %3 : vector<1024x128xf32>
    %cst_4 = arith.constant 2.000000e-01 : f32
    %5 = vector.broadcast %cst_4 : f32 to vector<1024x128xf32>
    %6 = arith.mulf %5, %2 : vector<1024x128xf32>
    %7 = arith.select %4, %2, %6 : vector<1024x128xi1>, vector<1024x128xf32>
    %8 = arith.truncf %7 : vector<1024x128xf32> to vector<1024x128xbf16>
    %c0_5 = arith.constant 0 : index
    %c0_6 = arith.constant 0 : index
    %9 = vector.load %arg3[%c0_5, %c0_6] : memref<1024x128xbf16, #tpu.memory_space<vmem>>, vector<1024x128xbf16>
    tpu.vector_store %arg3[%c0_5, %c0_6], %8 {strides = array<i32>} : memref<1024x128xbf16, #tpu.memory_space<vmem>>, vector<1024x128xbf16>,
    return
  }
  func.func @transform_0(%arg0: i32) -> (i32, i32) {
    %c0_i32 = arith.constant 0 : i32
    %c0_i32_0 = arith.constant 0 : i32
    return %arg0, %c0_i32 : i32, i32
  }
  func.func @transform_1(%arg0: i32) -> (i32, i32) {
    %c0_i32 = arith.constant 0 : i32
    %c0_i32_0 = arith.constant 0 : i32
    %c0_i32_1 = arith.constant 0 : i32
    return %c0_i32, %c0_i32_0 : i32, i32
  }
  func.func @transform_2(%arg0: i32) -> (i32, i32) {
    %c0_i32 = arith.constant 0 : i32
    %c0_i32_0 = arith.constant 0 : i32
    return %arg0, %c0_i32 : i32, i32
  }
}

module attributes {stable_mosaic.version = 11 : i64} {
  func.func @kernel(%arg0: i32, %arg1: i32, %arg2: memref<128x128xbf16, #tpu.memory_space<vmem>>, %arg3: memref<128x128xbf16, #tpu.memory_space<vmem>>, %arg4: memref<128x128xbf16, #tpu.memory_space<vmem>>, %arg5: memref<1x8x128xf32, #tpu.memory_space<vmem>>, %arg6: memref<1x8x128xf32, #tpu.memory_space<vmem>>) attributes {dimension_semantics = [#tpu.dimension_semantics<parallel>, #tpu.dimension_semantics<arbitrary>], iteration_bounds = array<i64: 2, 2>, scalar_prefetch = 0 : i64, scratch_operands = 0 : i64, tpu.core_type = #tpu.core_type<tc>, window_params = [{transform_indices = @transform_0, window_bounds = array<i64: 128, 128>}, {pipeline_mode = #tpu.pipeline_mode<synchronous>, transform_indices = @transform_1, window_bounds = array<i64: 128, 128>}, {transform_indices = @transform_2, window_bounds = array<i64: 128, 128>}, {transform_indices = @transform_3, window_bounds = array<i64: 1, 8, 128>}, {transform_indices = @transform_4, window_bounds = array<i64: 1, 8, 128>}]} {
    %c0 = arith.constant 0 : index
    %c0_0 = arith.constant 0 : index
    %0 = vector.load %arg2[%c0, %c0_0] : memref<128x128xbf16, #tpu.memory_space<vmem>>, vector<128x128xbf16>
    %c0_1 = arith.constant 0 : index
    %c0_2 = arith.constant 0 : index
    %1 = vector.load %arg3[%c0_1, %c0_2] : memref<128x128xbf16, #tpu.memory_space<vmem>>, vector<128x128xbf16>
    %cst = arith.constant dense<0.000000e+00> : vector<128x128xf32>
    %2 = tpu.matmul %0, %1, %cst {dimension_numbers = #tpu.dot_dimension_numbers<[1], [0], [0], [1], [0, 0, 1, 1], [], []>} : vector<128x128xbf16>, vector<128x128xbf16>, vector<128x128xf32> -> vector<128x128xf32>
    %c0_i32 = arith.constant 0 : i32
    %3 = arith.cmpi eq, %arg1, %c0_i32 : i32
    %4 = arith.extui %3 : i1 to i32
    %c0_i32_3 = arith.constant 0 : i32
    %5 = arith.cmpi ne, %4, %c0_i32_3 : i32
    scf.if %5 {
      %cst_20 = arith.constant 0.000000e+00 : f32
      %23 = vector.broadcast %cst_20 : f32 to vector<1x8x128xf32>
      %c0_21 = arith.constant 0 : index
      %c0_22 = arith.constant 0 : index
      %c0_23 = arith.constant 0 : index
      %24 = vector.load %arg5[%c0_21, %c0_22, %c0_23] : memref<1x8x128xf32, #tpu.memory_space<vmem>>, vector<1x8x128xf32>
      tpu.vector_store %arg5[%c0_21, %c0_22, %c0_23], %23 {strides = array<i32>} : memref<1x8x128xf32, #tpu.memory_space<vmem>>, vector<1x8x128xf32>,
      %cst_24 = arith.constant 0.000000e+00 : f32
      %25 = vector.broadcast %cst_24 : f32 to vector<1x8x128xf32>
      %c0_25 = arith.constant 0 : index
      %c0_26 = arith.constant 0 : index
      %c0_27 = arith.constant 0 : index
      %26 = vector.load %arg6[%c0_25, %c0_26, %c0_27] : memref<1x8x128xf32, #tpu.memory_space<vmem>>, vector<1x8x128xf32>
      tpu.vector_store %arg6[%c0_25, %c0_26, %c0_27], %25 {strides = array<i32>} : memref<1x8x128xf32, #tpu.memory_space<vmem>>, vector<1x8x128xf32>,
    } else {
    }
    %c0_4 = arith.constant 0 : index
    %c0_5 = arith.constant 0 : index
    %c0_6 = arith.constant 0 : index
    %6 = vector.load %arg5[%c0_4, %c0_5, %c0_6] : memref<1x8x128xf32, #tpu.memory_space<vmem>>, vector<1x8x128xf32>
    %cst_7 = arith.constant dense<0.000000e+00> : vector<128xf32>
    %7 = vector.multi_reduction <add>, %2, %cst_7 [0] : vector<128x128xf32> to vector<128xf32>
    %8 = vector.shape_cast %7 : vector<128xf32> to vector<1x128xf32>
    %9 = vector.shape_cast %8 : vector<1x128xf32> to vector<1x1x128xf32>
    %10 = vector.broadcast %9 : vector<1x1x128xf32> to vector<1x8x128xf32>
    %11 = arith.addf %6, %10 : vector<1x8x128xf32>
    %c0_8 = arith.constant 0 : index
    %c0_9 = arith.constant 0 : index
    %c0_10 = arith.constant 0 : index
    %12 = vector.load %arg5[%c0_8, %c0_9, %c0_10] : memref<1x8x128xf32, #tpu.memory_space<vmem>>, vector<1x8x128xf32>
    tpu.vector_store %arg5[%c0_8, %c0_9, %c0_10], %11 {strides = array<i32>} : memref<1x8x128xf32, #tpu.memory_space<vmem>>, vector<1x8x128xf32>,
    %c0_11 = arith.constant 0 : index
    %c0_12 = arith.constant 0 : index
    %c0_13 = arith.constant 0 : index
    %13 = vector.load %arg6[%c0_11, %c0_12, %c0_13] : memref<1x8x128xf32, #tpu.memory_space<vmem>>, vector<1x8x128xf32>
    %14 = arith.mulf %2, %2 : vector<128x128xf32>
    %cst_14 = arith.constant dense<0.000000e+00> : vector<128xf32>
    %15 = vector.multi_reduction <add>, %14, %cst_14 [0] : vector<128x128xf32> to vector<128xf32>
    %16 = vector.shape_cast %15 : vector<128xf32> to vector<1x128xf32>
    %17 = vector.shape_cast %16 : vector<1x128xf32> to vector<1x1x128xf32>
    %18 = vector.broadcast %17 : vector<1x1x128xf32> to vector<1x8x128xf32>
    %19 = arith.addf %13, %18 : vector<1x8x128xf32>
    %c0_15 = arith.constant 0 : index
    %c0_16 = arith.constant 0 : index
    %c0_17 = arith.constant 0 : index
    %20 = vector.load %arg6[%c0_15, %c0_16, %c0_17] : memref<1x8x128xf32, #tpu.memory_space<vmem>>, vector<1x8x128xf32>
    tpu.vector_store %arg6[%c0_15, %c0_16, %c0_17], %19 {strides = array<i32>} : memref<1x8x128xf32, #tpu.memory_space<vmem>>, vector<1x8x128xf32>,
    %21 = arith.truncf %2 : vector<128x128xf32> to vector<128x128xbf16>
    %c0_18 = arith.constant 0 : index
    %c0_19 = arith.constant 0 : index
    %22 = vector.load %arg4[%c0_18, %c0_19] : memref<128x128xbf16, #tpu.memory_space<vmem>>, vector<128x128xbf16>
    tpu.vector_store %arg4[%c0_18, %c0_19], %21 {strides = array<i32>} : memref<128x128xbf16, #tpu.memory_space<vmem>>, vector<128x128xbf16>,
    return
  }
  func.func @transform_0(%arg0: i32, %arg1: i32) -> (i32, i32) {
    %c2_i32 = arith.constant 2 : i32
    %0 = arith.muli %arg0, %c2_i32 : i32
    %1 = arith.addi %0, %arg1 : i32
    %c0_i32 = arith.constant 0 : i32
    %c0_i32_0 = arith.constant 0 : i32
    return %1, %c0_i32 : i32, i32
  }
  func.func @transform_1(%arg0: i32, %arg1: i32) -> (i32, i32) {
    %c0_i32 = arith.constant 0 : i32
    %c0_i32_0 = arith.constant 0 : i32
    %c0_i32_1 = arith.constant 0 : i32
    return %c0_i32, %c0_i32_0 : i32, i32
  }
  func.func @transform_2(%arg0: i32, %arg1: i32) -> (i32, i32) {
    %c2_i32 = arith.constant 2 : i32
    %0 = arith.muli %arg0, %c2_i32 : i32
    %1 = arith.addi %0, %arg1 : i32
    %c0_i32 = arith.constant 0 : i32
    %c0_i32_0 = arith.constant 0 : i32
    return %1, %c0_i32 : i32, i32
  }
  func.func @transform_3(%arg0: i32, %arg1: i32) -> (i32, i32, i32) {
    %c0_i32 = arith.constant 0 : i32
    %c0_i32_0 = arith.constant 0 : i32
    %c0_i32_1 = arith.constant 0 : i32
    return %arg0, %c0_i32, %c0_i32_0 : i32, i32, i32
  }
  func.func @transform_4(%arg0: i32, %arg1: i32) -> (i32, i32, i32) {
    %c0_i32 = arith.constant 0 : i32
    %c0_i32_0 = arith.constant 0 : i32
    %c0_i32_1 = arith.constant 0 : i32
    return %arg0, %c0_i32, %c0_i32_0 : i32, i32, i32
  }
}

module attributes {stable_mosaic.version = 11 : i64} {
  func.func @kernel(%arg0: i32, %arg1: i32, %arg2: memref<32x256xbf16, #tpu.memory_space<vmem>>, %arg3: memref<256x128xbf16, #tpu.memory_space<vmem>>, %arg4: memref<1x256xf32, #tpu.memory_space<vmem>>, %arg5: memref<1x256xf32, #tpu.memory_space<vmem>>, %arg6: memref<32x128xbf16, #tpu.memory_space<vmem>>, %arg7: memref<1x8x128xf32, #tpu.memory_space<vmem>>, %arg8: memref<1x8x128xf32, #tpu.memory_space<vmem>>) attributes {dimension_semantics = [#tpu.dimension_semantics<parallel>, #tpu.dimension_semantics<arbitrary>], iteration_bounds = array<i64: 2, 2>, scalar_prefetch = 0 : i64, scratch_operands = 0 : i64, tpu.core_type = #tpu.core_type<tc>, window_params = [{transform_indices = @transform_0, window_bounds = array<i64: 32, 256>}, {pipeline_mode = #tpu.pipeline_mode<synchronous>, transform_indices = @transform_1, window_bounds = array<i64: 256, 128>}, {pipeline_mode = #tpu.pipeline_mode<synchronous>, transform_indices = @transform_2, window_bounds = array<i64: 1, 256>}, {pipeline_mode = #tpu.pipeline_mode<synchronous>, transform_indices = @transform_3, window_bounds = array<i64: 1, 256>}, {transform_indices = @transform_4, window_bounds = array<i64: 32, 128>}, {transform_indices = @transform_5, window_bounds = array<i64: 1, 8, 128>}, {transform_indices = @transform_6, window_bounds = array<i64: 1, 8, 128>}]} {
    %c0 = arith.constant 0 : index
    %c0_0 = arith.constant 0 : index
    %0 = vector.load %arg2[%c0, %c0_0] : memref<32x256xbf16, #tpu.memory_space<vmem>>, vector<32x256xbf16>
    %1 = arith.extf %0 : vector<32x256xbf16> to vector<32x256xf32>
    %c0_1 = arith.constant 0 : index
    %c0_2 = arith.constant 0 : index
    %2 = vector.load %arg4[%c0_1, %c0_2] : memref<1x256xf32, #tpu.memory_space<vmem>>, vector<1x256xf32>
    %3 = vector.broadcast %2 : vector<1x256xf32> to vector<32x256xf32>
    %4 = arith.mulf %1, %3 : vector<32x256xf32>
    %c0_3 = arith.constant 0 : index
    %c0_4 = arith.constant 0 : index
    %5 = vector.load %arg5[%c0_3, %c0_4] : memref<1x256xf32, #tpu.memory_space<vmem>>, vector<1x256xf32>
    %6 = vector.broadcast %5 : vector<1x256xf32> to vector<32x256xf32>
    %7 = arith.addf %4, %6 : vector<32x256xf32>
    %cst = arith.constant 0.000000e+00 : f32
    %8 = vector.broadcast %cst : f32 to vector<32x256xf32>
    %9 = arith.cmpf ogt, %7, %8 : vector<32x256xf32>
    %cst_5 = arith.constant 2.000000e-01 : f32
    %10 = vector.broadcast %cst_5 : f32 to vector<32x256xf32>
    %11 = arith.mulf %10, %7 : vector<32x256xf32>
    %12 = arith.select %9, %7, %11 : vector<32x256xi1>, vector<32x256xf32>
    %13 = arith.truncf %12 : vector<32x256xf32> to vector<32x256xbf16>
    %c0_6 = arith.constant 0 : index
    %c0_7 = arith.constant 0 : index
    %14 = vector.load %arg3[%c0_6, %c0_7] : memref<256x128xbf16, #tpu.memory_space<vmem>>, vector<256x128xbf16>
    %cst_8 = arith.constant dense<0.000000e+00> : vector<32x128xf32>
    %15 = tpu.matmul %13, %14, %cst_8 {dimension_numbers = #tpu.dot_dimension_numbers<[1], [0], [0], [1], [0, 0, 1, 1], [], []>} : vector<32x256xbf16>, vector<256x128xbf16>, vector<32x128xf32> -> vector<32x128xf32>
    %c0_i32 = arith.constant 0 : i32
    %16 = arith.cmpi eq, %arg1, %c0_i32 : i32
    %17 = arith.extui %16 : i1 to i32
    %c0_i32_9 = arith.constant 0 : i32
    %18 = arith.cmpi ne, %17, %c0_i32_9 : i32
    scf.if %18 {
      %cst_26 = arith.constant 0.000000e+00 : f32
      %36 = vector.broadcast %cst_26 : f32 to vector<1x8x128xf32>
      %c0_27 = arith.constant 0 : index
      %c0_28 = arith.constant 0 : index
      %c0_29 = arith.constant 0 : index
      %37 = vector.load %arg7[%c0_27, %c0_28, %c0_29] : memref<1x8x128xf32, #tpu.memory_space<vmem>>, vector<1x8x128xf32>
      tpu.vector_store %arg7[%c0_27, %c0_28, %c0_29], %36 {strides = array<i32>} : memref<1x8x128xf32, #tpu.memory_space<vmem>>, vector<1x8x128xf32>,
      %cst_30 = arith.constant 0.000000e+00 : f32
      %38 = vector.broadcast %cst_30 : f32 to vector<1x8x128xf32>
      %c0_31 = arith.constant 0 : index
      %c0_32 = arith.constant 0 : index
      %c0_33 = arith.constant 0 : index
      %39 = vector.load %arg8[%c0_31, %c0_32, %c0_33] : memref<1x8x128xf32, #tpu.memory_space<vmem>>, vector<1x8x128xf32>
      tpu.vector_store %arg8[%c0_31, %c0_32, %c0_33], %38 {strides = array<i32>} : memref<1x8x128xf32, #tpu.memory_space<vmem>>, vector<1x8x128xf32>,
    } else {
    }
    %c0_10 = arith.constant 0 : index
    %c0_11 = arith.constant 0 : index
    %c0_12 = arith.constant 0 : index
    %19 = vector.load %arg7[%c0_10, %c0_11, %c0_12] : memref<1x8x128xf32, #tpu.memory_space<vmem>>, vector<1x8x128xf32>
    %cst_13 = arith.constant dense<0.000000e+00> : vector<128xf32>
    %20 = vector.multi_reduction <add>, %15, %cst_13 [0] : vector<32x128xf32> to vector<128xf32>
    %21 = vector.shape_cast %20 : vector<128xf32> to vector<1x128xf32>
    %22 = vector.shape_cast %21 : vector<1x128xf32> to vector<1x1x128xf32>
    %23 = vector.broadcast %22 : vector<1x1x128xf32> to vector<1x8x128xf32>
    %24 = arith.addf %19, %23 : vector<1x8x128xf32>
    %c0_14 = arith.constant 0 : index
    %c0_15 = arith.constant 0 : index
    %c0_16 = arith.constant 0 : index
    %25 = vector.load %arg7[%c0_14, %c0_15, %c0_16] : memref<1x8x128xf32, #tpu.memory_space<vmem>>, vector<1x8x128xf32>
    tpu.vector_store %arg7[%c0_14, %c0_15, %c0_16], %24 {strides = array<i32>} : memref<1x8x128xf32, #tpu.memory_space<vmem>>, vector<1x8x128xf32>,
    %c0_17 = arith.constant 0 : index
    %c0_18 = arith.constant 0 : index
    %c0_19 = arith.constant 0 : index
    %26 = vector.load %arg8[%c0_17, %c0_18, %c0_19] : memref<1x8x128xf32, #tpu.memory_space<vmem>>, vector<1x8x128xf32>
    %27 = arith.mulf %15, %15 : vector<32x128xf32>
    %cst_20 = arith.constant dense<0.000000e+00> : vector<128xf32>
    %28 = vector.multi_reduction <add>, %27, %cst_20 [0] : vector<32x128xf32> to vector<128xf32>
    %29 = vector.shape_cast %28 : vector<128xf32> to vector<1x128xf32>
    %30 = vector.shape_cast %29 : vector<1x128xf32> to vector<1x1x128xf32>
    %31 = vector.broadcast %30 : vector<1x1x128xf32> to vector<1x8x128xf32>
    %32 = arith.addf %26, %31 : vector<1x8x128xf32>
    %c0_21 = arith.constant 0 : index
    %c0_22 = arith.constant 0 : index
    %c0_23 = arith.constant 0 : index
    %33 = vector.load %arg8[%c0_21, %c0_22, %c0_23] : memref<1x8x128xf32, #tpu.memory_space<vmem>>, vector<1x8x128xf32>
    tpu.vector_store %arg8[%c0_21, %c0_22, %c0_23], %32 {strides = array<i32>} : memref<1x8x128xf32, #tpu.memory_space<vmem>>, vector<1x8x128xf32>,
    %34 = arith.truncf %15 : vector<32x128xf32> to vector<32x128xbf16>
    %c0_24 = arith.constant 0 : index
    %c0_25 = arith.constant 0 : index
    %35 = vector.load %arg6[%c0_24, %c0_25] : memref<32x128xbf16, #tpu.memory_space<vmem>>, vector<32x128xbf16>
    tpu.vector_store %arg6[%c0_24, %c0_25], %34 {strides = array<i32>} : memref<32x128xbf16, #tpu.memory_space<vmem>>, vector<32x128xbf16>,
    return
  }
  func.func @transform_0(%arg0: i32, %arg1: i32) -> (i32, i32) {
    %c2_i32 = arith.constant 2 : i32
    %0 = arith.muli %arg0, %c2_i32 : i32
    %1 = arith.addi %0, %arg1 : i32
    %c0_i32 = arith.constant 0 : i32
    %c0_i32_0 = arith.constant 0 : i32
    return %1, %c0_i32 : i32, i32
  }
  func.func @transform_1(%arg0: i32, %arg1: i32) -> (i32, i32) {
    %c0_i32 = arith.constant 0 : i32
    %c0_i32_0 = arith.constant 0 : i32
    %c0_i32_1 = arith.constant 0 : i32
    return %c0_i32, %c0_i32_0 : i32, i32
  }
  func.func @transform_2(%arg0: i32, %arg1: i32) -> (i32, i32) {
    %c0_i32 = arith.constant 0 : i32
    %c0_i32_0 = arith.constant 0 : i32
    %c0_i32_1 = arith.constant 0 : i32
    return %c0_i32, %c0_i32_0 : i32, i32
  }
  func.func @transform_3(%arg0: i32, %arg1: i32) -> (i32, i32) {
    %c0_i32 = arith.constant 0 : i32
    %c0_i32_0 = arith.constant 0 : i32
    %c0_i32_1 = arith.constant 0 : i32
    return %c0_i32, %c0_i32_0 : i32, i32
  }
  func.func @transform_4(%arg0: i32, %arg1: i32) -> (i32, i32) {
    %c2_i32 = arith.constant 2 : i32
    %0 = arith.muli %arg0, %c2_i32 : i32
    %1 = arith.addi %0, %arg1 : i32
    %c0_i32 = arith.constant 0 : i32
    %c0_i32_0 = arith.constant 0 : i32
    return %1, %c0_i32 : i32, i32
  }
  func.func @transform_5(%arg0: i32, %arg1: i32) -> (i32, i32, i32) {
    %c0_i32 = arith.constant 0 : i32
    %c0_i32_0 = arith.constant 0 : i32
    %c0_i32_1 = arith.constant 0 : i32
    return %arg0, %c0_i32, %c0_i32_0 : i32, i32, i32
  }
  func.func @transform_6(%arg0: i32, %arg1: i32) -> (i32, i32, i32) {
    %c0_i32 = arith.constant 0 : i32
    %c0_i32_0 = arith.constant 0 : i32
    %c0_i32_1 = arith.constant 0 : i32
    return %arg0, %c0_i32, %c0_i32_0 : i32, i32, i32
  }
}

module attributes {stable_mosaic.version = 11 : i64} {
  func.func @kernel(%arg0: i32, %arg1: i32, %arg2: memref<16x512xbf16, #tpu.memory_space<vmem>>, %arg3: memref<512x128xbf16, #tpu.memory_space<vmem>>, %arg4: memref<1x512xf32, #tpu.memory_space<vmem>>, %arg5: memref<1x512xf32, #tpu.memory_space<vmem>>, %arg6: memref<16x128xbf16, #tpu.memory_space<vmem>>, %arg7: memref<1x8x128xf32, #tpu.memory_space<vmem>>, %arg8: memref<1x8x128xf32, #tpu.memory_space<vmem>>) attributes {dimension_semantics = [#tpu.dimension_semantics<parallel>, #tpu.dimension_semantics<arbitrary>], iteration_bounds = array<i64: 2, 1>, scalar_prefetch = 0 : i64, scratch_operands = 0 : i64, tpu.core_type = #tpu.core_type<tc>, window_params = [{transform_indices = @transform_0, window_bounds = array<i64: 16, 512>}, {pipeline_mode = #tpu.pipeline_mode<synchronous>, transform_indices = @transform_1, window_bounds = array<i64: 512, 128>}, {pipeline_mode = #tpu.pipeline_mode<synchronous>, transform_indices = @transform_2, window_bounds = array<i64: 1, 512>}, {pipeline_mode = #tpu.pipeline_mode<synchronous>, transform_indices = @transform_3, window_bounds = array<i64: 1, 512>}, {transform_indices = @transform_4, window_bounds = array<i64: 16, 128>}, {transform_indices = @transform_5, window_bounds = array<i64: 1, 8, 128>}, {transform_indices = @transform_6, window_bounds = array<i64: 1, 8, 128>}]} {
    %c0 = arith.constant 0 : index
    %c0_0 = arith.constant 0 : index
    %0 = vector.load %arg2[%c0, %c0_0] : memref<16x512xbf16, #tpu.memory_space<vmem>>, vector<16x512xbf16>
    %1 = arith.extf %0 : vector<16x512xbf16> to vector<16x512xf32>
    %c0_1 = arith.constant 0 : index
    %c0_2 = arith.constant 0 : index
    %2 = vector.load %arg4[%c0_1, %c0_2] : memref<1x512xf32, #tpu.memory_space<vmem>>, vector<1x512xf32>
    %3 = vector.broadcast %2 : vector<1x512xf32> to vector<16x512xf32>
    %4 = arith.mulf %1, %3 : vector<16x512xf32>
    %c0_3 = arith.constant 0 : index
    %c0_4 = arith.constant 0 : index
    %5 = vector.load %arg5[%c0_3, %c0_4] : memref<1x512xf32, #tpu.memory_space<vmem>>, vector<1x512xf32>
    %6 = vector.broadcast %5 : vector<1x512xf32> to vector<16x512xf32>
    %7 = arith.addf %4, %6 : vector<16x512xf32>
    %cst = arith.constant 0.000000e+00 : f32
    %8 = vector.broadcast %cst : f32 to vector<16x512xf32>
    %9 = arith.cmpf ogt, %7, %8 : vector<16x512xf32>
    %cst_5 = arith.constant 2.000000e-01 : f32
    %10 = vector.broadcast %cst_5 : f32 to vector<16x512xf32>
    %11 = arith.mulf %10, %7 : vector<16x512xf32>
    %12 = arith.select %9, %7, %11 : vector<16x512xi1>, vector<16x512xf32>
    %13 = arith.truncf %12 : vector<16x512xf32> to vector<16x512xbf16>
    %c0_6 = arith.constant 0 : index
    %c0_7 = arith.constant 0 : index
    %14 = vector.load %arg3[%c0_6, %c0_7] : memref<512x128xbf16, #tpu.memory_space<vmem>>, vector<512x128xbf16>
    %cst_8 = arith.constant dense<0.000000e+00> : vector<16x128xf32>
    %15 = tpu.matmul %13, %14, %cst_8 {dimension_numbers = #tpu.dot_dimension_numbers<[1], [0], [0], [1], [0, 0, 1, 1], [], []>} : vector<16x512xbf16>, vector<512x128xbf16>, vector<16x128xf32> -> vector<16x128xf32>
    %c0_i32 = arith.constant 0 : i32
    %16 = arith.cmpi eq, %arg1, %c0_i32 : i32
    %17 = arith.extui %16 : i1 to i32
    %c0_i32_9 = arith.constant 0 : i32
    %18 = arith.cmpi ne, %17, %c0_i32_9 : i32
    scf.if %18 {
      %cst_26 = arith.constant 0.000000e+00 : f32
      %36 = vector.broadcast %cst_26 : f32 to vector<1x8x128xf32>
      %c0_27 = arith.constant 0 : index
      %c0_28 = arith.constant 0 : index
      %c0_29 = arith.constant 0 : index
      %37 = vector.load %arg7[%c0_27, %c0_28, %c0_29] : memref<1x8x128xf32, #tpu.memory_space<vmem>>, vector<1x8x128xf32>
      tpu.vector_store %arg7[%c0_27, %c0_28, %c0_29], %36 {strides = array<i32>} : memref<1x8x128xf32, #tpu.memory_space<vmem>>, vector<1x8x128xf32>,
      %cst_30 = arith.constant 0.000000e+00 : f32
      %38 = vector.broadcast %cst_30 : f32 to vector<1x8x128xf32>
      %c0_31 = arith.constant 0 : index
      %c0_32 = arith.constant 0 : index
      %c0_33 = arith.constant 0 : index
      %39 = vector.load %arg8[%c0_31, %c0_32, %c0_33] : memref<1x8x128xf32, #tpu.memory_space<vmem>>, vector<1x8x128xf32>
      tpu.vector_store %arg8[%c0_31, %c0_32, %c0_33], %38 {strides = array<i32>} : memref<1x8x128xf32, #tpu.memory_space<vmem>>, vector<1x8x128xf32>,
    } else {
    }
    %c0_10 = arith.constant 0 : index
    %c0_11 = arith.constant 0 : index
    %c0_12 = arith.constant 0 : index
    %19 = vector.load %arg7[%c0_10, %c0_11, %c0_12] : memref<1x8x128xf32, #tpu.memory_space<vmem>>, vector<1x8x128xf32>
    %cst_13 = arith.constant dense<0.000000e+00> : vector<128xf32>
    %20 = vector.multi_reduction <add>, %15, %cst_13 [0] : vector<16x128xf32> to vector<128xf32>
    %21 = vector.shape_cast %20 : vector<128xf32> to vector<1x128xf32>
    %22 = vector.shape_cast %21 : vector<1x128xf32> to vector<1x1x128xf32>
    %23 = vector.broadcast %22 : vector<1x1x128xf32> to vector<1x8x128xf32>
    %24 = arith.addf %19, %23 : vector<1x8x128xf32>
    %c0_14 = arith.constant 0 : index
    %c0_15 = arith.constant 0 : index
    %c0_16 = arith.constant 0 : index
    %25 = vector.load %arg7[%c0_14, %c0_15, %c0_16] : memref<1x8x128xf32, #tpu.memory_space<vmem>>, vector<1x8x128xf32>
    tpu.vector_store %arg7[%c0_14, %c0_15, %c0_16], %24 {strides = array<i32>} : memref<1x8x128xf32, #tpu.memory_space<vmem>>, vector<1x8x128xf32>,
    %c0_17 = arith.constant 0 : index
    %c0_18 = arith.constant 0 : index
    %c0_19 = arith.constant 0 : index
    %26 = vector.load %arg8[%c0_17, %c0_18, %c0_19] : memref<1x8x128xf32, #tpu.memory_space<vmem>>, vector<1x8x128xf32>
    %27 = arith.mulf %15, %15 : vector<16x128xf32>
    %cst_20 = arith.constant dense<0.000000e+00> : vector<128xf32>
    %28 = vector.multi_reduction <add>, %27, %cst_20 [0] : vector<16x128xf32> to vector<128xf32>
    %29 = vector.shape_cast %28 : vector<128xf32> to vector<1x128xf32>
    %30 = vector.shape_cast %29 : vector<1x128xf32> to vector<1x1x128xf32>
    %31 = vector.broadcast %30 : vector<1x1x128xf32> to vector<1x8x128xf32>
    %32 = arith.addf %26, %31 : vector<1x8x128xf32>
    %c0_21 = arith.constant 0 : index
    %c0_22 = arith.constant 0 : index
    %c0_23 = arith.constant 0 : index
    %33 = vector.load %arg8[%c0_21, %c0_22, %c0_23] : memref<1x8x128xf32, #tpu.memory_space<vmem>>, vector<1x8x128xf32>
    tpu.vector_store %arg8[%c0_21, %c0_22, %c0_23], %32 {strides = array<i32>} : memref<1x8x128xf32, #tpu.memory_space<vmem>>, vector<1x8x128xf32>,
    %34 = arith.truncf %15 : vector<16x128xf32> to vector<16x128xbf16>
    %c0_24 = arith.constant 0 : index
    %c0_25 = arith.constant 0 : index
    %35 = vector.load %arg6[%c0_24, %c0_25] : memref<16x128xbf16, #tpu.memory_space<vmem>>, vector<16x128xbf16>
    tpu.vector_store %arg6[%c0_24, %c0_25], %34 {strides = array<i32>} : memref<16x128xbf16, #tpu.memory_space<vmem>>, vector<16x128xbf16>,
    return
  }
  func.func @transform_0(%arg0: i32, %arg1: i32) -> (i32, i32) {
    %c1_i32 = arith.constant 1 : i32
    %0 = arith.muli %arg0, %c1_i32 : i32
    %1 = arith.addi %0, %arg1 : i32
    %c0_i32 = arith.constant 0 : i32
    %c0_i32_0 = arith.constant 0 : i32
    return %1, %c0_i32 : i32, i32
  }
  func.func @transform_1(%arg0: i32, %arg1: i32) -> (i32, i32) {
    %c0_i32 = arith.constant 0 : i32
    %c0_i32_0 = arith.constant 0 : i32
    %c0_i32_1 = arith.constant 0 : i32
    return %c0_i32, %c0_i32_0 : i32, i32
  }
  func.func @transform_2(%arg0: i32, %arg1: i32) -> (i32, i32) {
    %c0_i32 = arith.constant 0 : i32
    %c0_i32_0 = arith.constant 0 : i32
    %c0_i32_1 = arith.constant 0 : i32
    return %c0_i32, %c0_i32_0 : i32, i32
  }
  func.func @transform_3(%arg0: i32, %arg1: i32) -> (i32, i32) {
    %c0_i32 = arith.constant 0 : i32
    %c0_i32_0 = arith.constant 0 : i32
    %c0_i32_1 = arith.constant 0 : i32
    return %c0_i32, %c0_i32_0 : i32, i32
  }
  func.func @transform_4(%arg0: i32, %arg1: i32) -> (i32, i32) {
    %c1_i32 = arith.constant 1 : i32
    %0 = arith.muli %arg0, %c1_i32 : i32
    %1 = arith.addi %0, %arg1 : i32
    %c0_i32 = arith.constant 0 : i32
    %c0_i32_0 = arith.constant 0 : i32
    return %1, %c0_i32 : i32, i32
  }
  func.func @transform_5(%arg0: i32, %arg1: i32) -> (i32, i32, i32) {
    %c0_i32 = arith.constant 0 : i32
    %c0_i32_0 = arith.constant 0 : i32
    %c0_i32_1 = arith.constant 0 : i32
    return %arg0, %c0_i32, %c0_i32_0 : i32, i32, i32
  }
  func.func @transform_6(%arg0: i32, %arg1: i32) -> (i32, i32, i32) {
    %c0_i32 = arith.constant 0 : i32
    %c0_i32_0 = arith.constant 0 : i32
    %c0_i32_1 = arith.constant 0 : i32
    return %arg0, %c0_i32, %c0_i32_0 : i32, i32, i32
  }
}

module attributes {stable_mosaic.version = 11 : i64} {
  func.func @kernel(%arg0: i32, %arg1: memref<2x1024xbf16, #tpu.memory_space<vmem>>, %arg2: memref<1024x128xbf16, #tpu.memory_space<vmem>>, %arg3: memref<1x1024xf32, #tpu.memory_space<vmem>>, %arg4: memref<1x1024xf32, #tpu.memory_space<vmem>>, %arg5: memref<2x128xf32, #tpu.memory_space<vmem>>) attributes {dimension_semantics = [#tpu.dimension_semantics<parallel>], iteration_bounds = array<i64: 1>, scalar_prefetch = 0 : i64, scratch_operands = 0 : i64, tpu.core_type = #tpu.core_type<tc>, window_params = [{transform_indices = @transform_0, window_bounds = array<i64: 2, 1024>}, {pipeline_mode = #tpu.pipeline_mode<synchronous>, transform_indices = @transform_1, window_bounds = array<i64: 1024, 128>}, {pipeline_mode = #tpu.pipeline_mode<synchronous>, transform_indices = @transform_2, window_bounds = array<i64: 1, 1024>}, {pipeline_mode = #tpu.pipeline_mode<synchronous>, transform_indices = @transform_3, window_bounds = array<i64: 1, 1024>}, {transform_indices = @transform_4, window_bounds = array<i64: 2, 128>}]} {
    %c0 = arith.constant 0 : index
    %c0_0 = arith.constant 0 : index
    %0 = vector.load %arg1[%c0, %c0_0] : memref<2x1024xbf16, #tpu.memory_space<vmem>>, vector<2x1024xbf16>
    %1 = arith.extf %0 : vector<2x1024xbf16> to vector<2x1024xf32>
    %c0_1 = arith.constant 0 : index
    %c0_2 = arith.constant 0 : index
    %2 = vector.load %arg3[%c0_1, %c0_2] : memref<1x1024xf32, #tpu.memory_space<vmem>>, vector<1x1024xf32>
    %3 = vector.broadcast %2 : vector<1x1024xf32> to vector<2x1024xf32>
    %4 = arith.mulf %1, %3 : vector<2x1024xf32>
    %c0_3 = arith.constant 0 : index
    %c0_4 = arith.constant 0 : index
    %5 = vector.load %arg4[%c0_3, %c0_4] : memref<1x1024xf32, #tpu.memory_space<vmem>>, vector<1x1024xf32>
    %6 = vector.broadcast %5 : vector<1x1024xf32> to vector<2x1024xf32>
    %7 = arith.addf %4, %6 : vector<2x1024xf32>
    %cst = arith.constant 0.000000e+00 : f32
    %8 = vector.broadcast %cst : f32 to vector<2x1024xf32>
    %9 = arith.cmpf ogt, %7, %8 : vector<2x1024xf32>
    %cst_5 = arith.constant 2.000000e-01 : f32
    %10 = vector.broadcast %cst_5 : f32 to vector<2x1024xf32>
    %11 = arith.mulf %10, %7 : vector<2x1024xf32>
    %12 = arith.select %9, %7, %11 : vector<2x1024xi1>, vector<2x1024xf32>
    %13 = arith.truncf %12 : vector<2x1024xf32> to vector<2x1024xbf16>
    %c0_6 = arith.constant 0 : index
    %c0_7 = arith.constant 0 : index
    %14 = vector.load %arg2[%c0_6, %c0_7] : memref<1024x128xbf16, #tpu.memory_space<vmem>>, vector<1024x128xbf16>
    %cst_8 = arith.constant dense<0.000000e+00> : vector<2x128xf32>
    %15 = tpu.matmul %13, %14, %cst_8 {dimension_numbers = #tpu.dot_dimension_numbers<[1], [0], [0], [1], [0, 0, 1, 1], [], []>} : vector<2x1024xbf16>, vector<1024x128xbf16>, vector<2x128xf32> -> vector<2x128xf32>
    %16 = arith.negf %15 : vector<2x128xf32>
    %17 = math.exp %16 : vector<2x128xf32>
    %cst_9 = arith.constant 1.000000e+00 : f32
    %18 = vector.broadcast %cst_9 : f32 to vector<2x128xf32>
    %19 = arith.addf %18, %17 : vector<2x128xf32>
    %20 = arith.divf %18, %19 : vector<2x128xf32>
    %c0_10 = arith.constant 0 : index
    %c0_11 = arith.constant 0 : index
    %21 = vector.load %arg5[%c0_10, %c0_11] : memref<2x128xf32, #tpu.memory_space<vmem>>, vector<2x128xf32>
    tpu.vector_store %arg5[%c0_10, %c0_11], %20 {strides = array<i32>} : memref<2x128xf32, #tpu.memory_space<vmem>>, vector<2x128xf32>,
    return
  }
  func.func @transform_0(%arg0: i32) -> (i32, i32) {
    %c0_i32 = arith.constant 0 : i32
    %c0_i32_0 = arith.constant 0 : i32
    return %arg0, %c0_i32 : i32, i32
  }
  func.func @transform_1(%arg0: i32) -> (i32, i32) {
    %c0_i32 = arith.constant 0 : i32
    %c0_i32_0 = arith.constant 0 : i32
    %c0_i32_1 = arith.constant 0 : i32
    return %c0_i32, %c0_i32_0 : i32, i32
  }
  func.func @transform_2(%arg0: i32) -> (i32, i32) {
    %c0_i32 = arith.constant 0 : i32
    %c0_i32_0 = arith.constant 0 : i32
    %c0_i32_1 = arith.constant 0 : i32
    return %c0_i32, %c0_i32_0 : i32, i32
  }
  func.func @transform_3(%arg0: i32) -> (i32, i32) {
    %c0_i32 = arith.constant 0 : i32
    %c0_i32_0 = arith.constant 0 : i32
    %c0_i32_1 = arith.constant 0 : i32
    return %c0_i32, %c0_i32_0 : i32, i32
  }
  func.func @transform_4(%arg0: i32) -> (i32, i32) {
    %c0_i32 = arith.constant 0 : i32
    %c0_i32_0 = arith.constant 0 : i32
    return %arg0, %c0_i32 : i32, i32
  }
}

</mosaic_0001>

<bundles_post_ra>
// kernel: discriminator_forward.5
= control target key start
LH: loop header
LB: loop body
LE: loop exit
PB: predicated region body
PF: predicated region fallthrough
CT: control target
= control target key end

     0   :  { %s3524_s9 = smov 0   ;;  %s3770_s0 = inlined_call_operand.vmem [shape: bf16[2048,48], index: 0, kind: input, shape index: {}]   ;;  %s3771_s1 = inlined_call_operand.vmem [shape: bf16[48,128], index: 1, kind: input, shape index: {}]   ;;  %s3772_s2 = inlined_call_operand.vmem [shape: bf16[2048,128], index: 2, kind: output, shape index: {}]  }
   0x1 LB: > { %s2438_s10 = sadd.s32 4294967295, %s3507_s9   ;;  %p2442_p0 = scmp.ge.s32.totalorder %s3507_s9, 1  ;;  %s3507_s9 = sphi %s3524_s9, %s12_s9  }
   0x2   : > { %p113_p1 = scmp.lt.s32.totalorder %s3507_s9, 3 }
   0x4   : > { %p114_p2 = pnand %p2442_p0, %p113_p1 }
   0x5   : > { %s2443_s13 = sshll.u32 (!%p114_p2), %s2438_s10, 7 }
   0x6   : > { %117 = sbr.rel (%p114_p2) target bundleno = 350 (0x15e), region = 28  ;;  %p136_p3 = scmp.lt.s32.totalorder (!%p114_p2), %s2443_s13, 255 }
   0xb   : > { %v3434_v0 = vld [vmem:[%s3771_s1 + $0x10] sm:$0xff]   ;;  %v3435_v1 = vld [vmem:[%s3771_s1 + $0x8] sm:$0xff]   ;;  %s3774_s13 = smov (!%p136_p3, %s2443_s13), 255  ;;  %v3436_v2 = vld [vmem:[%s3771_s1] sm:$0xff]   ;;  %vm620_vm0 = vcmask 392192  }
   0xc   : > { %3286 = vmatprep.subr.bf16.mxu0 %v3434_v0  ;;  %3420 = vmatprep.subr.bf16.mxu1 %v3434_v0  ;;  %s2444_s18 = sshll.u32 %s3774_s13, 2 }
   0xd   : > { %3287 = vmatpush3.bf16.msra.mxu0 %v3434_v0  ;;  %3423 = vmatpush3.bf16.msra.mxu1 %v3434_v0  ;;  %s3549_s21 = scalar_lea.vmem %s3770_s0, %s2444_s18  ;;  %s3684_s24 = scalar_lea.vmem %s3772_s2, %s2444_s18 }
   0xe   : > { %3288 = vmatprep.subr.bf16.mxu0 %v3435_v1  ;;  %3421 = vmatprep.subr.bf16.mxu1 %v3435_v1  ;;  %v3437_v3 = vld [vmem:[%s3549_s21] sm:$0xff]   ;;  %v3439_v5 = vld [vmem:[%s3549_s21 + $0x8] sm:$0xff]   ;;  %v3441_v7 = vld [vmem:[%s3549_s21 + $0x10] sm:$0xff]  }
   0xf   : > { %v3438_v4 = vld [vmem:[%s3549_s21 + $0x100] sm:$0xff]   ;;  %3292 = vmatprep.mubr.msk.bf16.mxu0 %vm620_vm0, %v3437_v3  ;;  %v3440_v6 = vld [vmem:[%s3549_s21 + $0x108] sm:$0xff]   ;;  %v3442_v8 = vld [vmem:[%s3549_s21 + $0x110] sm:$0xff]  }
  0x10   : > { %3356 = vmatprep.mubr.msk.bf16.mxu1 %vm620_vm0, %v3438_v4  ;;  %v3443_v9 = vld [vmem:[%s3549_s21 + $0x18] sm:$0xff]   ;;  %v3445_v11 = vld [vmem:[%s3549_s21 + $0x20] sm:$0xff]   ;;  %v3447_v13 = vld [vmem:[%s3549_s21 + $0x28] sm:$0xff]  }
  0x11   : > { %3289 = vmatpush3.bf16.msra.mxu0 %v3435_v1  ;;  %3424 = vmatpush3.bf16.msra.mxu1 %v3435_v1  ;;  %v3444_v10 = vld [vmem:[%s3549_s21 + $0x118] sm:$0xff]   ;;  %v3446_v12 = vld [vmem:[%s3549_s21 + $0x120] sm:$0xff]   ;;  %v3448_v14 = vld [vmem:[%s3549_s21 + $0x128] sm:$0xff]  }
  0x12   : > { %3290 = vmatprep.subr.bf16.mxu0 %v3436_v2  ;;  %3422 = vmatprep.subr.bf16.mxu1 %v3436_v2  ;;  %v3449_v15 = vld [vmem:[%s3549_s21 + $0x30] sm:$0xff]   ;;  %v3451_v17 = vld [vmem:[%s3549_s21 + $0x38] sm:$0xff]   ;;  %v3453_v19 = vld [vmem:[%s3549_s21 + $0x40] sm:$0xff]  }
  0x13   : > { %v3450_v16 = vld [vmem:[%s3549_s21 + $0x130] sm:$0xff]   ;;  %v3452_v18 = vld [vmem:[%s3549_s21 + $0x138] sm:$0xff]   ;;  %v3454_v20 = vld [vmem:[%s3549_s21 + $0x140] sm:$0xff]  }
  0x14   : > { %v3455_v21 = vld [vmem:[%s3549_s21 + $0x48] sm:$0xff]   ;;  %v3457_v23 = vld [vmem:[%s3549_s21 + $0x50] sm:$0xff]   ;;  %v3459_v25 = vld [vmem:[%s3549_s21 + $0x58] sm:$0xff]  }
  0x15   : > { %3291 = vmatpush3.bf16.msra.mxu0 %v3436_v2  ;;  %3425 = vmatpush3.bf16.msra.mxu1 %v3436_v2  ;;  %v3456_v22 = vld [vmem:[%s3549_s21 + $0x148] sm:$0xff]   ;;  %v3458_v24 = vld [vmem:[%s3549_s21 + $0x150] sm:$0xff]   ;;  %v3460_v26 = vld [vmem:[%s3549_s21 + $0x158] sm:$0xff]  }
  0x16   : > { %v3461_v27 = vld [vmem:[%s3549_s21 + $0x60] sm:$0xff]   ;;  %v3463_v29 = vld [vmem:[%s3549_s21 + $0x68] sm:$0xff]   ;;  %v3465_v31 = vld [vmem:[%s3549_s21 + $0x70] sm:$0xff]  }
  0x17   : > { %v3462_v28 = vld [vmem:[%s3549_s21 + $0x160] sm:$0xff]   ;;  %v3464_v30 = vld [vmem:[%s3549_s21 + $0x168] sm:$0xff]   ;;  %v3466_v32 = vld [vmem:[%s3549_s21 + $0x170] sm:$0xff]  }
  0x18   : > { %3293 = vmatmul.mubr.msk.bf16.vlgmr.msra.gmra.mxu0 %vm620_vm0, %v3439_v5  ;;  %3357 = vmatmul.mubr.msk.bf16.vlgmr.msra.gmra.mxu1 %vm620_vm0, %v3440_v6  ;;  %v3467_v33 = vld [vmem:[%s3549_s21 + $0x78] sm:$0xff]   ;;  %v3469_v35 = vld [vmem:[%s3549_s21 + $0x80] sm:$0xff]   ;;  %v3471_v37 = vld [vmem:[%s3549_s21 + $0x88] sm:$0xff]  }
  0x19   : > { %3296 = vmatprep.mubr.msk.bf16.mxu0 %vm620_vm0, %v3441_v7  ;;  %3360 = vmatprep.mubr.msk.bf16.mxu1 %vm620_vm0, %v3442_v8  ;;  %v3468_v34 = vld [vmem:[%s3549_s21 + $0x178] sm:$0xff]   ;;  %v3470_v36 = vld [vmem:[%s3549_s21 + $0x180] sm:$0xff]   ;;  %v3472_v38 = vld [vmem:[%s3549_s21 + $0x188] sm:$0xff]  }
  0x1a   : > { %v3473_v39 = vld [vmem:[%s3549_s21 + $0x90] sm:$0xff]   ;;  %v3475_v41 = vld [vmem:[%s3549_s21 + $0x98] sm:$0xff]   ;;  %v3477_v43 = vld [vmem:[%s3549_s21 + $0xa0] sm:$0xff]  }
  0x1b   : > { %v3474_v40 = vld [vmem:[%s3549_s21 + $0x190] sm:$0xff]   ;;  %v3476_v42 = vld [vmem:[%s3549_s21 + $0x198] sm:$0xff]   ;;  %v3478_v44 = vld [vmem:[%s3549_s21 + $0x1a0] sm:$0xff]  }
  0x1c   : > { %v3479_v45 = vld [vmem:[%s3549_s21 + $0xa8] sm:$0xff]   ;;  %v3481_v47 = vld [vmem:[%s3549_s21 + $0xb0] sm:$0xff]   ;;  %v3483_v49 = vld [vmem:[%s3549_s21 + $0xb8] sm:$0xff]  }
  0x1d   : > { %v3480_v46 = vld [vmem:[%s3549_s21 + $0x1a8] sm:$0xff]   ;;  %v3482_v48 = vld [vmem:[%s3549_s21 + $0x1b0] sm:$0xff]   ;;  %v3484_v50 = vld [vmem:[%s3549_s21 + $0x1b8] sm:$0xff]  }
  0x1e   : > { %v3485_v51 = vld [vmem:[%s3549_s21 + $0xc0] sm:$0xff]   ;;  %v3487_v53 = vld [vmem:[%s3549_s21 + $0xc8] sm:$0xff]   ;;  %v3489_v55 = vld [vmem:[%s3549_s21 + $0xd0] sm:$0xff]  }
  0x1f   : > { %v3486_v52 = vld [vmem:[%s3549_s21 + $0x1c0] sm:$0xff]   ;;  %v3488_v54 = vld [vmem:[%s3549_s21 + $0x1c8] sm:$0xff]   ;;  %v3490_v56 = vld [vmem:[%s3549_s21 + $0x1d0] sm:$0xff]  }
  0x20   : > { %3297 = vmatmul.mubr.msk.bf16.gmra.mxu0 %vm620_vm0, %v3443_v9  ;;  %3361 = vmatmul.mubr.msk.bf16.gmra.mxu1 %vm620_vm0, %v3444_v10  ;;  %v3491_v57 = vld [vmem:[%s3549_s21 + $0xd8] sm:$0xff]   ;;  %v3493_v59 = vld [vmem:[%s3549_s21 + $0xe0] sm:$0xff]   ;;  %v3495_v61 = vld [vmem:[%s3549_s21 + $0xe8] sm:$0xff]  }
  0x21   : > { %3300 = vmatprep.mubr.msk.bf16.mxu0 %vm620_vm0, %v3445_v11  ;;  %3364 = vmatprep.mubr.msk.bf16.mxu1 %vm620_vm0, %v3446_v12  ;;  %v3492_v58 = vld [vmem:[%s3549_s21 + $0x1d8] sm:$0xff]   ;;  %v3494_v60 = vld [vmem:[%s3549_s21 + $0x1e0] sm:$0xff]   ;;  %v3496_v62 = vld [vmem:[%s3549_s21 + $0x1e8] sm:$0xff]  }
  0x22   : > { %v3497_v63 = vld [vmem:[%s3549_s21 + $0xf0] sm:$0xff]   ;;  %v3499_v1 = vld [vmem:[%s3549_s21 + $0xf8] sm:$0xff]  }
  0x23   : > { %v3498_v0 = vld [vmem:[%s3549_s21 + $0x1f0] sm:$0xff]   ;;  %v3500_v2 = vld [vmem:[%s3549_s21 + $0x1f8] sm:$0xff]  }
  0x28   : > { %3301 = vmatmul.mubr.msk.bf16.gmra.mxu0 %vm620_vm0, %v3447_v13  ;;  %3365 = vmatmul.mubr.msk.bf16.gmra.mxu1 %vm620_vm0, %v3448_v14 }
  0x29   : > { %3304 = vmatprep.mubr.msk.bf16.mxu0 %vm620_vm0, %v3449_v15  ;;  %3368 = vmatprep.mubr.msk.bf16.mxu1 %vm620_vm0, %v3450_v16 }
  0x30   : > { %3305 = vmatmul.mubr.msk.bf16.gmra.mxu0 %vm620_vm0, %v3451_v17  ;;  %3369 = vmatmul.mubr.msk.bf16.gmra.mxu1 %vm620_vm0, %v3452_v18 }
  0x31   : > { %3308 = vmatprep.mubr.msk.bf16.mxu0 %vm620_vm0, %v3453_v19  ;;  %3372 = vmatprep.mubr.msk.bf16.mxu1 %vm620_vm0, %v3454_v20 }
  0x38   : > { %3309 = vmatmul.mubr.msk.bf16.gmra.mxu0 %vm620_vm0, %v3455_v21  ;;  %3373 = vmatmul.mubr.msk.bf16.gmra.mxu1 %vm620_vm0, %v3456_v22 }
  0x39   : > { %3312 = vmatprep.mubr.msk.bf16.mxu0 %vm620_vm0, %v3457_v23  ;;  %3376 = vmatprep.mubr.msk.bf16.mxu1 %vm620_vm0, %v3458_v24 }
  0x40   : > { %3313 = vmatmul.mubr.msk.bf16.gmra.mxu0 %vm620_vm0, %v3459_v25  ;;  %3377 = vmatmul.mubr.msk.bf16.gmra.mxu1 %vm620_vm0, %v3460_v26 }
  0x41   : > { %3316 = vmatprep.mubr.msk.bf16.mxu0 %vm620_vm0, %v3461_v27  ;;  %3380 = vmatprep.mubr.msk.bf16.mxu1 %vm620_vm0, %v3462_v28 }
  0x48   : > { %3317 = vmatmul.mubr.msk.bf16.gmra.mxu0 %vm620_vm0, %v3463_v29  ;;  %3381 = vmatmul.mubr.msk.bf16.gmra.mxu1 %vm620_vm0, %v3464_v30 }
  0x49   : > { %3320 = vmatprep.mubr.msk.bf16.mxu0 %vm620_vm0, %v3465_v31  ;;  %3384 = vmatprep.mubr.msk.bf16.mxu1 %vm620_vm0, %v3466_v32 }
  0x50   : > { %3321 = vmatmul.mubr.msk.bf16.gmra.mxu0 %vm620_vm0, %v3467_v33  ;;  %3385 = vmatmul.mubr.msk.bf16.gmra.mxu1 %vm620_vm0, %v3468_v34 }
  0x51   : > { %3324 = vmatprep.mubr.msk.bf16.mxu0 %vm620_vm0, %v3469_v35  ;;  %3388 = vmatprep.mubr.msk.bf16.mxu1 %vm620_vm0, %v3470_v36 }
  0x58   : > { %3325 = vmatmul.mubr.msk.bf16.gmra.mxu0 %vm620_vm0, %v3471_v37  ;;  %3389 = vmatmul.mubr.msk.bf16.gmra.mxu1 %vm620_vm0, %v3472_v38 }
  0x59   : > { %3328 = vmatprep.mubr.msk.bf16.mxu0 %vm620_vm0, %v3473_v39  ;;  %3392 = vmatprep.mubr.msk.bf16.mxu1 %vm620_vm0, %v3474_v40 }
  0x60   : > { %3329 = vmatmul.mubr.msk.bf16.gmra.mxu0 %vm620_vm0, %v3475_v41  ;;  %3393 = vmatmul.mubr.msk.bf16.gmra.mxu1 %vm620_vm0, %v3476_v42 }
  0x61   : > { %3332 = vmatprep.mubr.msk.bf16.mxu0 %vm620_vm0, %v3477_v43  ;;  %3396 = vmatprep.mubr.msk.bf16.mxu1 %vm620_vm0, %v3478_v44 }
  0x68   : > { %3333 = vmatmul.mubr.msk.bf16.gmra.mxu0 %vm620_vm0, %v3479_v45  ;;  %3397 = vmatmul.mubr.msk.bf16.gmra.mxu1 %vm620_vm0, %v3480_v46 }
  0x69   : > { %3336 = vmatprep.mubr.msk.bf16.mxu0 %vm620_vm0, %v3481_v47  ;;  %3400 = vmatprep.mubr.msk.bf16.mxu1 %vm620_vm0, %v3482_v48 }
  0x70   : > { %3337 = vmatmul.mubr.msk.bf16.gmra.mxu0 %vm620_vm0, %v3483_v49  ;;  %3401 = vmatmul.mubr.msk.bf16.gmra.mxu1 %vm620_vm0, %v3484_v50 }
  0x71   : > { %3340 = vmatprep.mubr.msk.bf16.mxu0 %vm620_vm0, %v3485_v51  ;;  %3404 = vmatprep.mubr.msk.bf16.mxu1 %vm620_vm0, %v3486_v52 }
  0x78   : > { %3341 = vmatmul.mubr.msk.bf16.gmra.mxu0 %vm620_vm0, %v3487_v53  ;;  %3405 = vmatmul.mubr.msk.bf16.gmra.mxu1 %vm620_vm0, %v3488_v54 }
  0x79   : > { %3344 = vmatprep.mubr.msk.bf16.mxu0 %vm620_vm0, %v3489_v55  ;;  %3408 = vmatprep.mubr.msk.bf16.mxu1 %vm620_vm0, %v3490_v56 }
  0x80   : > { %3345 = vmatmul.mubr.msk.bf16.gmra.mxu0 %vm620_vm0, %v3491_v57  ;;  %3409 = vmatmul.mubr.msk.bf16.gmra.mxu1 %vm620_vm0, %v3492_v58 }
  0x81   : > { %3348 = vmatprep.mubr.msk.bf16.mxu0 %vm620_vm0, %v3493_v59  ;;  %3412 = vmatprep.mubr.msk.bf16.mxu1 %vm620_vm0, %v3494_v60 }
  0x88   : > { %3349 = vmatmul.mubr.msk.bf16.gmra.mxu0 %vm620_vm0, %v3495_v61  ;;  %3413 = vmatmul.mubr.msk.bf16.gmra.mxu1 %vm620_vm0, %v3496_v62 }
  0x89   : > { %3352 = vmatprep.mubr.msk.bf16.mxu0 %vm620_vm0, %v3497_v63  ;;  %3416 = vmatprep.mubr.msk.bf16.mxu1 %vm620_vm0, %v3498_v0 }
  0x90   : > { %3353 = vmatmul.mubr.msk.bf16.gmra.mxu0 %vm620_vm0, %v3499_v1  ;;  %3417 = vmatmul.mubr.msk.bf16.gmra.mxu1 %vm620_vm0, %v3500_v2 }
  0xd8   : > { %v3294_v3 = vpop.f32.mrf.mxu0  ;;  %v3358_v4 = vpop.f32.mrf.mxu1 }
  0xd9   : > { %vm1360_vm1 = vcmp.gt.f32.partialorder %v3294_v3, 0.0  ;;  %v1488_v5 = vmul.f32 0.2, %v3294_v3  ;;  %v1552_v6 = vmul.f32 0.2, %v3358_v4  ;;  %vm1424_vm2 = vcmp.gt.f32.partialorder %v3358_v4, 0.0 }
  0xda   : > { %v847_v7 = vpop.f32.mrf.mxu0  ;;  %v1103_v8 = vpop.f32.mrf.mxu1 }
  0xdb   : > { %v1616_v9 = vsel %vm1360_vm1, %v3294_v3, %v1488_v5  ;;  %v1486_v10 = vmul.f32 0.2, %v847_v7  ;;  %vm1358_vm3 = vcmp.gt.f32.partialorder %v847_v7, 0.0  ;;  %v1680_v14 = vsel %vm1424_vm2, %v3358_v4, %v1552_v6 }
  0xdc   : > { %v3295_v11 = vpop.f32.mrf.mxu0  ;;  %v3359_v12 = vpop.f32.mrf.mxu1  ;;  %vm1422_vm6 = vcmp.gt.f32.partialorder %v1103_v8, 0.0  ;;  %v1550_v15 = vmul.f32 0.2, %v1103_v8 }
  0xdd   : > { %vm1361_vm4 = vcmp.gt.f32.partialorder %v3295_v11, 0.0  ;;  %v1489_v13 = vmul.f32 0.2, %v3295_v11  ;;  %vm1425_vm5 = vcmp.gt.f32.partialorder %v3359_v12, 0.0  ;;  %v1553_v16 = vmul.f32 0.2, %v3359_v12 }
  0xde   : > { %v850_v17 = vpop.f32.mrf.mxu0  ;;  %v1106_v18 = vpop.f32.mrf.mxu1  ;;  %v1614_v21 = vsel %vm1358_vm3, %v847_v7, %v1486_v10  ;;  %v1678_v30 = vsel %vm1422_vm6, %v1103_v8, %v1550_v15 }
  0xdf   : > { %v1617_v19 = vsel %vm1361_vm4, %v3295_v11, %v1489_v13  ;;  %vm1359_vm7 = vcmp.gt.f32.partialorder %v850_v17, 0.0  ;;  %v1487_v20 = vmul.f32 0.2, %v850_v17  ;;  %vm1423_vm8 = vcmp.gt.f32.partialorder %v1106_v18, 0.0 }
  0xe0   : > { %v2844_v22 = vpack.c.bf16 %v1617_v19, %v1616_v9  ;;  %v1681_v23 = vsel %vm1425_vm5, %v3359_v12, %v1553_v16  ;;  %v1551_v24 = vmul.f32 0.2, %v1106_v18  ;;  %v3298_v25 = vpop.f32.mrf.mxu0  ;;  %v3362_v26 = vpop.f32.mrf.mxu1 }
  0xe1   : > { %v3004_v27 = vpack.c.bf16 %v1681_v23, %v1680_v14  ;;  %v1615_v28 = vsel %vm1359_vm7, %v850_v17, %v1487_v20  ;;  %vm1364_vm9 = vcmp.gt.f32.partialorder %v3298_v25, 0.0  ;;  %v1492_v29 = vmul.f32 0.2, %v3298_v25 }
  0xe2   : > { %3156 = vst [vmem:[%s3684_s24 + $0x8] sm:$0xff] %v2844_v22   ;;  %v2839_v31 = vpack.c.bf16 %v1615_v28, %v1614_v21  ;;  %v1679_v32 = vsel %vm1423_vm8, %v1106_v18, %v1551_v24  ;;  %v1556_v33 = vmul.f32 0.2, %v3362_v26  ;;  %v863_v34 = vpop.f32.mrf.mxu0  ;;  %v1119_v35 = vpop.f32.mrf.mxu1  ;;  %vm1428_vm10 = vcmp.gt.f32.partialorder %v3362_v26, 0.0 }
  0xe3   : > { %3188 = vst [vmem:[%s3684_s24 + $0x108] sm:$0xff] %v3004_v27   ;;  %v2999_v36 = vpack.c.bf16 %v1679_v32, %v1678_v30  ;;  %v1620_v37 = vsel %vm1364_vm9, %v3298_v25, %v1492_v29  ;;  %v1490_v38 = vmul.f32 0.2, %v863_v34  ;;  %vm1362_vm11 = vcmp.gt.f32.partialorder %v863_v34, 0.0 }
  0xe4   : > { %2840 = vst [vmem:[%s3684_s24] sm:$0xff] %v2839_v31   ;;  %v3299_v39 = vpop.f32.mrf.mxu0  ;;  %v3363_v40 = vpop.f32.mrf.mxu1  ;;  %v1684_v42 = vsel %vm1428_vm10, %v3362_v26, %v1556_v33  ;;  %vm1426_vm14 = vcmp.gt.f32.partialorder %v1119_v35, 0.0  ;;  %v1554_v43 = vmul.f32 0.2, %v1119_v35 }
  0xe5   : > { %3187 = vst [vmem:[%s3684_s24 + $0x100] sm:$0xff] %v2999_v36   ;;  %vm1365_vm12 = vcmp.gt.f32.partialorder %v3299_v39, 0.0  ;;  %v1493_v41 = vmul.f32 0.2, %v3299_v39  ;;  %vm1429_vm13 = vcmp.gt.f32.partialorder %v3363_v40, 0.0  ;;  %v1618_v49 = vsel %vm1362_vm11, %v863_v34, %v1490_v38 }
  0xe6   : > { %v1557_v44 = vmul.f32 0.2, %v3363_v40  ;;  %v866_v45 = vpop.f32.mrf.mxu0  ;;  %v1122_v46 = vpop.f32.mrf.mxu1  ;;  %v1682_v58 = vsel %vm1426_vm14, %v1119_v35, %v1554_v43 }
  0xe7   : > { %v1621_v47 = vsel %vm1365_vm12, %v3299_v39, %v1493_v41  ;;  %vm1363_vm15 = vcmp.gt.f32.partialorder %v866_v45, 0.0  ;;  %v1491_v48 = vmul.f32 0.2, %v866_v45  ;;  %vm1427_vm0 = vcmp.gt.f32.partialorder %v1122_v46, 0.0 }
  0xe8   : > { %v2854_v50 = vpack.c.bf16 %v1621_v47, %v1620_v37  ;;  %v1685_v51 = vsel %vm1429_vm13, %v3363_v40, %v1557_v44  ;;  %v1555_v52 = vmul.f32 0.2, %v1122_v46  ;;  %v3302_v53 = vpop.f32.mrf.mxu0  ;;  %v3366_v54 = vpop.f32.mrf.mxu1 }
  0xe9   : > { %v3014_v55 = vpack.c.bf16 %v1685_v51, %v1684_v42  ;;  %v1619_v56 = vsel %vm1363_vm15, %v866_v45, %v1491_v48  ;;  %vm1368_vm1 = vcmp.gt.f32.partialorder %v3302_v53, 0.0  ;;  %v1496_v57 = vmul.f32 0.2, %v3302_v53 }
  0xea   : > { %3158 = vst [vmem:[%s3684_s24 + $0x18] sm:$0xff] %v2854_v50   ;;  %v2849_v59 = vpack.c.bf16 %v1619_v56, %v1618_v49  ;;  %v1683_v60 = vsel %vm1427_vm0, %v1122_v46, %v1555_v52  ;;  %v1560_v61 = vmul.f32 0.2, %v3366_v54  ;;  %v879_v62 = vpop.f32.mrf.mxu0  ;;  %v1135_v63 = vpop.f32.mrf.mxu1  ;;  %vm1432_vm2 = vcmp.gt.f32.partialorder %v3366_v54, 0.0 }
  0xeb   : > { %3190 = vst [vmem:[%s3684_s24 + $0x118] sm:$0xff] %v3014_v55   ;;  %v3009_v0 = vpack.c.bf16 %v1683_v60, %v1682_v58  ;;  %v1624_v1 = vsel %vm1368_vm1, %v3302_v53, %v1496_v57  ;;  %v1494_v2 = vmul.f32 0.2, %v879_v62  ;;  %vm1366_vm3 = vcmp.gt.f32.partialorder %v879_v62, 0.0 }
  0xec   : > { %3157 = vst [vmem:[%s3684_s24 + $0x10] sm:$0xff] %v2849_v59   ;;  %v3303_v3 = vpop.f32.mrf.mxu0  ;;  %v3367_v4 = vpop.f32.mrf.mxu1  ;;  %v1688_v6 = vsel %vm1432_vm2, %v3366_v54, %v1560_v61  ;;  %vm1430_vm6 = vcmp.gt.f32.partialorder %v1135_v63, 0.0  ;;  %v1558_v7 = vmul.f32 0.2, %v1135_v63 }
  0xed   : > { %3189 = vst [vmem:[%s3684_s24 + $0x110] sm:$0xff] %v3009_v0   ;;  %vm1369_vm4 = vcmp.gt.f32.partialorder %v3303_v3, 0.0  ;;  %v1497_v5 = vmul.f32 0.2, %v3303_v3  ;;  %vm1433_vm5 = vcmp.gt.f32.partialorder %v3367_v4, 0.0  ;;  %v1622_v13 = vsel %vm1366_vm3, %v879_v62, %v1494_v2 }
  0xee   : > { %v1561_v8 = vmul.f32 0.2, %v3367_v4  ;;  %v882_v9 = vpop.f32.mrf.mxu0  ;;  %v1138_v10 = vpop.f32.mrf.mxu1  ;;  %v1686_v22 = vsel %vm1430_vm6, %v1135_v63, %v1558_v7 }
  0xef   : > { %v1625_v11 = vsel %vm1369_vm4, %v3303_v3, %v1497_v5  ;;  %vm1367_vm7 = vcmp.gt.f32.partialorder %v882_v9, 0.0  ;;  %v1495_v12 = vmul.f32 0.2, %v882_v9  ;;  %vm1431_vm8 = vcmp.gt.f32.partialorder %v1138_v10, 0.0 }
  0xf0   : > { %v2864_v14 = vpack.c.bf16 %v1625_v11, %v1624_v1  ;;  %v1689_v15 = vsel %vm1433_vm5, %v3367_v4, %v1561_v8  ;;  %v1559_v16 = vmul.f32 0.2, %v1138_v10  ;;  %v3306_v17 = vpop.f32.mrf.mxu0  ;;  %v3370_v18 = vpop.f32.mrf.mxu1 }
  0xf1   : > { %v3024_v19 = vpack.c.bf16 %v1689_v15, %v1688_v6  ;;  %v1623_v20 = vsel %vm1367_vm7, %v882_v9, %v1495_v12  ;;  %vm1372_vm9 = vcmp.gt.f32.partialorder %v3306_v17, 0.0  ;;  %v1500_v21 = vmul.f32 0.2, %v3306_v17 }
  0xf2   : > { %3160 = vst [vmem:[%s3684_s24 + $0x28] sm:$0xff] %v2864_v14   ;;  %v2859_v23 = vpack.c.bf16 %v1623_v20, %v1622_v13  ;;  %v1687_v24 = vsel %vm1431_vm8, %v1138_v10, %v1559_v16  ;;  %v1564_v25 = vmul.f32 0.2, %v3370_v18  ;;  %v895_v26 = vpop.f32.mrf.mxu0  ;;  %v1151_v27 = vpop.f32.mrf.mxu1  ;;  %vm1436_vm10 = vcmp.gt.f32.partialorder %v3370_v18, 0.0 }
  0xf3   : > { %3192 = vst [vmem:[%s3684_s24 + $0x128] sm:$0xff] %v3024_v19   ;;  %v3019_v28 = vpack.c.bf16 %v1687_v24, %v1686_v22  ;;  %v1628_v29 = vsel %vm1372_vm9, %v3306_v17, %v1500_v21  ;;  %v1498_v30 = vmul.f32 0.2, %v895_v26  ;;  %vm1370_vm11 = vcmp.gt.f32.partialorder %v895_v26, 0.0 }
  0xf4   : > { %3159 = vst [vmem:[%s3684_s24 + $0x20] sm:$0xff] %v2859_v23   ;;  %v3307_v31 = vpop.f32.mrf.mxu0  ;;  %v3371_v32 = vpop.f32.mrf.mxu1  ;;  %v1692_v34 = vsel %vm1436_vm10, %v3370_v18, %v1564_v25  ;;  %vm1434_vm14 = vcmp.gt.f32.partialorder %v1151_v27, 0.0  ;;  %v1562_v35 = vmul.f32 0.2, %v1151_v27 }
  0xf5   : > { %3191 = vst [vmem:[%s3684_s24 + $0x120] sm:$0xff] %v3019_v28   ;;  %vm1373_vm12 = vcmp.gt.f32.partialorder %v3307_v31, 0.0  ;;  %v1501_v33 = vmul.f32 0.2, %v3307_v31  ;;  %vm1437_vm13 = vcmp.gt.f32.partialorder %v3371_v32, 0.0  ;;  %v1626_v41 = vsel %vm1370_vm11, %v895_v26, %v1498_v30 }
  0xf6   : > { %v1565_v36 = vmul.f32 0.2, %v3371_v32  ;;  %v898_v37 = vpop.f32.mrf.mxu0  ;;  %v1154_v38 = vpop.f32.mrf.mxu1  ;;  %v1690_v50 = vsel %vm1434_vm14, %v1151_v27, %v1562_v35 }
  0xf7   : > { %v1629_v39 = vsel %vm1373_vm12, %v3307_v31, %v1501_v33  ;;  %vm1371_vm15 = vcmp.gt.f32.partialorder %v898_v37, 0.0  ;;  %v1499_v40 = vmul.f32 0.2, %v898_v37  ;;  %vm1435_vm0 = vcmp.gt.f32.partialorder %v1154_v38, 0.0 }
  0xf8   : > { %v2874_v42 = vpack.c.bf16 %v1629_v39, %v1628_v29  ;;  %v1693_v43 = vsel %vm1437_vm13, %v3371_v32, %v1565_v36  ;;  %v1563_v44 = vmul.f32 0.2, %v1154_v38  ;;  %v3310_v45 = vpop.f32.mrf.mxu0  ;;  %v3374_v46 = vpop.f32.mrf.mxu1 }
  0xf9   : > { %v3034_v47 = vpack.c.bf16 %v1693_v43, %v1692_v34  ;;  %v1627_v48 = vsel %vm1371_vm15, %v898_v37, %v1499_v40  ;;  %vm1376_vm1 = vcmp.gt.f32.partialorder %v3310_v45, 0.0  ;;  %v1504_v49 = vmul.f32 0.2, %v3310_v45 }
  0xfa   : > { %3162 = vst [vmem:[%s3684_s24 + $0x38] sm:$0xff] %v2874_v42   ;;  %v2869_v51 = vpack.c.bf16 %v1627_v48, %v1626_v41  ;;  %v1691_v52 = vsel %vm1435_vm0, %v1154_v38, %v1563_v44  ;;  %v1568_v53 = vmul.f32 0.2, %v3374_v46  ;;  %v911_v54 = vpop.f32.mrf.mxu0  ;;  %v1167_v55 = vpop.f32.mrf.mxu1  ;;  %vm1440_vm2 = vcmp.gt.f32.partialorder %v3374_v46, 0.0 }
  0xfb   : > { %3194 = vst [vmem:[%s3684_s24 + $0x138] sm:$0xff] %v3034_v47   ;;  %v3029_v56 = vpack.c.bf16 %v1691_v52, %v1690_v50  ;;  %v1632_v57 = vsel %vm1376_vm1, %v3310_v45, %v1504_v49  ;;  %v1502_v58 = vmul.f32 0.2, %v911_v54  ;;  %vm1374_vm3 = vcmp.gt.f32.partialorder %v911_v54, 0.0 }
  0xfc   : > { %3161 = vst [vmem:[%s3684_s24 + $0x30] sm:$0xff] %v2869_v51   ;;  %v3311_v59 = vpop.f32.mrf.mxu0  ;;  %v3375_v60 = vpop.f32.mrf.mxu1  ;;  %v1696_v62 = vsel %vm1440_vm2, %v3374_v46, %v1568_v53  ;;  %vm1438_vm6 = vcmp.gt.f32.partialorder %v1167_v55, 0.0  ;;  %v1566_v63 = vmul.f32 0.2, %v1167_v55 }
  0xfd   : > { %3193 = vst [vmem:[%s3684_s24 + $0x130] sm:$0xff] %v3029_v56   ;;  %vm1377_vm4 = vcmp.gt.f32.partialorder %v3311_v59, 0.0  ;;  %v1505_v61 = vmul.f32 0.2, %v3311_v59  ;;  %vm1441_vm5 = vcmp.gt.f32.partialorder %v3375_v60, 0.0  ;;  %v1630_v5 = vsel %vm1374_vm3, %v911_v54, %v1502_v58 }
  0xfe   : > { %v1569_v0 = vmul.f32 0.2, %v3375_v60  ;;  %v914_v1 = vpop.f32.mrf.mxu0  ;;  %v1170_v2 = vpop.f32.mrf.mxu1  ;;  %v1694_v14 = vsel %vm1438_vm6, %v1167_v55, %v1566_v63 }
  0xff   : > { %v1633_v3 = vsel %vm1377_vm4, %v3311_v59, %v1505_v61  ;;  %vm1375_vm7 = vcmp.gt.f32.partialorder %v914_v1, 0.0  ;;  %v1503_v4 = vmul.f32 0.2, %v914_v1  ;;  %vm1439_vm8 = vcmp.gt.f32.partialorder %v1170_v2, 0.0 }
 0x100   : > { %v2884_v6 = vpack.c.bf16 %v1633_v3, %v1632_v57  ;;  %v1697_v7 = vsel %vm1441_vm5, %v3375_v60, %v1569_v0  ;;  %v1567_v8 = vmul.f32 0.2, %v1170_v2  ;;  %v3314_v9 = vpop.f32.mrf.mxu0  ;;  %v3378_v10 = vpop.f32.mrf.mxu1 }
 0x101   : > { %v3044_v11 = vpack.c.bf16 %v1697_v7, %v1696_v62  ;;  %v1631_v12 = vsel %vm1375_vm7, %v914_v1, %v1503_v4  ;;  %vm1380_vm9 = vcmp.gt.f32.partialorder %v3314_v9, 0.0  ;;  %v1508_v13 = vmul.f32 0.2, %v3314_v9 }
 0x102   : > { %3164 = vst [vmem:[%s3684_s24 + $0x48] sm:$0xff] %v2884_v6   ;;  %v2879_v15 = vpack.c.bf16 %v1631_v12, %v1630_v5  ;;  %v1695_v16 = vsel %vm1439_vm8, %v1170_v2, %v1567_v8  ;;  %v1572_v17 = vmul.f32 0.2, %v3378_v10  ;;  %v927_v18 = vpop.f32.mrf.mxu0  ;;  %v1183_v19 = vpop.f32.mrf.mxu1  ;;  %vm1444_vm10 = vcmp.gt.f32.partialorder %v3378_v10, 0.0 }
 0x103   : > { %3196 = vst [vmem:[%s3684_s24 + $0x148] sm:$0xff] %v3044_v11   ;;  %v3039_v20 = vpack.c.bf16 %v1695_v16, %v1694_v14  ;;  %v1636_v21 = vsel %vm1380_vm9, %v3314_v9, %v1508_v13  ;;  %v1506_v22 = vmul.f32 0.2, %v927_v18  ;;  %vm1378_vm11 = vcmp.gt.f32.partialorder %v927_v18, 0.0 }
 0x104   : > { %3163 = vst [vmem:[%s3684_s24 + $0x40] sm:$0xff] %v2879_v15   ;;  %v3315_v23 = vpop.f32.mrf.mxu0  ;;  %v3379_v24 = vpop.f32.mrf.mxu1  ;;  %v1700_v26 = vsel %vm1444_vm10, %v3378_v10, %v1572_v17  ;;  %vm1442_vm14 = vcmp.gt.f32.partialorder %v1183_v19, 0.0  ;;  %v1570_v27 = vmul.f32 0.2, %v1183_v19 }
 0x105   : > { %3195 = vst [vmem:[%s3684_s24 + $0x140] sm:$0xff] %v3039_v20   ;;  %vm1381_vm12 = vcmp.gt.f32.partialorder %v3315_v23, 0.0  ;;  %v1509_v25 = vmul.f32 0.2, %v3315_v23  ;;  %vm1445_vm13 = vcmp.gt.f32.partialorder %v3379_v24, 0.0  ;;  %v1634_v33 = vsel %vm1378_vm11, %v927_v18, %v1506_v22 }
 0x106   : > { %v1573_v28 = vmul.f32 0.2, %v3379_v24  ;;  %v930_v29 = vpop.f32.mrf.mxu0  ;;  %v1186_v30 = vpop.f32.mrf.mxu1  ;;  %v1698_v42 = vsel %vm1442_vm14, %v1183_v19, %v1570_v27 }
 0x107   : > { %v1637_v31 = vsel %vm1381_vm12, %v3315_v23, %v1509_v25  ;;  %vm1379_vm15 = vcmp.gt.f32.partialorder %v930_v29, 0.0  ;;  %v1507_v32 = vmul.f32 0.2, %v930_v29  ;;  %vm1443_vm0 = vcmp.gt.f32.partialorder %v1186_v30, 0.0 }
 0x108   : > { %v2894_v34 = vpack.c.bf16 %v1637_v31, %v1636_v21  ;;  %v1701_v35 = vsel %vm1445_vm13, %v3379_v24, %v1573_v28  ;;  %v1571_v36 = vmul.f32 0.2, %v1186_v30  ;;  %v3318_v37 = vpop.f32.mrf.mxu0  ;;  %v3382_v38 = vpop.f32.mrf.mxu1 }
 0x109   : > { %v3054_v39 = vpack.c.bf16 %v1701_v35, %v1700_v26  ;;  %v1635_v40 = vsel %vm1379_vm15, %v930_v29, %v1507_v32  ;;  %vm1384_vm1 = vcmp.gt.f32.partialorder %v3318_v37, 0.0  ;;  %v1512_v41 = vmul.f32 0.2, %v3318_v37 }
 0x10a   : > { %3166 = vst [vmem:[%s3684_s24 + $0x58] sm:$0xff] %v2894_v34   ;;  %v2889_v43 = vpack.c.bf16 %v1635_v40, %v1634_v33  ;;  %v1699_v44 = vsel %vm1443_vm0, %v1186_v30, %v1571_v36  ;;  %v1576_v45 = vmul.f32 0.2, %v3382_v38  ;;  %v943_v46 = vpop.f32.mrf.mxu0  ;;  %v1199_v47 = vpop.f32.mrf.mxu1  ;;  %vm1448_vm2 = vcmp.gt.f32.partialorder %v3382_v38, 0.0 }
 0x10b   : > { %3198 = vst [vmem:[%s3684_s24 + $0x158] sm:$0xff] %v3054_v39   ;;  %v3049_v48 = vpack.c.bf16 %v1699_v44, %v1698_v42  ;;  %v1640_v49 = vsel %vm1384_vm1, %v3318_v37, %v1512_v41  ;;  %v1510_v50 = vmul.f32 0.2, %v943_v46  ;;  %vm1382_vm3 = vcmp.gt.f32.partialorder %v943_v46, 0.0 }
 0x10c   : > { %3165 = vst [vmem:[%s3684_s24 + $0x50] sm:$0xff] %v2889_v43   ;;  %v3319_v51 = vpop.f32.mrf.mxu0  ;;  %v3383_v52 = vpop.f32.mrf.mxu1  ;;  %v1704_v54 = vsel %vm1448_vm2, %v3382_v38, %v1576_v45  ;;  %vm1446_vm6 = vcmp.gt.f32.partialorder %v1199_v47, 0.0  ;;  %v1574_v55 = vmul.f32 0.2, %v1199_v47 }
 0x10d   : > { %3197 = vst [vmem:[%s3684_s24 + $0x150] sm:$0xff] %v3049_v48   ;;  %vm1385_vm4 = vcmp.gt.f32.partialorder %v3319_v51, 0.0  ;;  %v1513_v53 = vmul.f32 0.2, %v3319_v51  ;;  %vm1449_vm5 = vcmp.gt.f32.partialorder %v3383_v52, 0.0  ;;  %v1638_v61 = vsel %vm1382_vm3, %v943_v46, %v1510_v50 }
 0x10e   : > { %v1577_v56 = vmul.f32 0.2, %v3383_v52  ;;  %v946_v57 = vpop.f32.mrf.mxu0  ;;  %v1202_v58 = vpop.f32.mrf.mxu1  ;;  %v1702_v6 = vsel %vm1446_vm6, %v1199_v47, %v1574_v55 }
 0x10f   : > { %v1641_v59 = vsel %vm1385_vm4, %v3319_v51, %v1513_v53  ;;  %vm1383_vm7 = vcmp.gt.f32.partialorder %v946_v57, 0.0  ;;  %v1511_v60 = vmul.f32 0.2, %v946_v57  ;;  %vm1447_vm8 = vcmp.gt.f32.partialorder %v1202_v58, 0.0 }
 0x110   : > { %v2904_v62 = vpack.c.bf16 %v1641_v59, %v1640_v49  ;;  %v1705_v63 = vsel %vm1449_vm5, %v3383_v52, %v1577_v56  ;;  %v1575_v0 = vmul.f32 0.2, %v1202_v58  ;;  %v3322_v1 = vpop.f32.mrf.mxu0  ;;  %v3386_v2 = vpop.f32.mrf.mxu1 }
 0x111   : > { %v3064_v3 = vpack.c.bf16 %v1705_v63, %v1704_v54  ;;  %v1639_v4 = vsel %vm1383_vm7, %v946_v57, %v1511_v60  ;;  %vm1388_vm9 = vcmp.gt.f32.partialorder %v3322_v1, 0.0  ;;  %v1516_v5 = vmul.f32 0.2, %v3322_v1 }
 0x112   : > { %3168 = vst [vmem:[%s3684_s24 + $0x68] sm:$0xff] %v2904_v62   ;;  %v2899_v7 = vpack.c.bf16 %v1639_v4, %v1638_v61  ;;  %v1703_v8 = vsel %vm1447_vm8, %v1202_v58, %v1575_v0  ;;  %v1580_v9 = vmul.f32 0.2, %v3386_v2  ;;  %v959_v10 = vpop.f32.mrf.mxu0  ;;  %v1215_v11 = vpop.f32.mrf.mxu1  ;;  %vm1452_vm10 = vcmp.gt.f32.partialorder %v3386_v2, 0.0 }
 0x113   : > { %3200 = vst [vmem:[%s3684_s24 + $0x168] sm:$0xff] %v3064_v3   ;;  %v3059_v12 = vpack.c.bf16 %v1703_v8, %v1702_v6  ;;  %v1644_v13 = vsel %vm1388_vm9, %v3322_v1, %v1516_v5  ;;  %v1514_v14 = vmul.f32 0.2, %v959_v10  ;;  %vm1386_vm11 = vcmp.gt.f32.partialorder %v959_v10, 0.0 }
 0x114   : > { %3167 = vst [vmem:[%s3684_s24 + $0x60] sm:$0xff] %v2899_v7   ;;  %v3323_v15 = vpop.f32.mrf.mxu0  ;;  %v3387_v16 = vpop.f32.mrf.mxu1  ;;  %v1708_v18 = vsel %vm1452_vm10, %v3386_v2, %v1580_v9  ;;  %vm1450_vm14 = vcmp.gt.f32.partialorder %v1215_v11, 0.0  ;;  %v1578_v19 = vmul.f32 0.2, %v1215_v11 }
 0x115   : > { %3199 = vst [vmem:[%s3684_s24 + $0x160] sm:$0xff] %v3059_v12   ;;  %vm1389_vm12 = vcmp.gt.f32.partialorder %v3323_v15, 0.0  ;;  %v1517_v17 = vmul.f32 0.2, %v3323_v15  ;;  %vm1453_vm13 = vcmp.gt.f32.partialorder %v3387_v16, 0.0  ;;  %v1642_v25 = vsel %vm1386_vm11, %v959_v10, %v1514_v14 }
 0x116   : > { %v1581_v20 = vmul.f32 0.2, %v3387_v16  ;;  %v962_v21 = vpop.f32.mrf.mxu0  ;;  %v1218_v22 = vpop.f32.mrf.mxu1  ;;  %v1706_v34 = vsel %vm1450_vm14, %v1215_v11, %v1578_v19 }
 0x117   : > { %v1645_v23 = vsel %vm1389_vm12, %v3323_v15, %v1517_v17  ;;  %vm1387_vm15 = vcmp.gt.f32.partialorder %v962_v21, 0.0  ;;  %v1515_v24 = vmul.f32 0.2, %v962_v21  ;;  %vm1451_vm0 = vcmp.gt.f32.partialorder %v1218_v22, 0.0 }
 0x118   : > { %v2914_v26 = vpack.c.bf16 %v1645_v23, %v1644_v13  ;;  %v1709_v27 = vsel %vm1453_vm13, %v3387_v16, %v1581_v20  ;;  %v1579_v28 = vmul.f32 0.2, %v1218_v22  ;;  %v3326_v29 = vpop.f32.mrf.mxu0  ;;  %v3390_v30 = vpop.f32.mrf.mxu1 }
 0x119   : > { %v3074_v31 = vpack.c.bf16 %v1709_v27, %v1708_v18  ;;  %v1643_v32 = vsel %vm1387_vm15, %v962_v21, %v1515_v24  ;;  %vm1392_vm1 = vcmp.gt.f32.partialorder %v3326_v29, 0.0  ;;  %v1520_v33 = vmul.f32 0.2, %v3326_v29 }
 0x11a   : > { %3170 = vst [vmem:[%s3684_s24 + $0x78] sm:$0xff] %v2914_v26   ;;  %v2909_v35 = vpack.c.bf16 %v1643_v32, %v1642_v25  ;;  %v1707_v36 = vsel %vm1451_vm0, %v1218_v22, %v1579_v28  ;;  %v1584_v37 = vmul.f32 0.2, %v3390_v30  ;;  %v975_v38 = vpop.f32.mrf.mxu0  ;;  %v1231_v39 = vpop.f32.mrf.mxu1  ;;  %vm1456_vm2 = vcmp.gt.f32.partialorder %v3390_v30, 0.0 }
 0x11b   : > { %3202 = vst [vmem:[%s3684_s24 + $0x178] sm:$0xff] %v3074_v31   ;;  %v3069_v40 = vpack.c.bf16 %v1707_v36, %v1706_v34  ;;  %v1648_v41 = vsel %vm1392_vm1, %v3326_v29, %v1520_v33  ;;  %v1518_v42 = vmul.f32 0.2, %v975_v38  ;;  %vm1390_vm3 = vcmp.gt.f32.partialorder %v975_v38, 0.0 }
 0x11c   : > { %3169 = vst [vmem:[%s3684_s24 + $0x70] sm:$0xff] %v2909_v35   ;;  %v3327_v43 = vpop.f32.mrf.mxu0  ;;  %v3391_v44 = vpop.f32.mrf.mxu1  ;;  %v1712_v46 = vsel %vm1456_vm2, %v3390_v30, %v1584_v37  ;;  %vm1454_vm6 = vcmp.gt.f32.partialorder %v1231_v39, 0.0  ;;  %v1582_v47 = vmul.f32 0.2, %v1231_v39 }
 0x11d   : > { %3201 = vst [vmem:[%s3684_s24 + $0x170] sm:$0xff] %v3069_v40   ;;  %vm1393_vm4 = vcmp.gt.f32.partialorder %v3327_v43, 0.0  ;;  %v1521_v45 = vmul.f32 0.2, %v3327_v43  ;;  %vm1457_vm5 = vcmp.gt.f32.partialorder %v3391_v44, 0.0  ;;  %v1646_v53 = vsel %vm1390_vm3, %v975_v38, %v1518_v42 }
 0x11e   : > { %v1585_v48 = vmul.f32 0.2, %v3391_v44  ;;  %v978_v49 = vpop.f32.mrf.mxu0  ;;  %v1234_v50 = vpop.f32.mrf.mxu1  ;;  %v1710_v62 = vsel %vm1454_vm6, %v1231_v39, %v1582_v47 }
 0x11f   : > { %v1649_v51 = vsel %vm1393_vm4, %v3327_v43, %v1521_v45  ;;  %vm1391_vm7 = vcmp.gt.f32.partialorder %v978_v49, 0.0  ;;  %v1519_v52 = vmul.f32 0.2, %v978_v49  ;;  %vm1455_vm8 = vcmp.gt.f32.partialorder %v1234_v50, 0.0 }
 0x120   : > { %v2924_v54 = vpack.c.bf16 %v1649_v51, %v1648_v41  ;;  %v1713_v55 = vsel %vm1457_vm5, %v3391_v44, %v1585_v48  ;;  %v1583_v56 = vmul.f32 0.2, %v1234_v50  ;;  %v3330_v57 = vpop.f32.mrf.mxu0  ;;  %v3394_v58 = vpop.f32.mrf.mxu1 }
 0x121   : > { %v3084_v59 = vpack.c.bf16 %v1713_v55, %v1712_v46  ;;  %v1647_v60 = vsel %vm1391_vm7, %v978_v49, %v1519_v52  ;;  %vm1396_vm9 = vcmp.gt.f32.partialorder %v3330_v57, 0.0  ;;  %v1524_v61 = vmul.f32 0.2, %v3330_v57 }
 0x122   : > { %3172 = vst [vmem:[%s3684_s24 + $0x88] sm:$0xff] %v2924_v54   ;;  %v2919_v63 = vpack.c.bf16 %v1647_v60, %v1646_v53  ;;  %v1711_v0 = vsel %vm1455_vm8, %v1234_v50, %v1583_v56  ;;  %v1588_v1 = vmul.f32 0.2, %v3394_v58  ;;  %v991_v2 = vpop.f32.mrf.mxu0  ;;  %v1247_v3 = vpop.f32.mrf.mxu1  ;;  %vm1460_vm10 = vcmp.gt.f32.partialorder %v3394_v58, 0.0 }
 0x123   : > { %3204 = vst [vmem:[%s3684_s24 + $0x188] sm:$0xff] %v3084_v59   ;;  %v3079_v4 = vpack.c.bf16 %v1711_v0, %v1710_v62  ;;  %v1652_v5 = vsel %vm1396_vm9, %v3330_v57, %v1524_v61  ;;  %v1522_v6 = vmul.f32 0.2, %v991_v2  ;;  %vm1394_vm11 = vcmp.gt.f32.partialorder %v991_v2, 0.0 }
 0x124   : > { %3171 = vst [vmem:[%s3684_s24 + $0x80] sm:$0xff] %v2919_v63   ;;  %v3331_v7 = vpop.f32.mrf.mxu0  ;;  %v3395_v8 = vpop.f32.mrf.mxu1  ;;  %v1716_v10 = vsel %vm1460_vm10, %v3394_v58, %v1588_v1  ;;  %vm1458_vm14 = vcmp.gt.f32.partialorder %v1247_v3, 0.0  ;;  %v1586_v11 = vmul.f32 0.2, %v1247_v3 }
 0x125   : > { %3203 = vst [vmem:[%s3684_s24 + $0x180] sm:$0xff] %v3079_v4   ;;  %vm1397_vm12 = vcmp.gt.f32.partialorder %v3331_v7, 0.0  ;;  %v1525_v9 = vmul.f32 0.2, %v3331_v7  ;;  %vm1461_vm13 = vcmp.gt.f32.partialorder %v3395_v8, 0.0  ;;  %v1650_v17 = vsel %vm1394_vm11, %v991_v2, %v1522_v6 }
 0x126   : > { %v1589_v12 = vmul.f32 0.2, %v3395_v8  ;;  %v994_v13 = vpop.f32.mrf.mxu0  ;;  %v1250_v14 = vpop.f32.mrf.mxu1  ;;  %v1714_v26 = vsel %vm1458_vm14, %v1247_v3, %v1586_v11 }
 0x127   : > { %v1653_v15 = vsel %vm1397_vm12, %v3331_v7, %v1525_v9  ;;  %vm1395_vm15 = vcmp.gt.f32.partialorder %v994_v13, 0.0  ;;  %v1523_v16 = vmul.f32 0.2, %v994_v13  ;;  %vm1459_vm0 = vcmp.gt.f32.partialorder %v1250_v14, 0.0 }
 0x128   : > { %v2934_v18 = vpack.c.bf16 %v1653_v15, %v1652_v5  ;;  %v1717_v19 = vsel %vm1461_vm13, %v3395_v8, %v1589_v12  ;;  %v1587_v20 = vmul.f32 0.2, %v1250_v14  ;;  %v3334_v21 = vpop.f32.mrf.mxu0  ;;  %v3398_v22 = vpop.f32.mrf.mxu1 }
 0x129   : > { %v3094_v23 = vpack.c.bf16 %v1717_v19, %v1716_v10  ;;  %v1651_v24 = vsel %vm1395_vm15, %v994_v13, %v1523_v16  ;;  %vm1400_vm1 = vcmp.gt.f32.partialorder %v3334_v21, 0.0  ;;  %v1528_v25 = vmul.f32 0.2, %v3334_v21 }
 0x12a   : > { %3174 = vst [vmem:[%s3684_s24 + $0x98] sm:$0xff] %v2934_v18   ;;  %v2929_v27 = vpack.c.bf16 %v1651_v24, %v1650_v17  ;;  %v1715_v28 = vsel %vm1459_vm0, %v1250_v14, %v1587_v20  ;;  %v1592_v29 = vmul.f32 0.2, %v3398_v22  ;;  %v1007_v30 = vpop.f32.mrf.mxu0  ;;  %v1263_v31 = vpop.f32.mrf.mxu1  ;;  %vm1464_vm2 = vcmp.gt.f32.partialorder %v3398_v22, 0.0 }
 0x12b   : > { %3206 = vst [vmem:[%s3684_s24 + $0x198] sm:$0xff] %v3094_v23   ;;  %v3089_v32 = vpack.c.bf16 %v1715_v28, %v1714_v26  ;;  %v1656_v33 = vsel %vm1400_vm1, %v3334_v21, %v1528_v25  ;;  %v1526_v34 = vmul.f32 0.2, %v1007_v30  ;;  %vm1398_vm3 = vcmp.gt.f32.partialorder %v1007_v30, 0.0 }
 0x12c   : > { %3173 = vst [vmem:[%s3684_s24 + $0x90] sm:$0xff] %v2929_v27   ;;  %v3335_v35 = vpop.f32.mrf.mxu0  ;;  %v3399_v36 = vpop.f32.mrf.mxu1  ;;  %v1720_v38 = vsel %vm1464_vm2, %v3398_v22, %v1592_v29  ;;  %vm1462_vm6 = vcmp.gt.f32.partialorder %v1263_v31, 0.0  ;;  %v1590_v39 = vmul.f32 0.2, %v1263_v31 }
 0x12d   : > { %3205 = vst [vmem:[%s3684_s24 + $0x190] sm:$0xff] %v3089_v32   ;;  %vm1401_vm4 = vcmp.gt.f32.partialorder %v3335_v35, 0.0  ;;  %v1529_v37 = vmul.f32 0.2, %v3335_v35  ;;  %vm1465_vm5 = vcmp.gt.f32.partialorder %v3399_v36, 0.0  ;;  %v1654_v45 = vsel %vm1398_vm3, %v1007_v30, %v1526_v34 }
 0x12e   : > { %v1593_v40 = vmul.f32 0.2, %v3399_v36  ;;  %v1010_v41 = vpop.f32.mrf.mxu0  ;;  %v1266_v42 = vpop.f32.mrf.mxu1  ;;  %v1718_v54 = vsel %vm1462_vm6, %v1263_v31, %v1590_v39 }
 0x12f   : > { %v1657_v43 = vsel %vm1401_vm4, %v3335_v35, %v1529_v37  ;;  %vm1399_vm7 = vcmp.gt.f32.partialorder %v1010_v41, 0.0  ;;  %v1527_v44 = vmul.f32 0.2, %v1010_v41  ;;  %vm1463_vm8 = vcmp.gt.f32.partialorder %v1266_v42, 0.0 }
 0x130   : > { %v2944_v46 = vpack.c.bf16 %v1657_v43, %v1656_v33  ;;  %v1721_v47 = vsel %vm1465_vm5, %v3399_v36, %v1593_v40  ;;  %v1591_v48 = vmul.f32 0.2, %v1266_v42  ;;  %v3338_v49 = vpop.f32.mrf.mxu0  ;;  %v3402_v50 = vpop.f32.mrf.mxu1 }
 0x131   : > { %v3104_v51 = vpack.c.bf16 %v1721_v47, %v1720_v38  ;;  %v1655_v52 = vsel %vm1399_vm7, %v1010_v41, %v1527_v44  ;;  %vm1404_vm9 = vcmp.gt.f32.partialorder %v3338_v49, 0.0  ;;  %v1532_v53 = vmul.f32 0.2, %v3338_v49 }
 0x132   : > { %3176 = vst [vmem:[%s3684_s24 + $0xa8] sm:$0xff] %v2944_v46   ;;  %v2939_v55 = vpack.c.bf16 %v1655_v52, %v1654_v45  ;;  %v1719_v56 = vsel %vm1463_vm8, %v1266_v42, %v1591_v48  ;;  %v1596_v57 = vmul.f32 0.2, %v3402_v50  ;;  %v1023_v58 = vpop.f32.mrf.mxu0  ;;  %v1279_v59 = vpop.f32.mrf.mxu1  ;;  %vm1468_vm10 = vcmp.gt.f32.partialorder %v3402_v50, 0.0 }
 0x133   : > { %3208 = vst [vmem:[%s3684_s24 + $0x1a8] sm:$0xff] %v3104_v51   ;;  %v3099_v60 = vpack.c.bf16 %v1719_v56, %v1718_v54  ;;  %v1660_v61 = vsel %vm1404_vm9, %v3338_v49, %v1532_v53  ;;  %v1530_v62 = vmul.f32 0.2, %v1023_v58  ;;  %vm1402_vm11 = vcmp.gt.f32.partialorder %v1023_v58, 0.0 }
 0x134   : > { %3175 = vst [vmem:[%s3684_s24 + $0xa0] sm:$0xff] %v2939_v55   ;;  %v3339_v63 = vpop.f32.mrf.mxu0  ;;  %v3403_v0 = vpop.f32.mrf.mxu1  ;;  %v1724_v2 = vsel %vm1468_vm10, %v3402_v50, %v1596_v57  ;;  %vm1466_vm14 = vcmp.gt.f32.partialorder %v1279_v59, 0.0  ;;  %v1594_v3 = vmul.f32 0.2, %v1279_v59 }
 0x135   : > { %3207 = vst [vmem:[%s3684_s24 + $0x1a0] sm:$0xff] %v3099_v60   ;;  %vm1405_vm12 = vcmp.gt.f32.partialorder %v3339_v63, 0.0  ;;  %v1533_v1 = vmul.f32 0.2, %v3339_v63  ;;  %vm1469_vm13 = vcmp.gt.f32.partialorder %v3403_v0, 0.0  ;;  %v1658_v9 = vsel %vm1402_vm11, %v1023_v58, %v1530_v62 }
 0x136   : > { %v1597_v4 = vmul.f32 0.2, %v3403_v0  ;;  %v1026_v5 = vpop.f32.mrf.mxu0  ;;  %v1282_v6 = vpop.f32.mrf.mxu1  ;;  %v1722_v18 = vsel %vm1466_vm14, %v1279_v59, %v1594_v3 }
 0x137   : > { %v1661_v7 = vsel %vm1405_vm12, %v3339_v63, %v1533_v1  ;;  %vm1403_vm15 = vcmp.gt.f32.partialorder %v1026_v5, 0.0  ;;  %v1531_v8 = vmul.f32 0.2, %v1026_v5  ;;  %vm1467_vm0 = vcmp.gt.f32.partialorder %v1282_v6, 0.0 }
 0x138   : > { %v2954_v10 = vpack.c.bf16 %v1661_v7, %v1660_v61  ;;  %v1725_v11 = vsel %vm1469_vm13, %v3403_v0, %v1597_v4  ;;  %v1595_v12 = vmul.f32 0.2, %v1282_v6  ;;  %v3342_v13 = vpop.f32.mrf.mxu0  ;;  %v3406_v14 = vpop.f32.mrf.mxu1 }
 0x139   : > { %v3114_v15 = vpack.c.bf16 %v1725_v11, %v1724_v2  ;;  %v1659_v16 = vsel %vm1403_vm15, %v1026_v5, %v1531_v8  ;;  %vm1408_vm1 = vcmp.gt.f32.partialorder %v3342_v13, 0.0  ;;  %v1536_v17 = vmul.f32 0.2, %v3342_v13 }
 0x13a   : > { %3178 = vst [vmem:[%s3684_s24 + $0xb8] sm:$0xff] %v2954_v10   ;;  %v2949_v19 = vpack.c.bf16 %v1659_v16, %v1658_v9  ;;  %v1723_v20 = vsel %vm1467_vm0, %v1282_v6, %v1595_v12  ;;  %v1600_v21 = vmul.f32 0.2, %v3406_v14  ;;  %v1039_v22 = vpop.f32.mrf.mxu0  ;;  %v1295_v23 = vpop.f32.mrf.mxu1  ;;  %vm1472_vm2 = vcmp.gt.f32.partialorder %v3406_v14, 0.0 }
 0x13b   : > { %3210 = vst [vmem:[%s3684_s24 + $0x1b8] sm:$0xff] %v3114_v15   ;;  %v3109_v24 = vpack.c.bf16 %v1723_v20, %v1722_v18  ;;  %v1664_v25 = vsel %vm1408_vm1, %v3342_v13, %v1536_v17  ;;  %v1534_v26 = vmul.f32 0.2, %v1039_v22  ;;  %vm1406_vm3 = vcmp.gt.f32.partialorder %v1039_v22, 0.0 }
 0x13c   : > { %3177 = vst [vmem:[%s3684_s24 + $0xb0] sm:$0xff] %v2949_v19   ;;  %v3343_v27 = vpop.f32.mrf.mxu0  ;;  %v3407_v28 = vpop.f32.mrf.mxu1  ;;  %v1728_v30 = vsel %vm1472_vm2, %v3406_v14, %v1600_v21  ;;  %vm1470_vm6 = vcmp.gt.f32.partialorder %v1295_v23, 0.0  ;;  %v1598_v31 = vmul.f32 0.2, %v1295_v23 }
 0x13d   : > { %3209 = vst [vmem:[%s3684_s24 + $0x1b0] sm:$0xff] %v3109_v24   ;;  %vm1409_vm4 = vcmp.gt.f32.partialorder %v3343_v27, 0.0  ;;  %v1537_v29 = vmul.f32 0.2, %v3343_v27  ;;  %vm1473_vm5 = vcmp.gt.f32.partialorder %v3407_v28, 0.0  ;;  %v1662_v37 = vsel %vm1406_vm3, %v1039_v22, %v1534_v26 }
 0x13e   : > { %v1601_v32 = vmul.f32 0.2, %v3407_v28  ;;  %v1042_v33 = vpop.f32.mrf.mxu0  ;;  %v1298_v34 = vpop.f32.mrf.mxu1  ;;  %v1726_v46 = vsel %vm1470_vm6, %v1295_v23, %v1598_v31 }
 0x13f   : > { %v1665_v35 = vsel %vm1409_vm4, %v3343_v27, %v1537_v29  ;;  %vm1407_vm7 = vcmp.gt.f32.partialorder %v1042_v33, 0.0  ;;  %v1535_v36 = vmul.f32 0.2, %v1042_v33  ;;  %vm1471_vm8 = vcmp.gt.f32.partialorder %v1298_v34, 0.0 }
 0x140   : > { %v2964_v38 = vpack.c.bf16 %v1665_v35, %v1664_v25  ;;  %v1729_v39 = vsel %vm1473_vm5, %v3407_v28, %v1601_v32  ;;  %v1599_v40 = vmul.f32 0.2, %v1298_v34  ;;  %v3346_v41 = vpop.f32.mrf.mxu0  ;;  %v3410_v42 = vpop.f32.mrf.mxu1 }
 0x141   : > { %v3124_v43 = vpack.c.bf16 %v1729_v39, %v1728_v30  ;;  %v1663_v44 = vsel %vm1407_vm7, %v1042_v33, %v1535_v36  ;;  %vm1412_vm9 = vcmp.gt.f32.partialorder %v3346_v41, 0.0  ;;  %v1540_v45 = vmul.f32 0.2, %v3346_v41 }
 0x142   : > { %3180 = vst [vmem:[%s3684_s24 + $0xc8] sm:$0xff] %v2964_v38   ;;  %v2959_v47 = vpack.c.bf16 %v1663_v44, %v1662_v37  ;;  %v1727_v48 = vsel %vm1471_vm8, %v1298_v34, %v1599_v40  ;;  %v1604_v49 = vmul.f32 0.2, %v3410_v42  ;;  %v1055_v50 = vpop.f32.mrf.mxu0  ;;  %v1311_v51 = vpop.f32.mrf.mxu1  ;;  %vm1476_vm10 = vcmp.gt.f32.partialorder %v3410_v42, 0.0 }
 0x143   : > { %3212 = vst [vmem:[%s3684_s24 + $0x1c8] sm:$0xff] %v3124_v43   ;;  %v3119_v52 = vpack.c.bf16 %v1727_v48, %v1726_v46  ;;  %v1668_v53 = vsel %vm1412_vm9, %v3346_v41, %v1540_v45  ;;  %v1538_v54 = vmul.f32 0.2, %v1055_v50  ;;  %vm1410_vm11 = vcmp.gt.f32.partialorder %v1055_v50, 0.0 }
 0x144   : > { %3179 = vst [vmem:[%s3684_s24 + $0xc0] sm:$0xff] %v2959_v47   ;;  %v3347_v55 = vpop.f32.mrf.mxu0  ;;  %v3411_v56 = vpop.f32.mrf.mxu1  ;;  %v1732_v58 = vsel %vm1476_vm10, %v3410_v42, %v1604_v49  ;;  %vm1474_vm14 = vcmp.gt.f32.partialorder %v1311_v51, 0.0  ;;  %v1602_v59 = vmul.f32 0.2, %v1311_v51 }
 0x145   : > { %3211 = vst [vmem:[%s3684_s24 + $0x1c0] sm:$0xff] %v3119_v52   ;;  %vm1413_vm12 = vcmp.gt.f32.partialorder %v3347_v55, 0.0  ;;  %v1541_v57 = vmul.f32 0.2, %v3347_v55  ;;  %vm1477_vm13 = vcmp.gt.f32.partialorder %v3411_v56, 0.0  ;;  %v1666_v1 = vsel %vm1410_vm11, %v1055_v50, %v1538_v54 }
 0x146   : > { %v1605_v60 = vmul.f32 0.2, %v3411_v56  ;;  %v1058_v61 = vpop.f32.mrf.mxu0  ;;  %v1314_v62 = vpop.f32.mrf.mxu1  ;;  %v1730_v10 = vsel %vm1474_vm14, %v1311_v51, %v1602_v59 }
 0x147   : > { %v1669_v63 = vsel %vm1413_vm12, %v3347_v55, %v1541_v57  ;;  %vm1411_vm15 = vcmp.gt.f32.partialorder %v1058_v61, 0.0  ;;  %v1539_v0 = vmul.f32 0.2, %v1058_v61  ;;  %vm1475_vm0 = vcmp.gt.f32.partialorder %v1314_v62, 0.0 }
 0x148   : > { %v2974_v2 = vpack.c.bf16 %v1669_v63, %v1668_v53  ;;  %v1733_v3 = vsel %vm1477_vm13, %v3411_v56, %v1605_v60  ;;  %v1603_v4 = vmul.f32 0.2, %v1314_v62  ;;  %v3350_v5 = vpop.f32.mrf.mxu0  ;;  %v3414_v6 = vpop.f32.mrf.mxu1 }
 0x149   : > { %v3134_v7 = vpack.c.bf16 %v1733_v3, %v1732_v58  ;;  %v1667_v8 = vsel %vm1411_vm15, %v1058_v61, %v1539_v0  ;;  %vm1416_vm1 = vcmp.gt.f32.partialorder %v3350_v5, 0.0  ;;  %v1544_v9 = vmul.f32 0.2, %v3350_v5 }
 0x14a   : > { %3182 = vst [vmem:[%s3684_s24 + $0xd8] sm:$0xff] %v2974_v2   ;;  %v2969_v11 = vpack.c.bf16 %v1667_v8, %v1666_v1  ;;  %v1731_v12 = vsel %vm1475_vm0, %v1314_v62, %v1603_v4  ;;  %v1608_v13 = vmul.f32 0.2, %v3414_v6  ;;  %v1071_v14 = vpop.f32.mrf.mxu0  ;;  %v1327_v15 = vpop.f32.mrf.mxu1  ;;  %vm1480_vm2 = vcmp.gt.f32.partialorder %v3414_v6, 0.0 }
 0x14b   : > { %3214 = vst [vmem:[%s3684_s24 + $0x1d8] sm:$0xff] %v3134_v7   ;;  %v3129_v16 = vpack.c.bf16 %v1731_v12, %v1730_v10  ;;  %v1672_v17 = vsel %vm1416_vm1, %v3350_v5, %v1544_v9  ;;  %v1542_v18 = vmul.f32 0.2, %v1071_v14  ;;  %vm1414_vm3 = vcmp.gt.f32.partialorder %v1071_v14, 0.0 }
 0x14c   : > { %3181 = vst [vmem:[%s3684_s24 + $0xd0] sm:$0xff] %v2969_v11   ;;  %v3351_v19 = vpop.f32.mrf.mxu0  ;;  %v3415_v20 = vpop.f32.mrf.mxu1  ;;  %v1736_v22 = vsel %vm1480_vm2, %v3414_v6, %v1608_v13  ;;  %vm1478_vm6 = vcmp.gt.f32.partialorder %v1327_v15, 0.0  ;;  %v1606_v23 = vmul.f32 0.2, %v1327_v15 }
 0x14d   : > { %3213 = vst [vmem:[%s3684_s24 + $0x1d0] sm:$0xff] %v3129_v16   ;;  %vm1417_vm4 = vcmp.gt.f32.partialorder %v3351_v19, 0.0  ;;  %v1545_v21 = vmul.f32 0.2, %v3351_v19  ;;  %vm1481_vm5 = vcmp.gt.f32.partialorder %v3415_v20, 0.0  ;;  %v1670_v29 = vsel %vm1414_vm3, %v1071_v14, %v1542_v18 }
 0x14e   : > { %v1609_v24 = vmul.f32 0.2, %v3415_v20  ;;  %v1074_v25 = vpop.f32.mrf.mxu0  ;;  %v1330_v26 = vpop.f32.mrf.mxu1  ;;  %v1734_v38 = vsel %vm1478_vm6, %v1327_v15, %v1606_v23 }
 0x14f   : > { %v1673_v27 = vsel %vm1417_vm4, %v3351_v19, %v1545_v21  ;;  %vm1415_vm7 = vcmp.gt.f32.partialorder %v1074_v25, 0.0  ;;  %v1543_v28 = vmul.f32 0.2, %v1074_v25  ;;  %vm1479_vm8 = vcmp.gt.f32.partialorder %v1330_v26, 0.0 }
 0x150   : > { %v2984_v30 = vpack.c.bf16 %v1673_v27, %v1672_v17  ;;  %v1737_v31 = vsel %vm1481_vm5, %v3415_v20, %v1609_v24  ;;  %v1607_v32 = vmul.f32 0.2, %v1330_v26  ;;  %v3354_v33 = vpop.f32.mrf.mxu0  ;;  %v3418_v34 = vpop.f32.mrf.mxu1 }
 0x151   : > { %v3144_v35 = vpack.c.bf16 %v1737_v31, %v1736_v22  ;;  %v1671_v36 = vsel %vm1415_vm7, %v1074_v25, %v1543_v28  ;;  %vm1420_vm9 = vcmp.gt.f32.partialorder %v3354_v33, 0.0  ;;  %v1548_v37 = vmul.f32 0.2, %v3354_v33 }
 0x152   : > { %3184 = vst [vmem:[%s3684_s24 + $0xe8] sm:$0xff] %v2984_v30   ;;  %v2979_v39 = vpack.c.bf16 %v1671_v36, %v1670_v29  ;;  %v1735_v40 = vsel %vm1479_vm8, %v1330_v26, %v1607_v32  ;;  %v1087_v41 = vpop.f32.mrf.mxu0  ;;  %v1343_v42 = vpop.f32.mrf.mxu1  ;;  %vm1484_vm10 = vcmp.gt.f32.partialorder %v3418_v34, 0.0  ;;  %v1612_v45 = vmul.f32 0.2, %v3418_v34 }
 0x153   : > { %3216 = vst [vmem:[%s3684_s24 + $0x1e8] sm:$0xff] %v3144_v35   ;;  %v3139_v43 = vpack.c.bf16 %v1735_v40, %v1734_v38  ;;  %v1676_v44 = vsel %vm1420_vm9, %v3354_v33, %v1548_v37  ;;  %v1546_v48 = vmul.f32 0.2, %v1087_v41  ;;  %vm1418_vm13 = vcmp.gt.f32.partialorder %v1087_v41, 0.0 }
 0x154   : > { %3183 = vst [vmem:[%s3684_s24 + $0xe0] sm:$0xff] %v2979_v39   ;;  %v3355_v46 = vpop.f32.mrf.mxu0  ;;  %v3419_v47 = vpop.f32.mrf.mxu1  ;;  %vm1482_vm14 = vcmp.gt.f32.partialorder %v1343_v42, 0.0  ;;  %v1610_v50 = vmul.f32 0.2, %v1343_v42  ;;  %v1740_v56 = vsel %vm1484_vm10, %v3418_v34, %v1612_v45 }
 0x155   : > { %3215 = vst [vmem:[%s3684_s24 + $0x1e0] sm:$0xff] %v3139_v43   ;;  %vm1421_vm11 = vcmp.gt.f32.partialorder %v3355_v46, 0.0  ;;  %v1549_v49 = vmul.f32 0.2, %v3355_v46  ;;  %vm1485_vm12 = vcmp.gt.f32.partialorder %v3419_v47, 0.0  ;;  %v1674_v60 = vsel %vm1418_vm13, %v1087_v41, %v1546_v48 }
 0x156   : > { %v1613_v51 = vmul.f32 0.2, %v3419_v47  ;;  %v1090_v52 = vpop.f32.mrf.mxu0  ;;  %v1346_v53 = vpop.f32.mrf.mxu1  ;;  %v1738_v63 = vsel %vm1482_vm14, %v1343_v42, %v1610_v50 }
 0x157   : > { %v1677_v54 = vsel %vm1421_vm11, %v3355_v46, %v1549_v49  ;;  %vm1419_vm15 = vcmp.gt.f32.partialorder %v1090_v52, 0.0  ;;  %v1547_v55 = vmul.f32 0.2, %v1090_v52  ;;  %vm1483_vm0 = vcmp.gt.f32.partialorder %v1346_v53, 0.0 }
 0x158   : > { %v2994_v57 = vpack.c.bf16 %v1677_v54, %v1676_v44  ;;  %v1741_v58 = vsel %vm1485_vm12, %v3419_v47, %v1613_v51  ;;  %v1611_v59 = vmul.f32 0.2, %v1346_v53 }
 0x159   : > { %v3154_v61 = vpack.c.bf16 %v1741_v58, %v1740_v56  ;;  %v1675_v62 = vsel %vm1419_vm15, %v1090_v52, %v1547_v55 }
 0x15a   : > { %3186 = vst [vmem:[%s3684_s24 + $0xf8] sm:$0xff] %v2994_v57   ;;  %v2989_v0 = vpack.c.bf16 %v1675_v62, %v1674_v60  ;;  %v1739_v1 = vsel %vm1483_vm0, %v1346_v53, %v1611_v59 }
 0x15b   : > { %3218 = vst [vmem:[%s3684_s24 + $0x1f8] sm:$0xff] %v3154_v61   ;;  %v3149_v2 = vpack.c.bf16 %v1739_v1, %v1738_v63 }
 0x15c   : > { %3185 = vst [vmem:[%s3684_s24 + $0xf0] sm:$0xff] %v2989_v0  }
 0x15d   : > { %3217 = vst [vmem:[%s3684_s24 + $0x1f0] sm:$0xff] %v3149_v2  }
 0x15e PF: > { %s12_s9 = sadd.s32 1, %s3507_s9  }
 0x15f   : > { %p9_p4 = scmp.ge.s32.totalorder %s12_s9, 4  }
 0x161   :  { %11 = sbr.rel (!%p9_p4) target bundleno = 1 (0x1), region = 58 }

// kernel: discriminator_forward.6
= control target key start
LH: loop header
LB: loop body
LE: loop exit
PB: predicated region body
PF: predicated region fallthrough
CT: control target
= control target key end

     0   :  { %s1072_s15 = smov 0   ;;  %s1074_s16 = smov 0   ;;  %s1205_s0 = inlined_call_operand.vmem [shape: bf16[512,128], index: 0, kind: input, shape index: {}]   ;;  %s1206_s1 = inlined_call_operand.vmem [shape: bf16[128,128], index: 1, kind: input, shape index: {}]   ;;  %s1207_s2 = inlined_call_operand.vmem [shape: bf16[512,128], index: 2, kind: output, shape index: {0}]   ;;  %s1208_s3 = inlined_call_operand.vmem [shape: f32[2,8,128], index: 3, kind: output, shape index: {1}]   ;;  %s1209_s4 = inlined_call_operand.vmem [shape: f32[2,8,128], index: 4, kind: output, shape index: {2}]  }
   0x1   :  { %s1076_s17 = smov 0   ;;  %s1078_s18 = smov 0  }
   0x2   :  { %s1080_s19 = smov 0  }
   0x3 LB: > { %s24_s20 = sadd.s32 1, %s1036_s17  ;;  %s27_s21 = sadd.s32 1, %s1040_s18  ;;  %s1044_s19 = sphi %s1080_s19, %s15_s19   ;;  %s1040_s18 = sphi %s1078_s18, %s1213_s18   ;;  %s1036_s17 = sphi %s1076_s17, %s1212_s17   ;;  %s1032_s16 = sphi %s1074_s16, %s1211_s16   ;;  %s1028_s15 = sphi %s1072_s15, %s1210_s15  }
   0x4   : > { %p25_p0 = scmp.ge.s32.totalorder %s24_s20, 2  ;;  %p778_p1 = scmp.ge.s32.totalorder %s1044_s19, 1 }
   0x5   : > { %p192_p2 = scmp.lt.s32.totalorder %s1044_s19, 5 }
   0x6   : > { %s1215_s20 = smov (%p25_p0, %s24_s20), 0  ;;  %s1217_s21 = smov (!%p25_p0, %s27_s21), %s1040_s18 }
   0x7   : > { %p193_p3 = pnand %p778_p1, %p192_p2  ;;  %p29_p4 = scmp.ge.s32.totalorder %s1217_s21, 2 }
   0x8   : > { %p250_p5 = scmp.lt.s32.totalorder (!%p193_p3), %s1032_s16, 1  ;;  %s779_s26 = sshll.u32 (!%p193_p3), %s1032_s16, 1 }
   0x9   : > { %s1219_s21 = smov (%p29_p4, %s1217_s21), 0  ;;  %196 = sbr.rel (%p193_p3) target bundleno = 303 (0x12f), region = 28 }
   0xa   : > { %s231_s27 = sadd.s32 (!%p193_p3), %s1028_s15, %s779_s26  ;;  %p803_p7 = scmp.ne.s32.totalorder (!%p193_p3), %s1028_s15, 0 }
   0xb   : > { %s780_s11 = sshll.u32 (!%p193_p3), %s231_s27, 4 }
   0xc   : > { %p233_p6 = scmp.lt.s32.totalorder (!%p193_p3), %s780_s11, 63 }
   0xe   : > { %v990_v0 = vld [vmem:[%s1206_s1 + $0x38] sm:$0xff]   ;;  %v991_v1 = vld [vmem:[%s1206_s1 + $0x30] sm:$0xff]   ;;  %s1221_s16 = smov (!%p250_p5, %s1032_s16), 1  ;;  %v992_v2 = vld [vmem:[%s1206_s1 + $0x28] sm:$0xff]   ;;  %s1223_s11 = smov (!%p233_p6, %s780_s11), 63 }
   0xf   : > { %901 = vmatprep.subr.bf16.mxu0 %v990_v0  ;;  %933 = vmatprep.subr.bf16.mxu1 %v990_v0  ;;  %s785_s28 = sshll.u32 %s1221_s16, 3  ;;  %v993_v3 = vld [vmem:[%s1206_s1 + $0x20] sm:$0xff]   ;;  %s781_s14 = sshll.u32 %s1223_s11, 2  ;;  %v994_v4 = vld [vmem:[%s1206_s1 + $0x18] sm:$0xff]   ;;  %v995_v7 = vld [vmem:[%s1206_s1 + $0x10] sm:$0xff]  }
  0x10   : > { %902 = vmatpush3.bf16.msra.mxu0 %v990_v0  ;;  %941 = vmatpush3.bf16.msra.mxu1 %v990_v0  ;;  %s1117_s7 = scalar_lea.vmem %s1208_s3, %s785_s28  ;;  %s1122_s10 = scalar_lea.vmem %s1209_s4, %s785_s28  ;;  %v996_v8 = vld [vmem:[%s1206_s1 + $0x8] sm:$0xff]   ;;  %v997_v9 = vld [vmem:[%s1206_s1] sm:$0xff]  }
  0x11   : > { %903 = vmatprep.subr.bf16.mxu0 %v991_v1  ;;  %934 = vmatprep.subr.bf16.mxu1 %v991_v1  ;;  %s1133_s25 = scalar_lea.vmem %s1205_s0, %s781_s14  ;;  %s1138_s28 = scalar_lea.vmem %s1207_s2, %s781_s14 }
  0x12   : > { %v998_v5 = vld [vmem:[%s1133_s25] sm:$0xff]   ;;  %v1000_v10 = vld [vmem:[%s1133_s25 + $0x8] sm:$0xff]   ;;  %v1002_v12 = vld [vmem:[%s1133_s25 + $0x10] sm:$0xff]  }
  0x13   : > { %v999_v6 = vld [vmem:[%s1133_s25 + $0x20] sm:$0xff]   ;;  %917 = vmatprep.mubr.bf16.mxu0 %v998_v5  ;;  %v1001_v11 = vld [vmem:[%s1133_s25 + $0x28] sm:$0xff]   ;;  %v1003_v13 = vld [vmem:[%s1133_s25 + $0x30] sm:$0xff]  }
  0x14   : > { %904 = vmatpush3.bf16.msra.mxu0 %v991_v1  ;;  %942 = vmatpush3.bf16.msra.mxu1 %v991_v1  ;;  %v1004_v14 = vld [vmem:[%s1133_s25 + $0x18] sm:$0xff]  }
  0x15   : > { %905 = vmatprep.subr.bf16.mxu0 %v992_v2  ;;  %935 = vmatprep.subr.bf16.mxu1 %v992_v2  ;;  %v1005_v15 = vld [vmem:[%s1133_s25 + $0x38] sm:$0xff]  }
  0x16   : > { %925 = vmatprep.mubr.bf16.mxu1 %v999_v6 }
  0x18   : > { %906 = vmatpush3.bf16.msra.mxu0 %v992_v2  ;;  %943 = vmatpush3.bf16.msra.mxu1 %v992_v2 }
  0x19   : > { %907 = vmatprep.subr.bf16.mxu0 %v993_v3  ;;  %936 = vmatprep.subr.bf16.mxu1 %v993_v3 }
  0x1c   : > { %908 = vmatpush3.bf16.msra.mxu0 %v993_v3  ;;  %944 = vmatpush3.bf16.msra.mxu1 %v993_v3 }
  0x1d   : > { %909 = vmatprep.subr.bf16.mxu0 %v994_v4  ;;  %937 = vmatprep.subr.bf16.mxu1 %v994_v4 }
  0x20   : > { %910 = vmatpush3.bf16.msra.mxu0 %v994_v4  ;;  %945 = vmatpush3.bf16.msra.mxu1 %v994_v4 }
  0x21   : > { %911 = vmatprep.subr.bf16.mxu0 %v995_v7  ;;  %938 = vmatprep.subr.bf16.mxu1 %v995_v7 }
  0x24   : > { %912 = vmatpush3.bf16.msra.mxu0 %v995_v7  ;;  %946 = vmatpush3.bf16.msra.mxu1 %v995_v7 }
  0x25   : > { %913 = vmatprep.subr.bf16.mxu0 %v996_v8  ;;  %939 = vmatprep.subr.bf16.mxu1 %v996_v8 }
  0x28   : > { %914 = vmatpush3.bf16.msra.mxu0 %v996_v8  ;;  %947 = vmatpush3.bf16.msra.mxu1 %v996_v8 }
  0x29   : > { %915 = vmatprep.subr.bf16.mxu0 %v997_v9  ;;  %940 = vmatprep.subr.bf16.mxu1 %v997_v9 }
  0x2c   : > { %916 = vmatpush3.bf16.msra.mxu0 %v997_v9  ;;  %948 = vmatpush3.bf16.msra.mxu1 %v997_v9 }
  0x2f   : > { %918 = vmatmul.mubr.bf16.vlgmr.msra.gmra.mxu0 %v1000_v10  ;;  %926 = vmatmul.mubr.bf16.vlgmr.msra.gmra.mxu1 %v1001_v11 }
  0x30   : > { %921 = vmatprep.mubr.bf16.mxu0 %v1002_v12  ;;  %929 = vmatprep.mubr.bf16.mxu1 %v1003_v13 }
  0x37   : > { %922 = vmatmul.mubr.bf16.gmra.mxu0 %v1004_v14  ;;  %930 = vmatmul.mubr.bf16.gmra.mxu1 %v1005_v15 }
  0xef   : > { %v919_v16 = vpop.f32.mrf.mxu0  ;;  %v1157_v17 = vpop.f32.mrf.mxu1 }
  0xf1   : > { %v421_v18 = vpop.f32.mrf.mxu0  ;;  %v453_v19 = vpop.f32.mrf.mxu1 }
  0xf3   : > { %v920_v20 = vpop.f32.mrf.mxu0  ;;  %v928_v21 = vpop.f32.mrf.mxu1 }
  0xf5   : > { %v424_v22 = vpop.f32.mrf.mxu0  ;;  %v456_v23 = vpop.f32.mrf.mxu1 }
  0xf7   : > { %v923_v24 = vpop.f32.mrf.mxu0  ;;  %v1159_v25 = vpop.f32.mrf.mxu1 }
  0xf9   : > { %v437_v26 = vpop.f32.mrf.mxu0  ;;  %v469_v27 = vpop.f32.mrf.mxu1  ;;  %487 = sbr.rel (%p803_p7) target bundleno = 256 (0x100), region = 32 }
  0xfb   : > { %v924_v28 = vpop.f32.mrf.mxu0  ;;  %v1161_v29 = vpop.f32.mrf.mxu1 }
  0xfd   : > { %v440_v30 = vpop.f32.mrf.mxu0  ;;  %v472_v31 = vpop.f32.mrf.mxu1 }
  0xfe   : > { %v1046_v32 = vmov 0.0  }
  0xff   : > { %488 = vst [vmem:[%s1117_s7] sm:$0xff] %v1046_v32  ;;  %489 = vst [vmem:[%s1122_s10] sm:$0xff] %v1046_v32 }
 0x100 PF: > { %v491_v33 = vadd.f32 %v424_v22, %v421_v18  ;;  %v515_v34 = vmul.f32 %v421_v18, %v421_v18  ;;  %v516_v35 = vmul.f32 %v424_v22, %v424_v22  ;;  %v517_v37 = vmul.f32 %v919_v16, %v919_v16 }
 0x101   : > { %v518_v39 = vmul.f32 %v920_v20, %v920_v20  ;;  %v519_v40 = vmul.f32 %v437_v26, %v437_v26  ;;  %v841_v42 = vpack.c.bf16 %v424_v22, %v421_v18  ;;  %v846_v43 = vpack.c.bf16 %v920_v20, %v919_v16 }
 0x102   : > { %v492_v36 = vadd.f32 %v919_v16, %v491_v33  ;;  %v531_v41 = vadd.f32 %v516_v35, %v515_v34  ;;  %v851_v44 = vpack.c.bf16 %v440_v30, %v437_v26  ;;  %v856_v45 = vpack.c.bf16 %v924_v28, %v923_v24 }
 0x103   : > { %v861_v48 = vpack.c.bf16 %v456_v23, %v453_v19  ;;  %v866_v49 = vpack.c.bf16 %v928_v21, %v1157_v17  ;;  %842 = vst [vmem:[%s1138_s28] sm:$0xff] %v841_v42   ;;  %878 = vst [vmem:[%s1138_s28 + $0x8] sm:$0xff] %v846_v43   ;;  %v871_v50 = vpack.c.bf16 %v472_v31, %v469_v27 }
 0x104   : > { %v493_v38 = vadd.f32 %v920_v20, %v492_v36  ;;  %v532_v47 = vadd.f32 %v531_v41, %v517_v37  ;;  %879 = vst [vmem:[%s1138_s28 + $0x10] sm:$0xff] %v851_v44   ;;  %880 = vst [vmem:[%s1138_s28 + $0x18] sm:$0xff] %v856_v45   ;;  %v876_v51 = vpack.c.bf16 %v1161_v29, %v1159_v25 }
 0x105   : > { %v520_v53 = vmul.f32 %v440_v30, %v440_v30  ;;  %881 = vst [vmem:[%s1138_s28 + $0x20] sm:$0xff] %v861_v48   ;;  %882 = vst [vmem:[%s1138_s28 + $0x28] sm:$0xff] %v866_v49   ;;  %v521_v56 = vmul.f32 %v923_v24, %v923_v24  ;;  %v522_v59 = vmul.f32 %v924_v28, %v924_v28 }
 0x106   : > { %v494_v46 = vadd.f32 %v493_v38, %v437_v26  ;;  %v533_v54 = vadd.f32 %v532_v47, %v518_v39  ;;  %883 = vst [vmem:[%s1138_s28 + $0x30] sm:$0xff] %v871_v50   ;;  %884 = vst [vmem:[%s1138_s28 + $0x38] sm:$0xff] %v876_v51   ;;  %v523_v62 = vmul.f32 %v453_v19, %v453_v19  ;;  %v490_v32 = vld [vmem:[%s1117_s7] sm:$0xff] }
 0x107   : > { %v524_v1 = vmul.f32 %v456_v23, %v456_v23  ;;  %v525_v4 = vmul.f32 %v1157_v17, %v1157_v17  ;;  %v526_v7 = vmul.f32 %v928_v21, %v928_v21  ;;  %v527_v10 = vmul.f32 %v469_v27, %v469_v27 }
 0x108   : > { %v495_v52 = vadd.f32 %v494_v46, %v440_v30  ;;  %v534_v57 = vadd.f32 %v533_v54, %v519_v40  ;;  %v528_v13 = vmul.f32 %v472_v31, %v472_v31  ;;  %v529_v16 = vmul.f32 %v1159_v25, %v1159_v25 }
 0x10a   : > { %v496_v55 = vadd.f32 %v923_v24, %v495_v52  ;;  %v535_v60 = vadd.f32 %v534_v57, %v520_v53 }
 0x10c   : > { %v497_v58 = vadd.f32 %v924_v28, %v496_v55  ;;  %v536_v63 = vadd.f32 %v535_v60, %v521_v56 }
 0x10e   : > { %v498_v61 = vadd.f32 %v497_v58, %v453_v19  ;;  %v537_v2 = vadd.f32 %v536_v63, %v522_v59 }
 0x110   : > { %v499_v0 = vadd.f32 %v498_v61, %v456_v23  ;;  %v538_v5 = vadd.f32 %v537_v2, %v523_v62 }
 0x112   : > { %v500_v3 = vadd.f32 %v1157_v17, %v499_v0  ;;  %v539_v8 = vadd.f32 %v538_v5, %v524_v1  ;;  %v530_v17 = vmul.f32 %v1161_v29, %v1161_v29 }
 0x114   : > { %v501_v6 = vadd.f32 %v928_v21, %v500_v3  ;;  %v540_v11 = vadd.f32 %v539_v8, %v525_v4 }
 0x116   : > { %v502_v9 = vadd.f32 %v501_v6, %v469_v27  ;;  %v541_v14 = vadd.f32 %v540_v11, %v526_v7 }
 0x118   : > { %v503_v12 = vadd.f32 %v502_v9, %v472_v31  ;;  %v542_v18 = vadd.f32 %v541_v14, %v527_v10 }
 0x11a   : > { %v504_v15 = vadd.f32 %v1159_v25, %v503_v12  ;;  %v543_v20 = vadd.f32 %v542_v18, %v528_v13 }
 0x11c   : > { %v505_v19 = vadd.f32 %v1161_v29, %v504_v15  ;;  %v544_v22 = vadd.f32 %v543_v20, %v529_v16  ;;  %v514_v29 = vld [vmem:[%s1122_s10] sm:$0xff] }
 0x11e   : > { %v506_v21 = vrot.slane %v505_v19, 4  ;;  %v545_v24 = vadd.f32 %v544_v22, %v530_v17 }
 0x120   : > { %v507_v23 = vadd.f32 %v506_v21, %v505_v19  ;;  %v546_v27 = vrot.slane %v545_v24, 4 }
 0x122   : > { %v508_v26 = vrot.slane %v507_v23, 2  ;;  %v547_v30 = vadd.f32 %v546_v27, %v545_v24 }
 0x124   : > { %v509_v28 = vadd.f32 %v508_v26, %v507_v23  ;;  %v548_v25 = vrot.slane %v547_v30, 2 }
 0x126   : > { %v510_v31 = vrot.slane %v509_v28, 1  ;;  %v549_v34 = vadd.f32 %v548_v25, %v547_v30 }
 0x128   : > { %v511_v33 = vadd.f32 %v510_v31, %v509_v28  ;;  %v550_v36 = vrot.slane %v549_v34, 1 }
 0x12a   : > { %v512_v35 = vadd.f32 %v511_v33, %v490_v32  ;;  %v551_v37 = vadd.f32 %v550_v36, %v549_v34 }
 0x12c   : > { %513 = vst [vmem:[%s1117_s7] sm:$0xff] %v512_v35  ;;  %v552_v38 = vadd.f32 %v551_v37, %v514_v29 }
 0x12e   : > { %553 = vst [vmem:[%s1122_s10] sm:$0xff] %v552_v38 }
 0x12f PF: > { %s15_s19 = sadd.s32 1, %s1044_s19   ;;  %s1210_s15 = smov %s1036_s17 }
 0x130   : > { %p12_p8 = scmp.ge.s32.totalorder %s15_s19, 6   ;;  %s1211_s16 = smov %s1040_s18 }
 0x131   : > { %s1212_s17 = smov %s1215_s20  ;;  %s1213_s18 = smov %s1219_s21 }
 0x132   :  { %14 = sbr.rel (!%p12_p8) target bundleno = 3 (0x3), region = 86 }

// kernel: tile.33
= control target key start
LH: loop header
LB: loop body
LE: loop exit
PB: predicated region body
PF: predicated region fallthrough
CT: control target
= control target key end

     0   :  { %s28_s0 = inlined_call_operand.vmem [shape: f32[16], index: 0, kind: input, shape index: {}]   ;;  %s29_s1 = inlined_call_operand.vmem [shape: f32[16,16], index: 1, kind: output, shape index: {}]  }
   0x1   :  { %v4_v0 = vld [vmem:[%s28_s0] ss:$0 sm:$0xff] }
   0x2   :  { %5 = vst [vmem:[%s29_s1] sm:$0xff] %v4_v0  ;;  %8 = vst [vmem:[%s29_s1 + $0x8] sm:$0xff] %v4_v0 }

// kernel: tile.34
= control target key start
LH: loop header
LB: loop body
LE: loop exit
PB: predicated region body
PF: predicated region fallthrough
CT: control target
= control target key end

     0   :  { %s7_s6 = smov 3  ;;  %s21_s9 = smov 3  ;;  %vm4_vm0 = vcmask 130048   ;;  %vm11_vm1 = vcmask 1048448   ;;  %vm18_vm2 = vcmask 917248   ;;  %vm25_vm3 = vcmask 786048   ;;  %s131_s0 = inlined_call_operand.vmem [shape: f32[16,16], index: 0, kind: input, shape index: {}]   ;;  %s132_s1 = inlined_call_operand.vmem [shape: f32[1,256], index: 1, kind: output, shape index: {}]  }
   0x1   :  { %v69_v0 = vld [vmem:[%s131_s0 + $0x7] ss:$8 sm:%s7_s6]   ;;  %s84_s10 = smov 112   ;;  %v71_v1 = vld [vmem:[%s131_s0 + $0x5] ss:$8 sm:%s21_s9]   ;;  %s14_s13 = smov 3 }
   0x2   :  { %9 = vrot.lane.b32.xlu0 %v69_v0, %s84_s10  ;;  %s85_s14 = smov 80   ;;  %v70_v2 = vld [vmem:[%s131_s0 + $0x6] ss:$8 sm:%s14_s13]   ;;  %s28_s17 = smov 3  ;;  %vm32_vm4 = vcmask 654848   ;;  %vm39_vm5 = vcmask 523648  }
   0x3   :  { %23 = vrot.lane.b32.xlu1 %v71_v1, %s85_s14  ;;  %v72_v3 = vld [vmem:[%s131_s0 + $0x4] ss:$8 sm:%s28_s17]   ;;  %s35_s20 = smov 3  ;;  %s42_s21 = smov 3  ;;  %vm46_vm6 = vcmask 392448   ;;  %vm53_vm7 = vcmask 261248  }
   0x4   :  { %s86_s22 = smov 96   ;;  %s87_s23 = smov 64   ;;  %v73_v4 = vld [vmem:[%s131_s0 + $0x3] ss:$8 sm:%s35_s20]   ;;  %v74_v5 = vld [vmem:[%s131_s0 + $0x2] ss:$8 sm:%s42_s21]  }
   0x5   :  { %s2_s26 = smov 3  ;;  %s49_s29 = smov 3 }
   0x6   :  { %16 = vrot.lane.b32.xlu0 %v70_v2, %s86_s22  ;;  %v3_v6 = vld [vmem:[%s131_s0] ss:$8 sm:%s2_s26]   ;;  %s88_s3 = smov 48   ;;  %s89_s4 = smov 32  }
   0x7   :  { %30 = vrot.lane.b32.xlu1 %v72_v3, %s87_s23  ;;  %5 = vst.msk [vmem:[#allocation0] ss:$8 sm:$0x3] %vm4_vm0, %v3_v6   ;;  %v75_v7 = vld [vmem:[%s131_s0 + $0x1] ss:$8 sm:%s49_s29]   ;;  %s90_s0 = smov 16  }
   0xa   :  { %37 = vrot.lane.b32.xlu0 %v73_v4, %s88_s3 }
   0xb   :  { %44 = vrot.lane.b32.xlu1 %v74_v5, %s89_s4 }
   0xe   :  { %51 = vrot.lane.b32.xlu0 %v75_v7, %s90_s0 }
  0x74   :  { %v10_v8 = vpop.permute.xlu0 %9  }
  0x75   :  { %12 = vst.msk [vmem:[#allocation0] ss:$8 sm:$0x3] %vm11_vm1, %v10_v8   ;;  %v24_v9 = vpop.permute.xlu1 %23  }
  0x78   :  { %v17_v10 = vpop.permute.xlu0 %16  }
  0x79   :  { %19 = vst.msk [vmem:[#allocation0] ss:$8 sm:$0x3] %vm18_vm2, %v17_v10   ;;  %v31_v11 = vpop.permute.xlu1 %30  }
  0x7a   :  { %26 = vst.msk [vmem:[#allocation0] ss:$8 sm:$0x3] %vm25_vm3, %v24_v9  }
  0x7b   :  { %33 = vst.msk [vmem:[#allocation0] ss:$8 sm:$0x3] %vm32_vm4, %v31_v11  }
  0x7c   :  { %v38_v12 = vpop.permute.xlu0 %37  }
  0x7d   :  { %40 = vst.msk [vmem:[#allocation0] ss:$8 sm:$0x3] %vm39_vm5, %v38_v12   ;;  %v45_v13 = vpop.permute.xlu1 %44  }
  0x7e   :  { %47 = vst.msk [vmem:[#allocation0] ss:$8 sm:$0x3] %vm46_vm6, %v45_v13  }
  0x80   :  { %v52_v14 = vpop.permute.xlu0 %51  }
  0x81   :  { %54 = vst.msk [vmem:[#allocation0] ss:$8 sm:$0x3] %vm53_vm7, %v52_v14  }
  0x88   :  { %v59_v15 = vld [vmem:[#allocation0] sm:$0x1]  ;;  %v64_v16 = vld [vmem:[#allocation0 + $0x8] sm:$0x1] }
  0x89   :  { %62 = vst [vmem:[%s132_s1] sm:$0x1] %v59_v15  ;;  %76 = vst [vmem:[%s132_s1 + $0x1] sm:$0x1] %v64_v16 }

// kernel: discriminator_forward.7
= control target key start
LH: loop header
LB: loop body
LE: loop exit
PB: predicated region body
PF: predicated region fallthrough
CT: control target
= control target key end

     0   :  { %s997_s21 = smov 0   ;;  %s999_s22 = smov 0   ;;  %s1128_s0 = inlined_call_operand.vmem [shape: bf16[128,256], index: 0, kind: input, shape index: {}]   ;;  %s1129_s1 = inlined_call_operand.vmem [shape: bf16[256,128], index: 1, kind: input, shape index: {}]   ;;  %s1130_s2 = inlined_call_operand.vmem [shape: f32[1,256], index: 2, kind: input, shape index: {}]   ;;  %s1131_s3 = inlined_call_operand.vmem [shape: f32[1,256], index: 3, kind: input, shape index: {}]   ;;  %s1132_s4 = inlined_call_operand.vmem [shape: bf16[128,128], index: 4, kind: output, shape index: {0}]   ;;  %s1133_s5 = inlined_call_operand.vmem [shape: f32[2,8,128], index: 5, kind: output, shape index: {1}]   ;;  %s1134_s6 = inlined_call_operand.vmem [shape: f32[2,8,128], index: 6, kind: output, shape index: {2}]  }
   0x1   :  { %s1001_s23 = smov 0   ;;  %s1003_s24 = smov 0  }
   0x2   :  { %s1005_s25 = smov 0  }
   0x3 LB: > { %s26_s26 = sadd.s32 1, %s951_s23  ;;  %s29_s27 = sadd.s32 1, %s955_s24  ;;  %s959_s25 = sphi %s1005_s25, %s17_s25   ;;  %s955_s24 = sphi %s1003_s24, %s1138_s24   ;;  %s951_s23 = sphi %s1001_s23, %s1137_s23   ;;  %s947_s22 = sphi %s999_s22, %s1136_s22   ;;  %s943_s21 = sphi %s997_s21, %s1135_s21  }
   0x4   : > { %p27_p0 = scmp.ge.s32.totalorder %s26_s26, 2  ;;  %p771_p1 = scmp.ge.s32.totalorder %s959_s25, 1 }
   0x5   : > { %p243_p2 = scmp.lt.s32.totalorder %s959_s25, 5 }
   0x6   : > { %s1140_s26 = smov (%p27_p0, %s26_s26), 0  ;;  %s1142_s27 = smov (!%p27_p0, %s29_s27), %s955_s24 }
   0x7   : > { %p244_p3 = pnand %p771_p1, %p243_p2  ;;  %p31_p4 = scmp.ge.s32.totalorder %s1142_s27, 2 }
   0x8   : > { %p307_p5 = scmp.lt.s32.totalorder (!%p244_p3), %s947_s22, 1  ;;  %s772_s8 = sshll.u32 (!%p244_p3), %s947_s22, 1 }
   0x9   : > { %s1144_s27 = smov (%p31_p4, %s1142_s27), 0  ;;  %247 = sbr.rel (%p244_p3) target bundleno = 272 (0x110), region = 36 }
   0xa   : > { %s287_s13 = sadd.s32 (!%p244_p3), %s943_s21, %s772_s8  ;;  %p797_p7 = scmp.ne.s32.totalorder (!%p244_p3), %s943_s21, 0 }
   0xb   : > { %s773_s30 = sshll.u32 (!%p244_p3), %s287_s13, 2 }
   0xc   : > { %p289_p6 = scmp.lt.s32.totalorder (!%p244_p3), %s773_s30, 15 }
   0xe   : > { %v905_v0 = vld [vmem:[%s1129_s1 + $0x78] sm:$0xff]   ;;  %s1146_s22 = smov (!%p307_p5, %s947_s22), 1  ;;  %v907_v2 = vld [vmem:[%s1129_s1 + $0x70] sm:$0xff]   ;;  %v909_v4 = vld [vmem:[%s1129_s1 + $0x68] sm:$0xff]   ;;  %v330_v5 = vlaneseq  ;;  %s1148_s30 = smov (!%p289_p6, %s773_s30), 15 }
   0xf   : > { %v906_v1 = vld [vmem:[%s1129_s1 + $0x38] sm:$0xff]   ;;  %820 = vmatprep.subr.bf16.mxu0 %v905_v0  ;;  %848 = vmatprep.subr.bf16.mxu1 %v905_v0  ;;  %v908_v3 = vld [vmem:[%s1129_s1 + $0x30] sm:$0xff]   ;;  %s779_s14 = sshll.u32 %s1146_s22, 3  ;;  %v910_v6 = vld [vmem:[%s1129_s1 + $0x28] sm:$0xff]   ;;  %s804_s12 = sshll.u32 %s1148_s30, 3 }
  0x10   : > { %821 = vmatpush3.bf16.msra.mxu0 %v906_v1  ;;  %856 = vmatpush3.bf16.msra.mxu1 %v906_v1  ;;  %s1048_s19 = scalar_lea.vmem %s1133_s5, %s779_s14  ;;  %s1053_s29 = scalar_lea.vmem %s1134_s6, %s779_s14  ;;  %v911_v7 = vld [vmem:[%s1129_s1 + $0x60] sm:$0xff]   ;;  %v331_v8 = vshrl.u32 %v330_v5, 7  ;;  %v913_v10 = vld [vmem:[%s1129_s1 + $0x58] sm:$0xff]   ;;  %v915_v14 = vld [vmem:[%s1129_s1 + $0x50] sm:$0xff]  }
  0x11   : > { %822 = vmatprep.subr.bf16.mxu0 %v907_v2  ;;  %849 = vmatprep.subr.bf16.mxu1 %v907_v2  ;;  %v912_v9 = vld [vmem:[%s1129_s1 + $0x20] sm:$0xff]   ;;  %s778_s15 = sshll.u32 %s1148_s30, 2  ;;  %s293_s18 = scalar_lea.vmem %s1128_s0, %s804_s12  ;;  %v914_v12 = vld [vmem:[%s1129_s1 + $0x18] sm:$0xff]   ;;  %v916_v29 = vld [vmem:[%s1129_s1 + $0x10] sm:$0xff]  }
  0x12   : > { %s1073_s22 = scalar_lea.vmem %s1132_s4, %s778_s15  ;;  %v332_v11 = vsub.s32 0, %v331_v8  ;;  %v336_v13 = vsub.s32 1, %v331_v8  ;;  %v316_v15 = vld [vmem:[%s293_s18] sm:$0xff]  ;;  %v317_v16 = vld [vmem:[%s293_s18 + $0x8] sm:$0xff]  ;;  %v318_v23 = vld [vmem:[%s293_s18 + $0x10] sm:$0xff] }
  0x13   : > { %v328_v17 = vld [vmem:[%s1130_s2] sm:$0x3]  ;;  %v320_v18 = vunpack.c.l.bf16 %v316_v15  ;;  %v321_v19 = vunpack.c.h.bf16 %v316_v15  ;;  %v322_v20 = vunpack.c.l.bf16 %v317_v16  ;;  %v323_v21 = vunpack.c.h.bf16 %v317_v16  ;;  %v319_v24 = vld [vmem:[%s293_s18 + $0x18] sm:$0xff]  ;;  %v917_v34 = vld [vmem:[%s1129_s1 + $0x48] sm:$0xff]  }
  0x14   : > { %823 = vmatpush3.bf16.msra.mxu0 %v908_v3  ;;  %857 = vmatpush3.bf16.msra.mxu1 %v908_v3  ;;  %v348_v22 = vld [vmem:[%s1131_s3] sm:$0x3]  ;;  %v333_v25 = vrot.slane %v328_v17, %v332_v11  ;;  %v337_v26 = vrot.slane %v328_v17, %v336_v13  ;;  %v324_v30 = vunpack.c.l.bf16 %v318_v23  ;;  %v325_v31 = vunpack.c.h.bf16 %v318_v23  ;;  %v918_v46 = vld [vmem:[%s1129_s1 + $0x8] sm:$0xff]  }
  0x15   : > { %824 = vmatprep.subr.bf16.mxu0 %v909_v4  ;;  %850 = vmatprep.subr.bf16.mxu1 %v909_v4  ;;  %v353_v27 = vrot.slane %v348_v22, %v332_v11  ;;  %v357_v28 = vrot.slane %v348_v22, %v336_v13  ;;  %v326_v32 = vunpack.c.l.bf16 %v319_v24  ;;  %v327_v33 = vunpack.c.h.bf16 %v319_v24  ;;  %v919_v47 = vld [vmem:[%s1129_s1 + $0x40] sm:$0xff]  }
  0x16   : > { %v341_v35 = vmul.f32 %v337_v26, %v321_v19  ;;  %v343_v36 = vmul.f32 %v337_v26, %v323_v21  ;;  %v340_v37 = vmul.f32 %v333_v25, %v320_v18  ;;  %v345_v38 = vmul.f32 %v337_v26, %v325_v31  ;;  %v920_v57 = vld [vmem:[%s1129_s1] sm:$0xff]  }
  0x17   : > { %v347_v39 = vmul.f32 %v337_v26, %v327_v33  ;;  %v342_v40 = vmul.f32 %v333_v25, %v322_v20  ;;  %v344_v41 = vmul.f32 %v333_v25, %v324_v30  ;;  %v346_v45 = vmul.f32 %v333_v25, %v326_v32 }
  0x18   : > { %825 = vmatpush3.bf16.msra.mxu0 %v910_v6  ;;  %858 = vmatpush3.bf16.msra.mxu1 %v910_v6  ;;  %v361_v42 = vadd.f32 %v357_v28, %v341_v35  ;;  %v363_v43 = vadd.f32 %v357_v28, %v343_v36  ;;  %v360_v44 = vadd.f32 %v353_v27, %v340_v37 }
  0x19   : > { %826 = vmatprep.subr.bf16.mxu0 %v911_v7  ;;  %851 = vmatprep.subr.bf16.mxu1 %v911_v7  ;;  %v365_v48 = vadd.f32 %v357_v28, %v345_v38  ;;  %v367_v49 = vadd.f32 %v357_v28, %v347_v39  ;;  %v362_v50 = vadd.f32 %v353_v27, %v342_v40 }
  0x1a   : > { %vm369_vm0 = vcmp.gt.f32.partialorder %v361_v42, 0.0  ;;  %vm371_vm1 = vcmp.gt.f32.partialorder %v363_v43, 0.0  ;;  %v377_v51 = vmul.f32 0.2, %v361_v42  ;;  %v379_v52 = vmul.f32 0.2, %v363_v43 }
  0x1b   : > { %vm373_vm2 = vcmp.gt.f32.partialorder %v365_v48, 0.0  ;;  %vm375_vm3 = vcmp.gt.f32.partialorder %v367_v49, 0.0  ;;  %v381_v53 = vmul.f32 0.2, %v365_v48  ;;  %v383_v54 = vmul.f32 0.2, %v367_v49 }
  0x1c   : > { %827 = vmatpush3.bf16.msra.mxu0 %v912_v9  ;;  %859 = vmatpush3.bf16.msra.mxu1 %v912_v9  ;;  %v385_v55 = vsel %vm369_vm0, %v361_v42, %v377_v51  ;;  %v387_v56 = vsel %vm371_vm1, %v363_v43, %v379_v52  ;;  %vm368_vm4 = vcmp.gt.f32.partialorder %v360_v44, 0.0  ;;  %vm370_vm5 = vcmp.gt.f32.partialorder %v362_v50, 0.0 }
  0x1d   : > { %828 = vmatprep.subr.bf16.mxu0 %v913_v10  ;;  %852 = vmatprep.subr.bf16.mxu1 %v913_v10  ;;  %v393_v58 = vpack.c.bf16 %v387_v56, %v385_v55  ;;  %v389_v59 = vsel %vm373_vm2, %v365_v48, %v381_v53  ;;  %v391_v60 = vsel %vm375_vm3, %v367_v49, %v383_v54  ;;  %v376_v61 = vmul.f32 0.2, %v360_v44 }
  0x1e   : > { %v395_v62 = vpack.c.bf16 %v391_v60, %v389_v59  ;;  %v378_v63 = vmul.f32 0.2, %v362_v50  ;;  %v364_v0 = vadd.f32 %v353_v27, %v344_v41  ;;  %v366_v1 = vadd.f32 %v353_v27, %v346_v45 }
  0x1f   : > { %556 = vmatprep.mubr.bf16.mxu0 %v393_v58  ;;  %v384_v2 = vsel %vm368_vm4, %v360_v44, %v376_v61 }
  0x20   : > { %829 = vmatpush3.bf16.msra.mxu0 %v914_v12  ;;  %860 = vmatpush3.bf16.msra.mxu1 %v914_v12  ;;  %v386_v3 = vsel %vm370_vm5, %v362_v50, %v378_v63  ;;  %vm372_vm6 = vcmp.gt.f32.partialorder %v364_v0, 0.0  ;;  %vm374_vm7 = vcmp.gt.f32.partialorder %v366_v1, 0.0  ;;  %v380_v4 = vmul.f32 0.2, %v364_v0 }
  0x21   : > { %830 = vmatprep.subr.bf16.mxu0 %v915_v14  ;;  %853 = vmatprep.subr.bf16.mxu1 %v915_v14  ;;  %v392_v5 = vpack.c.bf16 %v386_v3, %v384_v2  ;;  %v382_v6 = vmul.f32 0.2, %v366_v1 }
  0x22   : > { %564 = vmatprep.mubr.bf16.mxu1 %v395_v62  ;;  %v388_v7 = vsel %vm372_vm6, %v364_v0, %v380_v4 }
  0x23   : > { %v390_v8 = vsel %vm374_vm7, %v366_v1, %v382_v6 }
  0x24   : > { %831 = vmatpush3.bf16.msra.mxu0 %v916_v29  ;;  %861 = vmatpush3.bf16.msra.mxu1 %v916_v29  ;;  %v394_v9 = vpack.c.bf16 %v390_v8, %v388_v7 }
  0x25   : > { %832 = vmatprep.subr.bf16.mxu0 %v917_v34  ;;  %854 = vmatprep.subr.bf16.mxu1 %v917_v34 }
  0x28   : > { %833 = vmatpush3.bf16.msra.mxu0 %v918_v46  ;;  %862 = vmatpush3.bf16.msra.mxu1 %v918_v46 }
  0x29   : > { %834 = vmatprep.subr.bf16.mxu0 %v919_v47  ;;  %855 = vmatprep.subr.bf16.mxu1 %v919_v47 }
  0x2c   : > { %835 = vmatpush3.bf16.msra.mxu0 %v920_v57  ;;  %863 = vmatpush3.bf16.msra.mxu1 %v920_v57 }
  0x2f   : > { %557 = vmatmul.mubr.bf16.vlgmr.msra.gmra.mxu0 %v392_v5  ;;  %565 = vmatmul.mubr.bf16.vlgmr.msra.gmra.mxu1 %v394_v9 }
  0xef   : > { %v836_v10 = vpop.f32.mrf.mxu0  ;;  %v842_v11 = vpop.f32.mrf.mxu1 }
  0xf1   : > { %v837_v12 = vpop.f32.mrf.mxu0  ;;  %v843_v14 = vpop.f32.mrf.mxu1 }
  0xf2   : > { %v838_v13 = vadd.f32 %v837_v12, %v836_v10  ;;  %v844_v16 = vadd.f32 %v843_v14, %v842_v11  ;;  %576 = sbr.rel (%p797_p7) target bundleno = 249 (0xf9), region = 40 }
  0xf3   : > { %v839_v15 = vpop.f32.mrf.mxu0  ;;  %v845_v17 = vpop.f32.mrf.mxu1 }
  0xf5   : > { %v840_v18 = vpop.f32.mrf.mxu0  ;;  %v846_v20 = vpop.f32.mrf.mxu1 }
  0xf6   : > { %v841_v19 = vadd.f32 %v840_v18, %v839_v15  ;;  %v847_v21 = vadd.f32 %v846_v20, %v845_v17 }
  0xf7   : > { %v961_v22 = vmov 0.0  }
  0xf8   : > { %577 = vst [vmem:[%s1048_s19] sm:$0xff] %v961_v22  ;;  %578 = vst [vmem:[%s1053_s29] sm:$0xff] %v961_v22 }
  0xf9 PF: > { %v580_v23 = vadd.f32 %v841_v19, %v838_v13  ;;  %v592_v24 = vmul.f32 %v838_v13, %v838_v13  ;;  %v593_v25 = vmul.f32 %v841_v19, %v841_v19  ;;  %v594_v26 = vmul.f32 %v844_v16, %v844_v16 }
  0xfa   : > { %v812_v27 = vpack.c.bf16 %v841_v19, %v838_v13  ;;  %v817_v28 = vpack.c.bf16 %v847_v21, %v844_v16  ;;  %v595_v30 = vmul.f32 %v847_v21, %v847_v21 }
  0xfb   : > { %v581_v29 = vadd.f32 %v844_v16, %v580_v23  ;;  %v596_v31 = vadd.f32 %v593_v25, %v592_v24 }
  0xfc   : > { %813 = vst [vmem:[%s1073_s22] sm:$0xff] %v812_v27   ;;  %819 = vst [vmem:[%s1073_s22 + $0x8] sm:$0xff] %v817_v28  }
  0xfd   : > { %v582_v32 = vadd.f32 %v847_v21, %v581_v29  ;;  %v597_v33 = vadd.f32 %v596_v31, %v594_v26 }
  0xff   : > { %v583_v34 = vrot.slane %v582_v32, 4  ;;  %v598_v35 = vadd.f32 %v597_v33, %v595_v30  ;;  %v579_v44 = vld [vmem:[%s1048_s19] sm:$0xff] }
 0x100   : > { %v591_v47 = vld [vmem:[%s1053_s29] sm:$0xff] }
 0x101   : > { %v584_v36 = vadd.f32 %v583_v34, %v582_v32  ;;  %v599_v37 = vrot.slane %v598_v35, 4 }
 0x103   : > { %v585_v38 = vrot.slane %v584_v36, 2  ;;  %v600_v39 = vadd.f32 %v599_v37, %v598_v35 }
 0x105   : > { %v586_v40 = vadd.f32 %v585_v38, %v584_v36  ;;  %v601_v41 = vrot.slane %v600_v39, 2 }
 0x107   : > { %v587_v42 = vrot.slane %v586_v40, 1  ;;  %v602_v43 = vadd.f32 %v601_v41, %v600_v39 }
 0x109   : > { %v588_v45 = vadd.f32 %v587_v42, %v586_v40  ;;  %v603_v46 = vrot.slane %v602_v43, 1 }
 0x10b   : > { %v589_v48 = vadd.f32 %v588_v45, %v579_v44  ;;  %v604_v49 = vadd.f32 %v603_v46, %v602_v43 }
 0x10d   : > { %590 = vst [vmem:[%s1048_s19] sm:$0xff] %v589_v48  ;;  %v605_v50 = vadd.f32 %v604_v49, %v591_v47 }
 0x10f   : > { %606 = vst [vmem:[%s1053_s29] sm:$0xff] %v605_v50 }
 0x110 PF: > { %s17_s25 = sadd.s32 1, %s959_s25   ;;  %s1135_s21 = smov %s951_s23 }
 0x111   : > { %p14_p8 = scmp.ge.s32.totalorder %s17_s25, 6   ;;  %s1136_s22 = smov %s955_s24 }
 0x112   : > { %s1137_s23 = smov %s1140_s26  ;;  %s1138_s24 = smov %s1144_s27 }
 0x113   :  { %16 = sbr.rel (!%p14_p8) target bundleno = 3 (0x3), region = 94 }

// kernel: tile.43
= control target key start
LH: loop header
LB: loop body
LE: loop exit
PB: predicated region body
PF: predicated region fallthrough
CT: control target
= control target key end

     0   :  { %s28_s0 = inlined_call_operand.vmem [shape: f32[32], index: 0, kind: input, shape index: {}]   ;;  %s29_s1 = inlined_call_operand.vmem [shape: f32[16,32], index: 1, kind: output, shape index: {}]  }
   0x1   :  { %v4_v0 = vld [vmem:[%s28_s0] ss:$0 sm:$0xff] }
   0x2   :  { %5 = vst [vmem:[%s29_s1] sm:$0xff] %v4_v0  ;;  %8 = vst [vmem:[%s29_s1 + $0x8] sm:$0xff] %v4_v0 }

// kernel: tile.44
= control target key start
LH: loop header
LB: loop body
LE: loop exit
PB: predicated region body
PF: predicated region fallthrough
CT: control target
= control target key end

     0   :  { %s62_s8 = smov 96   ;;  %vm3_vm0 = vcmask 261120   ;;  %s64_s15 = smov 64   ;;  %vm9_vm1 = vcmask 1048320   ;;  %vm15_vm2 = vcmask 785920   ;;  %vm21_vm3 = vcmask 523520   ;;  %s99_s0 = inlined_call_operand.vmem [shape: f32[16,32], index: 0, kind: input, shape index: {}]   ;;  %s100_s1 = inlined_call_operand.vmem [shape: f32[1,512], index: 1, kind: output, shape index: {}]  }
   0x1   :  { %v53_v0 = vld [vmem:[%s99_s0 + $0x3] ss:$4 sm:$0xf]   ;;  %v54_v1 = vld [vmem:[%s99_s0 + $0x2] ss:$4 sm:$0xf]  }
   0x2   :  { %7 = vrot.lane.b32.xlu0 %v53_v0, %s62_s8  ;;  %v55_v2 = vld [vmem:[%s99_s0 + $0x1] ss:$4 sm:$0xf]   ;;  %v2_v3 = vld [vmem:[%s99_s0] ss:$4 sm:$0xf]  }
   0x3   :  { %s63_s0 = smov 32   ;;  %4 = vst.msk [vmem:[#allocation0] ss:$8 sm:$0xf] %vm3_vm0, %v2_v3  }
   0x4   :  { %19 = vrot.lane.b32.xlu1 %v55_v2, %s63_s0 }
   0x6   :  { %13 = vrot.lane.b32.xlu0 %v54_v1, %s64_s15 }
  0x74   :  { %v8_v4 = vpop.permute.xlu0 %7  }
  0x75   :  { %10 = vst.msk [vmem:[#allocation0] ss:$8 sm:$0xf] %vm9_vm1, %v8_v4  }
  0x76   :  { %v20_v5 = vpop.permute.xlu1 %19  }
  0x78   :  { %v14_v6 = vpop.permute.xlu0 %13  }
  0x79   :  { %16 = vst.msk [vmem:[#allocation0] ss:$8 sm:$0xf] %vm15_vm2, %v14_v6  }
  0x7a   :  { %22 = vst.msk [vmem:[#allocation0] ss:$8 sm:$0xf] %vm21_vm3, %v20_v5  }
  0x81   :  { %v27_v7 = vld [vmem:[#allocation0] sm:$0x1]  ;;  %v32_v8 = vld [vmem:[#allocation0 + $0x8] sm:$0x1]  ;;  %v38_v9 = vld [vmem:[#allocation0 + $0x10] sm:$0x1] }
  0x82   :  { %30 = vst [vmem:[%s100_s1] sm:$0x1] %v27_v7  ;;  %56 = vst [vmem:[%s100_s1 + $0x1] sm:$0x1] %v32_v8  ;;  %v45_v10 = vld [vmem:[#allocation0 + $0x18] sm:$0x1] }
  0x83   :  { %57 = vst [vmem:[%s100_s1 + $0x2] sm:$0x1] %v38_v9  ;;  %58 = vst [vmem:[%s100_s1 + $0x3] sm:$0x1] %v45_v10 }

// kernel: tile.53
= control target key start
LH: loop header
LB: loop body
LE: loop exit
PB: predicated region body
PF: predicated region fallthrough
CT: control target
= control target key end

     0   :  { %s28_s0 = inlined_call_operand.vmem [shape: f32[64], index: 0, kind: input, shape index: {}]   ;;  %s29_s1 = inlined_call_operand.vmem [shape: f32[16,64], index: 1, kind: output, shape index: {}]  }
   0x1   :  { %v4_v0 = vld [vmem:[%s28_s0] ss:$0 sm:$0xff] }
   0x2   :  { %5 = vst [vmem:[%s29_s1] sm:$0xff] %v4_v0  ;;  %8 = vst [vmem:[%s29_s1 + $0x8] sm:$0xff] %v4_v0 }

// kernel: tile.54
= control target key start
LH: loop header
LB: loop body
LE: loop exit
PB: predicated region body
PF: predicated region fallthrough
CT: control target
= control target key end

     0   :  { %vm3_vm0 = vcmask 523264   ;;  %vm10_vm1 = vcmask 1048064   ;;  %s125_s0 = inlined_call_operand.vmem [shape: f32[16,64], index: 0, kind: input, shape index: {}]   ;;  %s126_s1 = inlined_call_operand.vmem [shape: f32[1,1024], index: 1, kind: output, shape index: {}]  }
   0x1   :  { %v75_v0 = vld [vmem:[%s125_s0 + $0x1] ss:$2 sm:$0xff]   ;;  %v2_v1 = vld [vmem:[%s125_s0] ss:$2 sm:$0xff]   ;;  %s84_s0 = smov 64  }
   0x2   :  { %8 = vrot.lane.b32.xlu0 %v75_v0, %s84_s0  ;;  %4 = vst.msk [vmem:[#allocation0] ss:$8 sm:$0xf] %vm3_vm0, %v2_v1   ;;  %5 = vst.msk [vmem:[#allocation0] ss:$8 sm:$0xf0] %vm3_vm0, %v2_v1  }
  0x74   :  { %v9_v2 = vpop.permute.xlu0 %8  }
  0x75   :  { %11 = vst.msk [vmem:[#allocation0] ss:$8 sm:$0xf] %vm10_vm1, %v9_v2   ;;  %12 = vst.msk [vmem:[#allocation0] ss:$8 sm:$0xf0] %vm10_vm1, %v9_v2  }
  0x7c   :  { %v17_v3 = vld [vmem:[#allocation0] sm:$0x1]  ;;  %v22_v4 = vld [vmem:[#allocation0 + $0x8] sm:$0x1]  ;;  %v28_v5 = vld [vmem:[#allocation0 + $0x10] sm:$0x1] }
  0x7d   :  { %20 = vst [vmem:[%s126_s1] sm:$0x1] %v17_v3  ;;  %76 = vst [vmem:[%s126_s1 + $0x1] sm:$0x1] %v22_v4  ;;  %v35_v6 = vld [vmem:[#allocation0 + $0x18] sm:$0x1] }
  0x7e   :  { %77 = vst [vmem:[%s126_s1 + $0x2] sm:$0x1] %v28_v5  ;;  %v42_v7 = vld [vmem:[#allocation0 + $0x20] sm:$0x1]  ;;  %v49_v8 = vld [vmem:[#allocation0 + $0x28] sm:$0x1] }
  0x7f   :  { %78 = vst [vmem:[%s126_s1 + $0x3] sm:$0x1] %v35_v6  ;;  %79 = vst [vmem:[%s126_s1 + $0x4] sm:$0x1] %v42_v7  ;;  %v56_v9 = vld [vmem:[#allocation0 + $0x30] sm:$0x1] }
  0x80   :  { %80 = vst [vmem:[%s126_s1 + $0x5] sm:$0x1] %v49_v8  ;;  %v63_v10 = vld [vmem:[#allocation0 + $0x38] sm:$0x1]  ;;  %81 = vst [vmem:[%s126_s1 + $0x6] sm:$0x1] %v56_v9 }
  0x81   :  { %82 = vst [vmem:[%s126_s1 + $0x7] sm:$0x1] %v63_v10 }

// kernel: discriminator_forward.8
= control target key start
LH: loop header
LB: loop body
LE: loop exit
PB: predicated region body
PF: predicated region fallthrough
CT: control target
= control target key end

     0   :  { %s1126_s21 = smov 0   ;;  %s1128_s22 = smov 0   ;;  %s1276_s0 = inlined_call_operand.vmem [shape: bf16[32,512], index: 0, kind: input, shape index: {}]   ;;  %s1277_s1 = inlined_call_operand.vmem [shape: bf16[512,128], index: 1, kind: input, shape index: {}]   ;;  %s1278_s2 = inlined_call_operand.vmem [shape: f32[1,512], index: 2, kind: input, shape index: {}]   ;;  %s1279_s3 = inlined_call_operand.vmem [shape: f32[1,512], index: 3, kind: input, shape index: {}]   ;;  %s1280_s4 = inlined_call_operand.vmem [shape: bf16[32,128], index: 4, kind: output, shape index: {0}]   ;;  %s1281_s5 = inlined_call_operand.vmem [shape: f32[2,8,128], index: 5, kind: output, shape index: {1}]   ;;  %s1282_s6 = inlined_call_operand.vmem [shape: f32[2,8,128], index: 6, kind: output, shape index: {2}]  }
   0x1   :  { %s1130_s23 = smov 0  }
   0x2 LB: > { %s29_s24 = sadd.s32 1, %s1085_s22  ;;  %p914_p0 = scmp.ge.s32.totalorder %s1089_s23, 1  ;;  %s1089_s23 = sphi %s1130_s23, %s17_s23   ;;  %s1085_s22 = sphi %s1128_s22, %s1284_s22   ;;  %s1081_s21 = sphi %s1126_s21, %s1283_s21  }
   0x3   : > { %p31_p1 = scmp.ge.s32.totalorder %s29_s24, 2  ;;  %p237_p2 = scmp.lt.s32.totalorder %s1089_s23, 3 }
   0x5   : > { %s1286_s24 = smov (%p31_p1, %s29_s24), 0  ;;  %p238_p3 = pnand %p914_p0, %p237_p2 }
   0x6   : > { %s915_s13 = sshll.u32 (!%p238_p3), %s1081_s21, 1  ;;  %p295_p5 = scmp.lt.s32.totalorder (!%p238_p3), %s1081_s21, 1 }
   0x7   : > { %241 = sbr.rel (%p238_p3) target bundleno = 267 (0x10b), region = 36  ;;  %p280_p4 = scmp.lt.s32.totalorder (!%p238_p3), %s915_s13, 3 }
   0xc   : > { %v1035_v0 = vld [vmem:[%s1277_s1 + $0x78] sm:$0xff]   ;;  %v1039_v4 = vld [vmem:[%s1277_s1 + $0x70] sm:$0xff]   ;;  %v1043_v8 = vld [vmem:[%s1277_s1 + $0x68] sm:$0xff]   ;;  %v318_v22 = vlaneseq  ;;  %s1288_s13 = smov (!%p280_p4, %s915_s13), 3  ;;  %s1290_s21 = smov (!%p295_p5, %s1081_s21), 1 }
   0xd   : > { %v1036_v1 = vld [vmem:[%s1277_s1 + $0xf8] sm:$0xff]   ;;  %966 = vmatprep.subr.bf16.mxu0 %v1035_v0  ;;  %v1040_v5 = vld [vmem:[%s1277_s1 + $0xf0] sm:$0xff]   ;;  %v1044_v9 = vld [vmem:[%s1277_s1 + $0xe8] sm:$0xff]   ;;  %s958_s17 = sshll.u32 %s1288_s13, 4  ;;  %s919_s16 = sshll.u32 %s1288_s13, 2 }
   0xe   : > { %v1037_v2 = vld [vmem:[%s1277_s1 + $0x38] sm:$0xff]   ;;  %988 = vmatprep.subr.bf16.mxu1 %v1036_v1  ;;  %v1041_v6 = vld [vmem:[%s1277_s1 + $0x30] sm:$0xff]   ;;  %v1045_v10 = vld [vmem:[%s1277_s1 + $0x28] sm:$0xff]   ;;  %v319_v27 = vshrl.u32 %v318_v22, 7  ;;  %s284_s30 = scalar_lea.vmem %s1276_s0, %s958_s17  ;;  %s292_s19 = scalar_lea.vmem %s1280_s4, %s919_s16 }
   0xf   : > { %v1038_v3 = vld [vmem:[%s1277_s1 + $0xb8] sm:$0xff]   ;;  %967 = vmatpush3.bf16.msra.mxu0 %v1037_v2  ;;  %v1042_v7 = vld [vmem:[%s1277_s1 + $0xb0] sm:$0xff]   ;;  %v1046_v11 = vld [vmem:[%s1277_s1 + $0xa8] sm:$0xff]   ;;  %s920_s13 = sshll.u32 %s1290_s21, 3 }
  0x10   : > { %989 = vmatpush3.bf16.msra.mxu1 %v1038_v3  ;;  %968 = vmatprep.subr.bf16.mxu0 %v1039_v4  ;;  %v1047_v12 = vld [vmem:[%s1277_s1 + $0x60] sm:$0xff]   ;;  %v1051_v16 = vld [vmem:[%s1277_s1 + $0x58] sm:$0xff]   ;;  %v1055_v20 = vld [vmem:[%s1277_s1 + $0x50] sm:$0xff]   ;;  %v324_v33 = vsub.s32 1, %v319_v27  ;;  %v332_v35 = vsub.s32 3, %v319_v27  ;;  %v320_v39 = vsub.s32 0, %v319_v27  ;;  %s298_s26 = scalar_lea.vmem %s1281_s5, %s920_s13  ;;  %s302_s29 = scalar_lea.vmem %s1282_s6, %s920_s13 }
  0x11   : > { %990 = vmatprep.subr.bf16.mxu1 %v1040_v5  ;;  %v1048_v13 = vld [vmem:[%s1277_s1 + $0xe0] sm:$0xff]   ;;  %v1052_v17 = vld [vmem:[%s1277_s1 + $0xd8] sm:$0xff]   ;;  %v1056_v21 = vld [vmem:[%s1277_s1 + $0xd0] sm:$0xff]   ;;  %v328_v40 = vsub.s32 2, %v319_v27 }
  0x12   : > { %v1049_v14 = vld [vmem:[%s1277_s1 + $0x20] sm:$0xff]   ;;  %v1053_v18 = vld [vmem:[%s1277_s1 + $0x18] sm:$0xff]   ;;  %v1057_v23 = vld [vmem:[%s1277_s1 + $0x10] sm:$0xff]  }
  0x13   : > { %969 = vmatpush3.bf16.msra.mxu0 %v1041_v6  ;;  %v1050_v15 = vld [vmem:[%s1277_s1 + $0xa0] sm:$0xff]   ;;  %v1054_v19 = vld [vmem:[%s1277_s1 + $0x98] sm:$0xff]   ;;  %v1058_v24 = vld [vmem:[%s1277_s1 + $0x90] sm:$0xff]  }
  0x14   : > { %991 = vmatpush3.bf16.msra.mxu1 %v1042_v7  ;;  %970 = vmatprep.subr.bf16.mxu0 %v1043_v8  ;;  %v1059_v25 = vld [vmem:[%s1277_s1 + $0x48] sm:$0xff]   ;;  %v1063_v30 = vld [vmem:[%s1277_s1 + $0x40] sm:$0xff]   ;;  %v306_v37 = vld [vmem:[%s284_s30 + $0x10] sm:$0xff] }
  0x15   : > { %992 = vmatprep.subr.bf16.mxu1 %v1044_v9  ;;  %v1060_v26 = vld [vmem:[%s1277_s1 + $0xc8] sm:$0xff]   ;;  %v1064_v31 = vld [vmem:[%s1277_s1 + $0xc0] sm:$0xff]   ;;  %v312_v43 = vunpack.c.l.bf16 %v306_v37  ;;  %v313_v44 = vunpack.c.h.bf16 %v306_v37  ;;  %v307_v47 = vld [vmem:[%s284_s30 + $0x18] sm:$0xff] }
  0x16   : > { %v1061_v28 = vld [vmem:[%s1277_s1 + $0x8] sm:$0xff]   ;;  %v1065_v32 = vld [vmem:[%s1277_s1] sm:$0xff]   ;;  %v314_v52 = vunpack.c.l.bf16 %v307_v47  ;;  %v315_v53 = vunpack.c.h.bf16 %v307_v47 }
  0x17   : > { %971 = vmatpush3.bf16.msra.mxu0 %v1045_v10  ;;  %v1062_v29 = vld [vmem:[%s1277_s1 + $0x88] sm:$0xff]   ;;  %v1066_v34 = vld [vmem:[%s1277_s1 + $0x80] sm:$0xff]  }
  0x18   : > { %993 = vmatpush3.bf16.msra.mxu1 %v1046_v11  ;;  %972 = vmatprep.subr.bf16.mxu0 %v1047_v12  ;;  %v304_v36 = vld [vmem:[%s284_s30] sm:$0xff]  ;;  %v305_v46 = vld [vmem:[%s284_s30 + $0x8] sm:$0xff] }
  0x19   : > { %994 = vmatprep.subr.bf16.mxu1 %v1048_v13  ;;  %v316_v38 = vld [vmem:[%s1278_s2] sm:$0xf]  ;;  %v308_v41 = vunpack.c.l.bf16 %v304_v36  ;;  %v309_v42 = vunpack.c.h.bf16 %v304_v36  ;;  %v310_v50 = vunpack.c.l.bf16 %v305_v46  ;;  %v311_v51 = vunpack.c.h.bf16 %v305_v46 }
  0x1a   : > { %v346_v45 = vld [vmem:[%s1279_s3] sm:$0xf]  ;;  %v325_v48 = vrot.slane %v316_v38, %v324_v33  ;;  %v333_v54 = vrot.slane %v316_v38, %v332_v35  ;;  %v321_v58 = vrot.slane %v316_v38, %v320_v39  ;;  %v329_v62 = vrot.slane %v316_v38, %v328_v40 }
  0x1b   : > { %973 = vmatpush3.bf16.msra.mxu0 %v1049_v14  ;;  %v355_v49 = vrot.slane %v346_v45, %v324_v33  ;;  %v363_v55 = vrot.slane %v346_v45, %v332_v35  ;;  %v351_v59 = vrot.slane %v346_v45, %v320_v39  ;;  %v359_v63 = vrot.slane %v346_v45, %v328_v40 }
  0x1c   : > { %995 = vmatpush3.bf16.msra.mxu1 %v1050_v15  ;;  %974 = vmatprep.subr.bf16.mxu0 %v1051_v16  ;;  %v339_v56 = vmul.f32 %v325_v48, %v309_v42  ;;  %v343_v57 = vmul.f32 %v325_v48, %v313_v44  ;;  %v341_v60 = vmul.f32 %v333_v54, %v311_v51 }
  0x1d   : > { %996 = vmatprep.subr.bf16.mxu1 %v1052_v17  ;;  %v345_v61 = vmul.f32 %v333_v54, %v315_v53  ;;  %v338_v2 = vmul.f32 %v321_v58, %v308_v41  ;;  %v342_v3 = vmul.f32 %v321_v58, %v312_v43  ;;  %v340_v6 = vmul.f32 %v329_v62, %v310_v50 }
  0x1e   : > { %v369_v0 = vadd.f32 %v355_v49, %v339_v56  ;;  %v373_v1 = vadd.f32 %v355_v49, %v343_v57  ;;  %v371_v4 = vadd.f32 %v363_v55, %v341_v60  ;;  %v344_v7 = vmul.f32 %v329_v62, %v314_v52 }
  0x1f   : > { %975 = vmatpush3.bf16.msra.mxu0 %v1053_v18  ;;  %v375_v5 = vadd.f32 %v363_v55, %v345_v61  ;;  %v368_v14 = vadd.f32 %v351_v59, %v338_v2  ;;  %v372_v15 = vadd.f32 %v351_v59, %v342_v3 }
  0x20   : > { %997 = vmatpush3.bf16.msra.mxu1 %v1054_v19  ;;  %976 = vmatprep.subr.bf16.mxu0 %v1055_v20  ;;  %vm377_vm0 = vcmp.gt.f32.partialorder %v369_v0, 0.0  ;;  %vm381_vm1 = vcmp.gt.f32.partialorder %v373_v1, 0.0  ;;  %v385_v8 = vmul.f32 0.2, %v369_v0  ;;  %v389_v9 = vmul.f32 0.2, %v373_v1 }
  0x21   : > { %998 = vmatprep.subr.bf16.mxu1 %v1056_v21  ;;  %vm379_vm2 = vcmp.gt.f32.partialorder %v371_v4, 0.0  ;;  %vm383_vm3 = vcmp.gt.f32.partialorder %v375_v5, 0.0  ;;  %v387_v10 = vmul.f32 0.2, %v371_v4  ;;  %v391_v11 = vmul.f32 0.2, %v375_v5 }
  0x22   : > { %v393_v12 = vsel %vm377_vm0, %v369_v0, %v385_v8  ;;  %v397_v13 = vsel %vm381_vm1, %v373_v1, %v389_v9  ;;  %v370_v19 = vadd.f32 %v359_v63, %v340_v6  ;;  %vm376_vm4 = vcmp.gt.f32.partialorder %v368_v14, 0.0 }
  0x23   : > { %977 = vmatpush3.bf16.msra.mxu0 %v1057_v23  ;;  %v401_v16 = vpack.c.bf16 %v397_v13, %v393_v12  ;;  %v395_v17 = vsel %vm379_vm2, %v371_v4, %v387_v10  ;;  %v399_v18 = vsel %vm383_vm3, %v375_v5, %v391_v11  ;;  %vm380_vm5 = vcmp.gt.f32.partialorder %v372_v15, 0.0 }
  0x24   : > { %999 = vmatpush3.bf16.msra.mxu1 %v1058_v24  ;;  %978 = vmatprep.subr.bf16.mxu0 %v1059_v25  ;;  %v403_v20 = vpack.c.bf16 %v399_v18, %v395_v17  ;;  %v384_v21 = vmul.f32 0.2, %v368_v14  ;;  %v388_v22 = vmul.f32 0.2, %v372_v15  ;;  %v374_v23 = vadd.f32 %v359_v63, %v344_v7 }
  0x25   : > { %1000 = vmatprep.subr.bf16.mxu1 %v1060_v26  ;;  %692 = vmatprep.mubr.bf16.mxu0 %v401_v16  ;;  %vm378_vm6 = vcmp.gt.f32.partialorder %v370_v19, 0.0  ;;  %v386_v24 = vmul.f32 0.2, %v370_v19 }
  0x26   : > { %733 = vmatprep.mubr.bf16.mxu1 %v403_v20  ;;  %v392_v25 = vsel %vm376_vm4, %v368_v14, %v384_v21  ;;  %v396_v26 = vsel %vm380_vm5, %v372_v15, %v388_v22  ;;  %vm382_vm7 = vcmp.gt.f32.partialorder %v374_v23, 0.0  ;;  %v390_v27 = vmul.f32 0.2, %v374_v23 }
  0x27   : > { %979 = vmatpush3.bf16.msra.mxu0 %v1061_v28  ;;  %v394_v28 = vsel %vm378_vm6, %v370_v19, %v386_v24 }
  0x28   : > { %1001 = vmatpush3.bf16.msra.mxu1 %v1062_v29  ;;  %980 = vmatprep.subr.bf16.mxu0 %v1063_v30  ;;  %v400_v29 = vpack.c.bf16 %v396_v26, %v392_v25  ;;  %v398_v30 = vsel %vm382_vm7, %v374_v23, %v390_v27 }
  0x29   : > { %1002 = vmatprep.subr.bf16.mxu1 %v1064_v31  ;;  %v402_v31 = vpack.c.bf16 %v398_v30, %v394_v28 }
  0x2b   : > { %981 = vmatpush3.bf16.msra.mxu0 %v1065_v32 }
  0x2c   : > { %1003 = vmatpush3.bf16.msra.mxu1 %v1066_v34 }
  0x2e   : > { %693 = vmatmul.mubr.bf16.vlgmr.msra.gmra.mxu0 %v400_v29 }
  0x2f   : > { %734 = vmatmul.mubr.bf16.vlgmr.msra.gmra.mxu1 %v402_v31 }
  0xee   : > { %v982_v32 = vpop.f32.mrf.mxu0 }
  0xef   : > { %v1004_v33 = vpop.f32.mrf.mxu1 }
  0xf0   : > { %v983_v34 = vpop.f32.mrf.mxu0 }
  0xf1   : > { %v1005_v35 = vpop.f32.mrf.mxu1  ;;  %v984_v37 = vadd.f32 %v983_v34, %v982_v32 }
  0xf2   : > { %v985_v36 = vpop.f32.mrf.mxu0  ;;  %v1006_v38 = vadd.f32 %v1005_v35, %v1004_v33 }
  0xf3   : > { %v1007_v39 = vpop.f32.mrf.mxu1 }
  0xf4   : > { %v986_v40 = vpop.f32.mrf.mxu0  ;;  %v736_v43 = vadd.f32 %v1006_v38, %v984_v37 }
  0xf5   : > { %v987_v41 = vadd.f32 %v986_v40, %v985_v36  ;;  %v1008_v42 = vpop.f32.mrf.mxu1 }
  0xf6   : > { %v1009_v44 = vadd.f32 %v1008_v42, %v1007_v39  ;;  %v759_v46 = vmul.f32 %v736_v43, %v736_v43 }
  0xf8   : > { %v739_v45 = vadd.f32 %v1009_v44, %v987_v41 }
  0xfa   : > { %v749_v47 = vadd.f32 %v739_v45, %v736_v43  ;;  %v760_v48 = vmul.f32 %v739_v45, %v739_v45  ;;  %v964_v49 = vpack.c.bf16 %v739_v45, %v736_v43 }
  0xfc   : > { %v750_v50 = vrot.slane %v749_v47, 4  ;;  %v761_v51 = vadd.f32 %v760_v48, %v759_v46  ;;  %965 = vst [vmem:[%s292_s19] sm:$0xff] %v964_v49  }
  0xfe   : > { %v751_v52 = vadd.f32 %v750_v50, %v749_v47  ;;  %v762_v53 = vrot.slane %v761_v51, 4 }
 0x100   : > { %v752_v54 = vrot.slane %v751_v52, 2  ;;  %v763_v55 = vadd.f32 %v762_v53, %v761_v51 }
 0x102   : > { %v753_v56 = vadd.f32 %v752_v54, %v751_v52  ;;  %v764_v57 = vrot.slane %v763_v55, 2 }
 0x104   : > { %v754_v58 = vrot.slane %v753_v56, 1  ;;  %v765_v59 = vadd.f32 %v764_v57, %v763_v55 }
 0x106   : > { %v755_v60 = vadd.f32 %v754_v58, %v753_v56  ;;  %v766_v61 = vrot.slane %v765_v59, 1 }
 0x108   : > { %v767_v62 = vadd.f32 %v766_v61, %v765_v59  ;;  %757 = vst [vmem:[%s298_s26] sm:$0xff] %v755_v60 }
 0x10a   : > { %769 = vst [vmem:[%s302_s29] sm:$0xff] %v767_v62 }
 0x10b PF: > { %s17_s23 = sadd.s32 1, %s1089_s23   ;;  %s1283_s21 = smov %s1085_s22 }
 0x10c   : > { %p14_p6 = scmp.ge.s32.totalorder %s17_s23, 4   ;;  %s1284_s22 = smov %s1286_s24 }
 0x10e   :  { %16 = sbr.rel (!%p14_p6) target bundleno = 2 (0x2), region = 94 }

// kernel: discriminator_forward.9
= control target key start
LH: loop header
LB: loop body
LE: loop exit
PB: predicated region body
PF: predicated region fallthrough
CT: control target
= control target key end

     0   :  { %v23_v20 = vlaneseq  ;;  %v1128_v28 = vmov 1983009808   ;;  %s1383_s1 = inlined_call_operand.vmem [shape: bf16[1024,128], index: 1, kind: input, shape index: {}]   ;;  %s1384_s2 = inlined_call_operand.vmem [shape: f32[1,1024], index: 2, kind: input, shape index: {}]   ;;  %s1385_s3 = inlined_call_operand.vmem [shape: f32[1,1024], index: 3, kind: input, shape index: {}]   ;;  %s1386_s0 = inlined_call_operand.vmem [shape: bf16[2,1024], index: 0, kind: input, shape index: {}]   ;;  %s1387_s4 = inlined_call_operand.vmem [shape: f32[2,128], index: 4, kind: output, shape index: {}]  }
   0x1   :  { %v1060_v0 = vld [vmem:[%s1383_s1 + $0x78] sm:$0xff]   ;;  %v1064_v4 = vld [vmem:[%s1383_s1 + $0x70] sm:$0xff]   ;;  %v1068_v8 = vld [vmem:[%s1383_s1 + $0x68] sm:$0xff]   ;;  %v58_v29 = vunpack.c.l.s4 %v1128_v28 }
   0x2   :  { %v1061_v1 = vld [vmem:[%s1383_s1 + $0xf8] sm:$0xff]   ;;  %971 = vmatprep.subr.bf16.mxu0 %v1060_v0  ;;  %v1065_v5 = vld [vmem:[%s1383_s1 + $0xf0] sm:$0xff]   ;;  %v1069_v9 = vld [vmem:[%s1383_s1 + $0xe8] sm:$0xff]   ;;  %v1226_v25 = vshrl.u32 %v23_v20, 7 }
   0x3   :  { %v1062_v2 = vld [vmem:[%s1383_s1 + $0x38] sm:$0xff]   ;;  %993 = vmatprep.subr.bf16.mxu1 %v1061_v1  ;;  %v1066_v6 = vld [vmem:[%s1383_s1 + $0x30] sm:$0xff]   ;;  %v1070_v10 = vld [vmem:[%s1383_s1 + $0x28] sm:$0xff]   ;;  %v59_v37 = vunpack.c.0.s8 %v58_v29 }
   0x4   :  { %v1063_v3 = vld [vmem:[%s1383_s1 + $0xb8] sm:$0xff]   ;;  %972 = vmatpush3.bf16.msra.mxu0 %v1062_v2  ;;  %v1067_v7 = vld [vmem:[%s1383_s1 + $0xb0] sm:$0xff]   ;;  %v1071_v11 = vld [vmem:[%s1383_s1 + $0xa8] sm:$0xff]   ;;  %v25_v32 = vsub.s32 0, %v1226_v25  ;;  %v29_v34 = vsub.s32 1, %v1226_v25  ;;  %v33_v36 = vsub.s32 2, %v1226_v25 }
   0x5   :  { %994 = vmatpush3.bf16.msra.mxu1 %v1063_v3  ;;  %973 = vmatprep.subr.bf16.mxu0 %v1064_v4  ;;  %v1072_v12 = vld [vmem:[%s1383_s1 + $0x60] sm:$0xff]   ;;  %v1076_v16 = vld [vmem:[%s1383_s1 + $0x58] sm:$0xff]   ;;  %v1080_v21 = vld [vmem:[%s1383_s1 + $0x50] sm:$0xff]   ;;  %v37_v39 = vsub.s32 3, %v1226_v25  ;;  %v1263_v45 = vsub.s32 %v59_v37, %v1226_v25  ;;  %v41_v47 = vsub.s32 4, %v1226_v25  ;;  %v45_v57 = vsub.s32 5, %v1226_v25 }
   0x6   :  { %995 = vmatprep.subr.bf16.mxu1 %v1065_v5  ;;  %v1073_v13 = vld [vmem:[%s1383_s1 + $0xe0] sm:$0xff]   ;;  %v1077_v17 = vld [vmem:[%s1383_s1 + $0xd8] sm:$0xff]   ;;  %v1081_v22 = vld [vmem:[%s1383_s1 + $0xd0] sm:$0xff]   ;;  %v49_v60 = vsub.s32 6, %v1226_v25  ;;  %v53_v61 = vsub.s32 7, %v1226_v25 }
   0x7   :  { %v1074_v14 = vld [vmem:[%s1383_s1 + $0x20] sm:$0xff]   ;;  %v1078_v18 = vld [vmem:[%s1383_s1 + $0x18] sm:$0xff]   ;;  %v1082_v23 = vld [vmem:[%s1383_s1 + $0x10] sm:$0xff]  }
   0x8   :  { %974 = vmatpush3.bf16.msra.mxu0 %v1066_v6  ;;  %v1075_v15 = vld [vmem:[%s1383_s1 + $0xa0] sm:$0xff]   ;;  %v1079_v19 = vld [vmem:[%s1383_s1 + $0x98] sm:$0xff]   ;;  %v1083_v24 = vld [vmem:[%s1383_s1 + $0x90] sm:$0xff]  }
   0x9   :  { %996 = vmatpush3.bf16.msra.mxu1 %v1067_v7  ;;  %975 = vmatprep.subr.bf16.mxu0 %v1068_v8  ;;  %v1084_v26 = vld [vmem:[%s1383_s1 + $0x48] sm:$0xff]   ;;  %v1088_v33 = vld [vmem:[%s1383_s1 + $0x40] sm:$0xff]   ;;  %v1092_v46 = vld [vmem:[%s1383_s1 + $0x178] sm:$0xff]  }
   0xa   :  { %997 = vmatprep.subr.bf16.mxu1 %v1069_v9  ;;  %v1085_v27 = vld [vmem:[%s1383_s1 + $0xc8] sm:$0xff]   ;;  %v1089_v35 = vld [vmem:[%s1383_s1 + $0xc0] sm:$0xff]   ;;  %v1093_v52 = vld [vmem:[%s1383_s1 + $0x1f8] sm:$0xff]  }
   0xb   :  { %v1086_v30 = vld [vmem:[%s1383_s1 + $0x8] sm:$0xff]   ;;  %v1090_v38 = vld [vmem:[%s1383_s1] sm:$0xff]   ;;  %v1096_v37 = vld [vmem:[%s1383_s1 + $0x170] sm:$0xff]  }
   0xc   :  { %976 = vmatpush3.bf16.msra.mxu0 %v1070_v10  ;;  %v1087_v31 = vld [vmem:[%s1383_s1 + $0x88] sm:$0xff]   ;;  %v1091_v40 = vld [vmem:[%s1383_s1 + $0x80] sm:$0xff]  }
   0xd   :  { %998 = vmatpush3.bf16.msra.mxu1 %v1071_v11  ;;  %977 = vmatprep.subr.bf16.mxu0 %v1072_v12  ;;  %v21_v41 = vld [vmem:[%s1384_s2] sm:$0xff] }
   0xe   :  { %999 = vmatprep.subr.bf16.mxu1 %v1073_v13  ;;  %v93_v42 = vld [vmem:[%s1385_s3] sm:$0xff]  ;;  %v26_v43 = vrot.slane %v21_v41, %v25_v32  ;;  %v30_v44 = vrot.slane %v21_v41, %v29_v34  ;;  %v34_v48 = vrot.slane %v21_v41, %v33_v36  ;;  %v38_v49 = vrot.slane %v21_v41, %v37_v39 }
   0xf   :  { %v98_v50 = vrot.slane %v93_v42, %v25_v32  ;;  %v102_v51 = vrot.slane %v93_v42, %v29_v34  ;;  %v18_v53 = vld [vmem:[%s1386_s0] sm:$0xff]  ;;  %v106_v55 = vrot.slane %v93_v42, %v33_v36  ;;  %v110_v56 = vrot.slane %v93_v42, %v37_v39  ;;  %v1095_v39 = vld [vmem:[%s1383_s1 + $0x1b8] sm:$0xff]  }
  0x10   :  { %978 = vmatpush3.bf16.msra.mxu0 %v1074_v14  ;;  %v55_v54 = vcombine.low %v26_v43, %v30_v44  ;;  %v56_v58 = vcombine.low %v34_v48, %v38_v49  ;;  %v19_v0 = vunpack.c.l.bf16 %v18_v53  ;;  %v42_v4 = vrot.slane %v21_v41, %v41_v47  ;;  %v1098_v43 = vld [vmem:[%s1383_s1 + $0x130] sm:$0xff]   ;;  %v1100_v44 = vld [vmem:[%s1383_s1 + $0x168] sm:$0xff]  }
  0x11   :  { %1000 = vmatpush3.bf16.msra.mxu1 %v1075_v15  ;;  %979 = vmatprep.subr.bf16.mxu0 %v1076_v16  ;;  %v127_v59 = vcombine.low %v98_v50, %v102_v51  ;;  %v128_v63 = vcombine.low %v106_v55, %v110_v56  ;;  %v46_v5 = vrot.slane %v21_v41, %v45_v57  ;;  %v1102_v49 = vld [vmem:[%s1383_s1 + $0x128] sm:$0xff]   ;;  %v1104_v50 = vld [vmem:[%s1383_s1 + $0x160] sm:$0xff]   ;;  %v1108_v55 = vld [vmem:[%s1383_s1 + $0x158] sm:$0xff]  }
  0x12   :  { %1001 = vmatprep.subr.bf16.mxu1 %v1077_v17  ;;  %v63_v62 = vrot.slane %v55_v54, %v1263_v45  ;;  %v70_v1 = vrot.slane %v56_v58, %v1263_v45  ;;  %v50_v7 = vrot.slane %v21_v41, %v49_v60  ;;  %v54_v8 = vrot.slane %v21_v41, %v53_v61  ;;  %v1103_v51 = vld [vmem:[%s1383_s1 + $0x1a8] sm:$0xff]   ;;  %v1107_v56 = vld [vmem:[%s1383_s1 + $0x1a0] sm:$0xff]   ;;  %v1109_v58 = vld [vmem:[%s1383_s1 + $0x1d8] sm:$0xff]  }
  0x13   :  { %v135_v2 = vrot.slane %v127_v59, %v1263_v45  ;;  %v142_v3 = vrot.slane %v128_v63, %v1263_v45  ;;  %v72_v11 = vcombine.low %v42_v4, %v46_v5  ;;  %v114_v12 = vrot.slane %v93_v42, %v41_v47  ;;  %v1101_v47 = vld [vmem:[%s1383_s1 + $0x1e8] sm:$0xff]   ;;  %v1114_v5 = vld [vmem:[%s1383_s1 + $0x110] sm:$0xff]  }
  0x14   :  { %980 = vmatpush3.bf16.msra.mxu0 %v1078_v18  ;;  %v71_v6 = vcombine.low %v63_v62, %v70_v1  ;;  %v118_v13 = vrot.slane %v93_v42, %v45_v57  ;;  %v73_v15 = vcombine.low %v50_v7, %v54_v8  ;;  %v122_v16 = vrot.slane %v93_v42, %v49_v60  ;;  %v1112_v62 = vld [vmem:[%s1383_s1 + $0x150] sm:$0xff]   ;;  %v1111_v1 = vld [vmem:[%s1383_s1 + $0x198] sm:$0xff]   ;;  %v1117_v8 = vld [vmem:[%s1383_s1 + $0x1c8] sm:$0xff]  }
  0x15   :  { %1002 = vmatpush3.bf16.msra.mxu1 %v1079_v19  ;;  %981 = vmatprep.subr.bf16.mxu0 %v1080_v21  ;;  %v143_v9 = vcombine.low %v135_v2, %v142_v3  ;;  %v126_v17 = vrot.slane %v93_v42, %v53_v61  ;;  %v80_v19 = vrot.slane %v72_v11, %v1263_v45  ;;  %v1110_v61 = vld [vmem:[%s1383_s1 + $0x118] sm:$0xff]   ;;  %v1113_v2 = vld [vmem:[%s1383_s1 + $0x1d0] sm:$0xff]   ;;  %v1119_v11 = vld [vmem:[%s1383_s1 + $0x188] sm:$0xff]  }
  0x16   :  { %1003 = vmatprep.subr.bf16.mxu1 %v1081_v22  ;;  %v91_v10 = vmul.f32 %v71_v6, %v19_v0  ;;  %v87_v21 = vrot.slane %v73_v15, %v1263_v45  ;;  %v144_v22 = vcombine.low %v114_v12, %v118_v13  ;;  %v1115_v7 = vld [vmem:[%s1383_s1 + $0x190] sm:$0xff]   ;;  %v1121_v12 = vld [vmem:[%s1383_s1 + $0x1c0] sm:$0xff]  }
  0x17   :  { %v1122_v13 = vld [vmem:[%s1383_s1 + $0x100] sm:$0xff]  }
  0x18   :  { %982 = vmatpush3.bf16.msra.mxu0 %v1082_v23  ;;  %v163_v14 = vadd.f32 %v143_v9, %v91_v10  ;;  %v145_v23 = vcombine.low %v122_v16, %v126_v17  ;;  %v1118_v9 = vld [vmem:[%s1383_s1 + $0x108] sm:$0xff]   ;;  %v1120_v10 = vld [vmem:[%s1383_s1 + $0x140] sm:$0xff]  }
  0x19   :  { %1004 = vmatpush3.bf16.msra.mxu1 %v1083_v24  ;;  %983 = vmatprep.subr.bf16.mxu0 %v1084_v26  ;;  %v20_v26 = vunpack.c.h.bf16 %v18_v53  ;;  %v1106_v53 = vld [vmem:[%s1383_s1 + $0x120] sm:$0xff]  }
  0x1a   :  { %1005 = vmatprep.subr.bf16.mxu1 %v1085_v27  ;;  %vm165_vm0 = vcmp.gt.f32.partialorder %v163_v14, 0.0  ;;  %v167_v18 = vmul.f32 0.2, %v163_v14  ;;  %v159_v32 = vrot.slane %v145_v23, %v1263_v45 }
  0x1c   :  { %984 = vmatpush3.bf16.msra.mxu0 %v1086_v30  ;;  %v169_v20 = vsel %vm165_vm0, %v163_v14, %v167_v18  ;;  %v88_v30 = vcombine.low %v80_v19, %v87_v21  ;;  %v1123_v14 = vld [vmem:[%s1383_s1 + $0x180] sm:$0xff]  }
  0x1d   :  { %1006 = vmatpush3.bf16.msra.mxu1 %v1087_v31  ;;  %985 = vmatprep.subr.bf16.mxu0 %v1088_v33  ;;  %v180_v24 = vrot.slane %v169_v20, %v1263_v45  ;;  %v173_v25 = vcombine.high %v169_v20, %v169_v20  ;;  %v152_v31 = vrot.slane %v144_v22, %v1263_v45 }
  0x1e   :  { %1007 = vmatprep.subr.bf16.mxu1 %v1089_v35  ;;  %v1094_v35 = vld [vmem:[%s1383_s1 + $0x138] sm:$0xff]   ;;  %v92_v41 = vmul.f32 %v88_v30, %v20_v26 }
  0x1f   :  { %v188_v27 = vcombine.high %v180_v24, %v180_v24  ;;  %v187_v28 = vrot.slane %v173_v25, %v1263_v45  ;;  %v215_v29 = vpack.c.bf16 %v180_v24, %v180_v24  ;;  %v160_v42 = vcombine.low %v152_v31, %v159_v32 }
  0x20   :  { %986 = vmatpush3.bf16.msra.mxu0 %v1090_v38 }
  0x21   :  { %1008 = vmatpush3.bf16.msra.mxu1 %v1091_v40  ;;  %1015 = vmatprep.subr.bf16.mxu0 %v1092_v46  ;;  %v216_v33 = vpack.c.bf16 %v188_v27, %v188_v27  ;;  %v189_v34 = vcombine.high %v187_v28, %v187_v28  ;;  %v217_v36 = vpack.c.bf16 %v187_v28, %v187_v28  ;;  %v1097_v40 = vld [vmem:[%s1383_s1 + $0x1f0] sm:$0xff]  }
  0x22   :  { %1037 = vmatprep.subr.bf16.mxu1 %v1093_v52  ;;  %v1099_v46 = vld [vmem:[%s1383_s1 + $0x1b0] sm:$0xff]   ;;  %v164_v48 = vadd.f32 %v160_v42, %v92_v41  ;;  %v1105_v52 = vld [vmem:[%s1383_s1 + $0x1e0] sm:$0xff]  }
  0x23   :  { %767 = vmatprep.mubr.bf16.mxu0 %v216_v33  ;;  %v218_v38 = vpack.c.bf16 %v189_v34, %v189_v34 }
  0x24   :  { %768 = vmatmul.mubr.bf16.vlgmr.msra.gmra.mxu0 %v215_v29  ;;  %vm166_vm1 = vcmp.gt.f32.partialorder %v164_v48, 0.0  ;;  %v168_v54 = vmul.f32 0.2, %v164_v48 }
  0x25   :  { %807 = vmatprep.mubr.bf16.mxu1 %v218_v38  ;;  %1016 = vmatpush3.bf16.msra.mxu0 %v1094_v35 }
  0x26   :  { %808 = vmatmul.mubr.bf16.vlgmr.msra.gmra.mxu1 %v217_v36  ;;  %1017 = vmatprep.subr.bf16.mxu0 %v1096_v37  ;;  %v170_v57 = vsel %vm166_vm1, %v164_v48, %v168_v54 }
  0x27   :  { %1038 = vmatpush3.bf16.msra.mxu1 %v1095_v39  ;;  %v197_v59 = vrot.slane %v170_v57, %v1263_v45  ;;  %v190_v60 = vcombine.high %v170_v57, %v170_v57 }
  0x28   :  { %1039 = vmatprep.subr.bf16.mxu1 %v1097_v40 }
  0x29   :  { %1018 = vmatpush3.bf16.msra.mxu0 %v1098_v43  ;;  %v205_v63 = vcombine.high %v197_v59, %v197_v59  ;;  %v204_v0 = vrot.slane %v190_v60, %v1263_v45  ;;  %v1116_v45 = vld [vmem:[%s1383_s1 + $0x148] sm:$0xff]   ;;  %v219_v15 = vpack.c.bf16 %v197_v59, %v197_v59 }
  0x2a   :  { %1019 = vmatprep.subr.bf16.mxu0 %v1100_v44 }
  0x2b   :  { %1040 = vmatpush3.bf16.msra.mxu1 %v1099_v46  ;;  %v220_v3 = vpack.c.bf16 %v205_v63, %v205_v63  ;;  %v206_v4 = vcombine.high %v204_v0, %v204_v0  ;;  %v221_v16 = vpack.c.bf16 %v204_v0, %v204_v0 }
  0x2c   :  { %1041 = vmatprep.subr.bf16.mxu1 %v1101_v47 }
  0x2d   :  { %1020 = vmatpush3.bf16.msra.mxu0 %v1102_v49  ;;  %847 = vmatprep.mubr.bf16.mxu0 %v220_v3  ;;  %v222_v6 = vpack.c.bf16 %v206_v4, %v206_v4 }
  0x2e   :  { %1021 = vmatprep.subr.bf16.mxu0 %v1104_v50 }
  0x2f   :  { %1042 = vmatpush3.bf16.msra.mxu1 %v1103_v51  ;;  %887 = vmatprep.mubr.bf16.mxu1 %v222_v6 }
  0x30   :  { %1043 = vmatprep.subr.bf16.mxu1 %v1105_v52 }
  0x31   :  { %1022 = vmatpush3.bf16.msra.mxu0 %v1106_v53 }
  0x32   :  { %1023 = vmatprep.subr.bf16.mxu0 %v1108_v55 }
  0x33   :  { %1044 = vmatpush3.bf16.msra.mxu1 %v1107_v56 }
  0x34   :  { %1045 = vmatprep.subr.bf16.mxu1 %v1109_v58 }
  0x35   :  { %1024 = vmatpush3.bf16.msra.mxu0 %v1110_v61 }
  0x36   :  { %1025 = vmatprep.subr.bf16.mxu0 %v1112_v62 }
  0x37   :  { %1046 = vmatpush3.bf16.msra.mxu1 %v1111_v1 }
  0x38   :  { %1047 = vmatprep.subr.bf16.mxu1 %v1113_v2 }
  0x39   :  { %1026 = vmatpush3.bf16.msra.mxu0 %v1114_v5 }
  0x3a   :  { %1027 = vmatprep.subr.bf16.mxu0 %v1116_v45 }
  0x3b   :  { %1048 = vmatpush3.bf16.msra.mxu1 %v1115_v7 }
  0x3c   :  { %1049 = vmatprep.subr.bf16.mxu1 %v1117_v8 }
  0x3d   :  { %1028 = vmatpush3.bf16.msra.mxu0 %v1118_v9 }
  0x3e   :  { %1029 = vmatprep.subr.bf16.mxu0 %v1120_v10 }
  0x3f   :  { %1050 = vmatpush3.bf16.msra.mxu1 %v1119_v11 }
  0x40   :  { %1051 = vmatprep.subr.bf16.mxu1 %v1121_v12 }
  0x41   :  { %1030 = vmatpush3.bf16.msra.mxu0 %v1122_v13 }
  0x43   :  { %1052 = vmatpush3.bf16.msra.mxu1 %v1123_v14 }
  0x44   :  { %848 = vmatmul.mubr.bf16.vlgmr.msra.gmra.mxu0 %v219_v15 }
  0x46   :  { %888 = vmatmul.mubr.bf16.vlgmr.msra.gmra.mxu1 %v221_v16 }
  0xe4   :  { %v987_v17 = vpop.f32.mrf.mxu0 }
  0xe6   :  { %v1009_v18 = vpop.f32.mrf.mxu1  ;;  %v988_v19 = vpop.f32.mrf.mxu0 }
  0xe7   :  { %v989_v25 = vadd.f32 %v988_v19, %v987_v17 }
  0xe8   :  { %v1010_v20 = vpop.f32.mrf.mxu1  ;;  %v990_v21 = vpop.f32.mrf.mxu0 }
  0xe9   :  { %v1011_v26 = vadd.f32 %v1010_v20, %v1009_v18 }
  0xea   :  { %v1012_v22 = vpop.f32.mrf.mxu1  ;;  %v991_v23 = vpop.f32.mrf.mxu0 }
  0xeb   :  { %v810_v30 = vadd.f32 %v1011_v26, %v989_v25 }
  0xec   :  { %v1013_v24 = vpop.f32.mrf.mxu1 }
 0x104   :  { %v1031_v27 = vpop.f32.mrf.mxu0 }
 0x106   :  { %v1053_v28 = vpop.f32.mrf.mxu1  ;;  %v1032_v29 = vpop.f32.mrf.mxu0 }
 0x107   :  { %v1033_v31 = vadd.f32 %v1032_v29, %v1031_v27 }
 0x108   :  { %v1054_v32 = vpop.f32.mrf.mxu1  ;;  %v1034_v33 = vpop.f32.mrf.mxu0 }
 0x109   :  { %v850_v34 = vadd.f32 %v1033_v31, %v810_v30  ;;  %v1055_v35 = vadd.f32 %v1054_v32, %v1053_v28 }
 0x10a   :  { %v1056_v36 = vpop.f32.mrf.mxu1  ;;  %v1035_v37 = vpop.f32.mrf.mxu0 }
 0x10b   :  { %v890_v38 = vadd.f32 %v1055_v35, %v850_v34 }
 0x10c   :  { %v1057_v39 = vpop.f32.mrf.mxu1 }
 0x10d   :  { %v970_v40 = vmul.f32 -1.442695, %v890_v38 }
 0x10f   :  { %1124 = vpow2.f32 %v970_v40 }
 0x11c   :  { %v1125_v41 = vpop.eup %1124 }
 0x11d   :  { %v898_v42 = vadd.f32 1.0, %v1125_v41 }
 0x11f   :  { %1126 = vrcp.f32 %v898_v42 }
 0x12c   :  { %v1127_v43 = vpop.eup %1126 }
 0x12d   :  { %901 = vst [vmem:[%s1387_s4] sm:$0x3] %v1127_v43 }

</bundles_post_ra>
